<compile_context>
chip_gen: v7x
topology: tpu7x:2x2x1
jax: 0.10.0
libtpu: 0.0.40
codegen_flags: <defaults>
</compile_context>

<pallas_src>
import jax
import jax.numpy as jnp
from jax.experimental import pallas as pl
from jax.experimental.pallas import tpu as pltpu


def _conv1d_k3_full(x, w_ref, b_ref):
    """Conv1d(kernel=3, pad=1) over all S rows of x as one fused matmul.

    x: (S, Din) value, w_ref: (3*Din, Dout), b_ref: (1, Dout) f32.
    Returns (S, Dout) in float32.
    """
    S = x.shape[0]
    rows = jax.lax.broadcasted_iota(jnp.int32, (S, 1), 0)
    zero = jnp.zeros((1, 1), x.dtype)
    # x_prev[t] = x[t-1] (zero at t=0); x_next[t] = x[t+1] (zero at t=S-1)
    x_prev = jnp.where(rows == 0, zero, pltpu.roll(x, shift=1, axis=0))
    x_next = jnp.where(rows == S - 1, zero, pltpu.roll(x, shift=S - 1, axis=0))
    x_cat = jnp.concatenate([x_prev, x, x_next], axis=-1)          # (S, 3*Din)
    return jnp.dot(x_cat, w_ref[...],
                   preferred_element_type=jnp.float32) + b_ref[...]


def _conv1d_k3_tile(x_ref, r0, tq, w_ref, b_ref):
    """Conv1d(kernel=3, pad=1) on rows [r0, r0+tq) of the resident (1,S,Din) slab."""
    S = x_ref.shape[1]
    x = x_ref[0, pl.ds(r0, tq), :]                                  # (tq, Din)
    # halo rows come straight from the already-resident input slab
    prev_row = x_ref[0, pl.ds(jnp.maximum(r0 - 1, 0), 1), :]        # (1, Din)
    next_row = x_ref[0, pl.ds(jnp.minimum(r0 + tq, S - 1), 1), :]   # (1, Din)
    prev_row = jnp.where(r0 == 0, jnp.zeros_like(prev_row), prev_row)
    next_row = jnp.where(r0 + tq == S, jnp.zeros_like(next_row), next_row)

    rows = jax.lax.broadcasted_iota(jnp.int32, (tq, 1), 0)
    x_prev = jnp.where(rows == 0, prev_row, pltpu.roll(x, shift=1, axis=0))
    x_next = jnp.where(rows == tq - 1, next_row, pltpu.roll(x, shift=tq - 1, axis=0))
    x_cat = jnp.concatenate([x_prev, x, x_next], axis=-1)           # (tq, 3*Din)
    return jnp.dot(x_cat, w_ref[...],
                   preferred_element_type=jnp.float32) + b_ref[...]


def _make_kernel(with_att):
    def kernel(q_ref, k_ref, v_ref,
               wq_ref, bq_ref, wk_ref, bk_ref, wv_ref, bv_ref,
               scale_ref, *rest):
        if with_att:
            out_ref, att_ref, k_scr, v_scr = rest
        else:
            out_ref, k_scr, v_scr = rest
            att_ref = None

        in_dtype = q_ref.dtype
        S = k_ref.shape[1]
        tq = out_ref.shape[1]
        qi = pl.program_id(1)

        # K/V conv projections over the full sequence, computed once per batch
        # element and kept in VMEM scratch across all q-tiles.
        @pl.when(qi == 0)
        def _():
            k_scr[...] = _conv1d_k3_full(k_ref[0], wk_ref, bk_ref).astype(k_scr.dtype)
            v_scr[...] = _conv1d_k3_full(v_ref[0], wv_ref, bv_ref).astype(v_scr.dtype)

        # Q conv projection for this TQ-row tile only.
        r0 = pl.multiple_of(qi * tq, tq)
        q_t = _conv1d_k3_tile(q_ref, r0, tq, wq_ref, bq_ref).astype(in_dtype)  # (tq, Dq)

        inv_scale = 1.0 / (float(q_t.shape[-1]) ** 0.5)             # 1/sqrt(dim_q)

        # scores = (q @ k^T) / sqrt(dim_q), f32 accumulation on the MXU
        scores = jax.lax.dot_general(
            q_t, k_scr[...], (((1,), (1,)), ((), ())),
            preferred_element_type=jnp.float32) * inv_scale         # (tq, S)

        # TODO(synk): optional boolean `mask` argument (masked_fill with -inf) is not
        # implemented; this kernel covers the mask=None path only.

        # numerically-stable softmax in f32; reciprocal on the EUP + 1 Newton step
        m = jnp.max(scores, axis=-1, keepdims=True)
        p = jnp.exp(scores - m)                                      # (tq, S)
        l = jnp.sum(p, axis=-1, keepdims=True)
        inv_l = pl.reciprocal(l, approx=True)
        inv_l = inv_l * (2.0 - l * inv_l)                            # refine to ~f32 exact

        # context = (p @ v) * inv_l * scale  (normalization folded into the scaling)
        ctx = jnp.dot(p.astype(in_dtype), v_scr[...],
                      preferred_element_type=jnp.float32)            # (tq, Dk)
        ctx = ctx * (inv_l * scale_ref[0])

        out_ref[0] = ctx.astype(out_ref.dtype)
        if att_ref is not None:
            att_ref[0] = (p * inv_l).astype(att_ref.dtype)
    return kernel


def kqvpcnn(query, key, value, wq, bq, wk, bk, wv, bv, scale,
            mask=None, return_att=True, tile_q=None):
    """query/key/value: (B, S, dim_in); wq: (3, dim_in, dim_q); wk/wv: (3, dim_in, dim_k).

    Feed bf16 activations for the bf16 MXU fast path (weights are cast to match).
    """
    assert mask is None, "mask path not implemented"
    B, S, Din = query.shape
    Dq = wq.shape[-1]
    Dk = wk.shape[-1]
    assert Dq == Dk, "module's bmm requires dim_q == dim_k"

    dtype = query.dtype
    itemsize = jnp.dtype(dtype).itemsize

    if tile_q is None:
        tile_q = 128 if S % 128 == 0 else S
    assert S % tile_q == 0, "sequence length must be divisible by tile_q"
    assert tile_q == S or tile_q % 8 == 0
    nq = S // tile_q

    # Fuse the three conv taps: (3, Din, D) -> (3*Din, D), matching
    # x_cat = [x_prev | x | x_next] inside the kernel.
    wq_f = wq.reshape(3 * Din, Dq).astype(dtype)
    wk_f = wk.reshape(3 * Din, Dk).astype(dtype)
    wv_f = wv.reshape(3 * Din, Dk).astype(dtype)
    bq2 = bq.reshape(1, Dq).astype(jnp.float32)
    bk2 = bk.reshape(1, Dk).astype(jnp.float32)
    bv2 = bv.reshape(1, Dk).astype(jnp.float32)
    scale1 = jnp.asarray(scale, jnp.float32).reshape(1)

    # cost estimate (conv tap matmuls + qk^T + att@v)
    flops = B * (2 * S * (3 * Din) * (Dq + 2 * Dk)
                 + 2 * S * S * Dq + 2 * S * S * Dk)
    transcendentals = B * S * S
    bytes_accessed = itemsize * (3 * B * S * Din + 3 * (3 * Din) * Dk + B * S * Dk)
    if return_att:
        bytes_accessed += itemsize * B * S * S

    # VMEM budget for the chosen tiles (raise scoped limit; cap at v7x physical)
    vmem_est = (2 * 3 * S * Din * itemsize                 # q/k/v slabs (double-buffered)
                + 2 * 3 * 3 * Din * Dk * itemsize          # fused weights (double-buffered)
                + 2 * S * Dk * itemsize                    # K/V conv scratch
                + 2 * tile_q * Dk * itemsize               # out blocks
                + (2 * tile_q * S * itemsize if return_att else 0)
                + 3 * tile_q * S * 4                       # f32 scores/p temporaries
                + 2 * S * 3 * Din * itemsize)              # conv concat temporaries
    vmem_limit = int(min(64 * 1024 * 1024, max(32 * 1024 * 1024, 2 * vmem_est)))

    per_b = lambda b, qi: (b, 0, 0)            # constant across qi -> no re-DMA
    const_w = lambda b, qi: (0, 0)             # grid-invariant weights/biases

    in_specs = [
        pl.BlockSpec((1, S, Din), per_b),      # query (full per-batch slab)
        pl.BlockSpec((1, S, Din), per_b),      # key
        pl.BlockSpec((1, S, Din), per_b),      # value
        pl.BlockSpec((3 * Din, Dq), const_w),  # Wq (taps fused)
        pl.BlockSpec((1, Dq), const_w),        # bq
        pl.BlockSpec((3 * Din, Dk), const_w),  # Wk
        pl.BlockSpec((1, Dk), const_w),        # bk
        pl.BlockSpec((3 * Din, Dk), const_w),  # Wv
        pl.BlockSpec((1, Dk), const_w),        # bv
        pl.BlockSpec(memory_space=pltpu.MemorySpace.SMEM),   # learnable scale
        # TODO(synk): weight specs could use pipeline_mode=pl.Buffered(1) to
        # single-buffer the grid-invariant weights at very large Din/Dk.
    ]
    out_block = pl.BlockSpec((1, tile_q, Dk), lambda b, qi: (b, qi, 0))
    att_block = pl.BlockSpec((1, tile_q, S), lambda b, qi: (b, qi, 0))

    if return_att:
        out_shape = (jax.ShapeDtypeStruct((B, S, Dk), dtype),
                     jax.ShapeDtypeStruct((B, S, S), dtype))
        out_specs = (out_block, att_block)
    else:
        out_shape = jax.ShapeDtypeStruct((B, S, Dk), dtype)
        out_specs = out_block

    result = pl.pallas_call(
        _make_kernel(return_att),
        out_shape=out_shape,
        grid=(B, nq),
        in_specs=in_specs,
        out_specs=out_specs,
        scratch_shapes=[pltpu.VMEM((S, Dk), dtype),      # K conv scratch
                        pltpu.VMEM((S, Dk), dtype)],     # V conv scratch
        compiler_params=pltpu.CompilerParams(
            dimension_semantics=("parallel", "arbitrary"),
            vmem_limit_bytes=vmem_limit),
        cost_estimate=pl.CostEstimate(flops=flops,
                                      transcendentals=transcendentals,
                                      bytes_accessed=bytes_accessed),
    )(query, key, value, wq_f, bq2, wk_f, bk2, wv_f, bv2, scale1)

    return result


if __name__ == "__main__":
    # Small, lane-dense demo shapes (S tiled into 2 q-tiles of 128 rows).
    B, S, Din, Dq, Dk = 2, 256, 128, 128, 128

    root = jax.random.PRNGKey(0)
    ks = jax.random.split(root, 9)

    q_in = jax.random.normal(ks[0], (B, S, Din), jnp.float32)
    k_in = jax.random.normal(ks[1], (B, S, Din), jnp.float32)
    v_in = jax.random.normal(ks[2], (B, S, Din), jnp.float32)

    # Conv1d-style init: uniform(-1/sqrt(fan_in), 1/sqrt(fan_in)), fan_in = Din * 3
    lim = 1.0 / ((Din * 3) ** 0.5)
    wq = jax.random.uniform(ks[3], (3, Din, Dq), jnp.float32, -lim, lim)
    bq = jax.random.uniform(ks[4], (Dq,), jnp.float32, -lim, lim)
    wk = jax.random.uniform(ks[5], (3, Din, Dk), jnp.float32, -lim, lim)
    bk = jax.random.uniform(ks[6], (Dk,), jnp.float32, -lim, lim)
    wv = jax.random.uniform(ks[7], (3, Din, Dk), jnp.float32, -lim, lim)
    bv = jax.random.uniform(ks[8], (Dk,), jnp.float32, -lim, lim)
    scale = jnp.float32(1.0)                             # nn.Parameter(torch.tensor(1.0))

    out, att = kqvpcnn(q_in, k_in, v_in, wq, bq, wk, bk, wv, bv, scale,
                       return_att=True)
    jax.block_until_ready((out, att))

    out_only = kqvpcnn(q_in, k_in, v_in, wq, bq, wk, bk, wv, bv, scale,
                       return_att=False)
    jax.block_until_ready(out_only)

    # ---- pure-JAX reference ----
    def conv_ref(x, w, b):
        xp = jnp.pad(x, ((0, 0), (1, 1), (0, 0)))
        return xp[:, :-2] @ w[0] + xp[:, 1:-1] @ w[1] + xp[:, 2:] @ w[2] + b

    Q = conv_ref(q_in, wq, bq)
    K = conv_ref(k_in, wk, bk)
    V = conv_ref(v_in, wv, bv)
    scores = jnp.einsum("bqd,bkd->bqk", Q, K) / (Dq ** 0.5)
    att_ref = jax.nn.softmax(scores, axis=-1)
    out_ref = scale * jnp.einsum("bqk,bkd->bqd", att_ref, V)

    assert jnp.allclose(att, att_ref, atol=1e-4, rtol=1e-4)
    assert jnp.allclose(out, out_ref, atol=1e-4, rtol=1e-4)
    assert jnp.allclose(out_only, out_ref, atol=1e-4, rtol=1e-4)

    print("KERNEL_OK")
</pallas_src>

<mosaic_0001>
module attributes {stable_mosaic.version = 11 : i64} {
  func.func @kernel(%arg0: i32, %arg1: i32, %arg2: memref<1x256x128xf32, #tpu.memory_space<vmem>>, %arg3: memref<1x256x128xf32, #tpu.memory_space<vmem>>, %arg4: memref<1x256x128xf32, #tpu.memory_space<vmem>>, %arg5: memref<384x128xf32, #tpu.memory_space<vmem>>, %arg6: memref<1x128xf32, #tpu.memory_space<vmem>>, %arg7: memref<384x128xf32, #tpu.memory_space<vmem>>, %arg8: memref<1x128xf32, #tpu.memory_space<vmem>>, %arg9: memref<384x128xf32, #tpu.memory_space<vmem>>, %arg10: memref<1x128xf32, #tpu.memory_space<vmem>>, %arg11: memref<1xf32, #tpu.memory_space<smem>>, %arg12: memref<1x128x128xf32, #tpu.memory_space<vmem>>, %arg13: memref<1x128x256xf32, #tpu.memory_space<vmem>>, %arg14: memref<256x128xf32, #tpu.memory_space<vmem>>, %arg15: memref<256x128xf32, #tpu.memory_space<vmem>>) attributes {dimension_semantics = [#tpu.dimension_semantics<parallel>, #tpu.dimension_semantics<arbitrary>], iteration_bounds = array<i64: 2, 2>, scalar_prefetch = 0 : i64, scratch_operands = 2 : i64, tpu.core_type = #tpu.core_type<tc>, window_params = [{transform_indices = @transform_0, window_bounds = array<i64: 1, 256, 128>}, {transform_indices = @transform_1, window_bounds = array<i64: 1, 256, 128>}, {transform_indices = @transform_2, window_bounds = array<i64: 1, 256, 128>}, {pipeline_mode = #tpu.pipeline_mode<synchronous>, transform_indices = @transform_3, window_bounds = array<i64: 384, 128>}, {pipeline_mode = #tpu.pipeline_mode<synchronous>, transform_indices = @transform_4, window_bounds = array<i64: 1, 128>}, {pipeline_mode = #tpu.pipeline_mode<synchronous>, transform_indices = @transform_5, window_bounds = array<i64: 384, 128>}, {pipeline_mode = #tpu.pipeline_mode<synchronous>, transform_indices = @transform_6, window_bounds = array<i64: 1, 128>}, {pipeline_mode = #tpu.pipeline_mode<synchronous>, transform_indices = @transform_7, window_bounds = array<i64: 384, 128>}, {pipeline_mode = #tpu.pipeline_mode<synchronous>, transform_indices = @transform_8, window_bounds = array<i64: 1, 128>}, {transform_indices = @transform_9, window_bounds = array<i64: 1>}, {transform_indices = @transform_10, window_bounds = array<i64: 1, 128, 128>}, {transform_indices = @transform_11, window_bounds = array<i64: 1, 128, 256>}]} {
    %c0_i32 = arith.constant 0 : i32
    %0 = arith.cmpi eq, %arg1, %c0_i32 : i32
    %1 = arith.extui %0 : i1 to i32
    %c0_i32_0 = arith.constant 0 : i32
    %2 = arith.cmpi ne, %1, %c0_i32_0 : i32
    scf.if %2 {
      %c0_36 = arith.constant 0 : index
      %c0_37 = arith.constant 0 : index
      %c0_38 = arith.constant 0 : index
      %79 = vector.load %arg3[%c0_36, %c0_37, %c0_38] : memref<1x256x128xf32, #tpu.memory_space<vmem>>, vector<1x256x128xf32>
      %80 = vector.shape_cast %79 : vector<1x256x128xf32> to vector<256x128xf32>
      %81 = tpu.iota {dimensions = array<i32: 0>} : vector<256x1xi32>
      %cst_39 = arith.constant 0.000000e+00 : f32
      %82 = vector.broadcast %cst_39 : f32 to vector<1x1xf32>
      %c0_i32_40 = arith.constant 0 : i32
      %83 = vector.broadcast %c0_i32_40 : i32 to vector<256x1xi32>
      %84 = arith.cmpi eq, %81, %83 : vector<256x1xi32>
      %c1_i32_41 = arith.constant 1 : i32
      %85 = tpu.dynamic_rotate %80 by %c1_i32_41 dim 0 : vector<256x128xf32>, i32 -> vector<256x128xf32>
      %86 = vector.shape_cast %84 : vector<256x1xi1> to vector<256x1xi1>
      %87 = vector.broadcast %86 : vector<256x1xi1> to vector<256x128xi1>
      %88 = vector.shape_cast %82 : vector<1x1xf32> to vector<1x1xf32>
      %89 = vector.broadcast %88 : vector<1x1xf32> to vector<256x128xf32>
      %90 = arith.select %87, %89, %85 : vector<256x128xi1>, vector<256x128xf32>
      %c255_i32_42 = arith.constant 255 : i32
      %91 = vector.broadcast %c255_i32_42 : i32 to vector<256x1xi32>
      %92 = arith.cmpi eq, %81, %91 : vector<256x1xi32>
      %c255_i32_43 = arith.constant 255 : i32
      %93 = tpu.dynamic_rotate %80 by %c255_i32_43 dim 0 : vector<256x128xf32>, i32 -> vector<256x128xf32>
      %94 = vector.shape_cast %92 : vector<256x1xi1> to vector<256x1xi1>
      %95 = vector.broadcast %94 : vector<256x1xi1> to vector<256x128xi1>
      %96 = vector.shape_cast %82 : vector<1x1xf32> to vector<1x1xf32>
      %97 = vector.broadcast %96 : vector<1x1xf32> to vector<256x128xf32>
      %98 = arith.select %95, %97, %93 : vector<256x128xi1>, vector<256x128xf32>
      %99 = tpu.concatenate %90, %80, %98 in 1 : vector<256x128xf32>, vector<256x128xf32>, vector<256x128xf32> -> vector<256x384xf32>
      %c0_44 = arith.constant 0 : index
      %c0_45 = arith.constant 0 : index
      %100 = vector.load %arg7[%c0_44, %c0_45] : memref<384x128xf32, #tpu.memory_space<vmem>>, vector<384x128xf32>
      %cst_46 = arith.constant dense<0.000000e+00> : vector<256x128xf32>
      %101 = tpu.matmul %99, %100, %cst_46 {dimension_numbers = #tpu.dot_dimension_numbers<[1], [0], [0], [1], [0, 0, 1, 1], [], []>} : vector<256x384xf32>, vector<384x128xf32>, vector<256x128xf32> -> vector<256x128xf32>
      %c0_47 = arith.constant 0 : index
      %c0_48 = arith.constant 0 : index
      %102 = vector.load %arg8[%c0_47, %c0_48] : memref<1x128xf32, #tpu.memory_space<vmem>>, vector<1x128xf32>
      %103 = vector.broadcast %102 : vector<1x128xf32> to vector<256x128xf32>
      %104 = arith.addf %101, %103 : vector<256x128xf32>
      %c0_49 = arith.constant 0 : index
      %c0_50 = arith.constant 0 : index
      %105 = vector.load %arg14[%c0_49, %c0_50] : memref<256x128xf32, #tpu.memory_space<vmem>>, vector<256x128xf32>
      tpu.vector_store %arg14[%c0_49, %c0_50], %104 {strides = array<i32>} : memref<256x128xf32, #tpu.memory_space<vmem>>, vector<256x128xf32>,
      %c0_51 = arith.constant 0 : index
      %c0_52 = arith.constant 0 : index
      %c0_53 = arith.constant 0 : index
      %106 = vector.load %arg4[%c0_51, %c0_52, %c0_53] : memref<1x256x128xf32, #tpu.memory_space<vmem>>, vector<1x256x128xf32>
      %107 = vector.shape_cast %106 : vector<1x256x128xf32> to vector<256x128xf32>
      %108 = tpu.iota {dimensions = array<i32: 0>} : vector<256x1xi32>
      %cst_54 = arith.constant 0.000000e+00 : f32
      %109 = vector.broadcast %cst_54 : f32 to vector<1x1xf32>
      %c0_i32_55 = arith.constant 0 : i32
      %110 = vector.broadcast %c0_i32_55 : i32 to vector<256x1xi32>
      %111 = arith.cmpi eq, %108, %110 : vector<256x1xi32>
      %c1_i32_56 = arith.constant 1 : i32
      %112 = tpu.dynamic_rotate %107 by %c1_i32_56 dim 0 : vector<256x128xf32>, i32 -> vector<256x128xf32>
      %113 = vector.shape_cast %111 : vector<256x1xi1> to vector<256x1xi1>
      %114 = vector.broadcast %113 : vector<256x1xi1> to vector<256x128xi1>
      %115 = vector.shape_cast %109 : vector<1x1xf32> to vector<1x1xf32>
      %116 = vector.broadcast %115 : vector<1x1xf32> to vector<256x128xf32>
      %117 = arith.select %114, %116, %112 : vector<256x128xi1>, vector<256x128xf32>
      %c255_i32_57 = arith.constant 255 : i32
      %118 = vector.broadcast %c255_i32_57 : i32 to vector<256x1xi32>
      %119 = arith.cmpi eq, %108, %118 : vector<256x1xi32>
      %c255_i32_58 = arith.constant 255 : i32
      %120 = tpu.dynamic_rotate %107 by %c255_i32_58 dim 0 : vector<256x128xf32>, i32 -> vector<256x128xf32>
      %121 = vector.shape_cast %119 : vector<256x1xi1> to vector<256x1xi1>
      %122 = vector.broadcast %121 : vector<256x1xi1> to vector<256x128xi1>
      %123 = vector.shape_cast %109 : vector<1x1xf32> to vector<1x1xf32>
      %124 = vector.broadcast %123 : vector<1x1xf32> to vector<256x128xf32>
      %125 = arith.select %122, %124, %120 : vector<256x128xi1>, vector<256x128xf32>
      %126 = tpu.concatenate %117, %107, %125 in 1 : vector<256x128xf32>, vector<256x128xf32>, vector<256x128xf32> -> vector<256x384xf32>
      %c0_59 = arith.constant 0 : index
      %c0_60 = arith.constant 0 : index
      %127 = vector.load %arg9[%c0_59, %c0_60] : memref<384x128xf32, #tpu.memory_space<vmem>>, vector<384x128xf32>
      %cst_61 = arith.constant dense<0.000000e+00> : vector<256x128xf32>
      %128 = tpu.matmul %126, %127, %cst_61 {dimension_numbers = #tpu.dot_dimension_numbers<[1], [0], [0], [1], [0, 0, 1, 1], [], []>} : vector<256x384xf32>, vector<384x128xf32>, vector<256x128xf32> -> vector<256x128xf32>
      %c0_62 = arith.constant 0 : index
      %c0_63 = arith.constant 0 : index
      %129 = vector.load %arg10[%c0_62, %c0_63] : memref<1x128xf32, #tpu.memory_space<vmem>>, vector<1x128xf32>
      %130 = vector.broadcast %129 : vector<1x128xf32> to vector<256x128xf32>
      %131 = arith.addf %128, %130 : vector<256x128xf32>
      %c0_64 = arith.constant 0 : index
      %c0_65 = arith.constant 0 : index
      %132 = vector.load %arg15[%c0_64, %c0_65] : memref<256x128xf32, #tpu.memory_space<vmem>>, vector<256x128xf32>
      tpu.vector_store %arg15[%c0_64, %c0_65], %131 {strides = array<i32>} : memref<256x128xf32, #tpu.memory_space<vmem>>, vector<256x128xf32>,
    } else {
    }
    %c128_i32 = arith.constant 128 : i32
    %3 = arith.muli %arg1, %c128_i32 : i32
    %4 = tpu.assume_multiple %3, 128 : i32
    %c0 = arith.constant 0 : index
    %5 = arith.index_cast %4 : i32 to index
    %c0_1 = arith.constant 0 : index
    %6 = vector.load %arg2[%c0, %5, %c0_1] : memref<1x256x128xf32, #tpu.memory_space<vmem>>, vector<1x128x128xf32>
    %7 = vector.shape_cast %6 : vector<1x128x128xf32> to vector<128x128xf32>
    %c1_i32 = arith.constant 1 : i32
    %8 = arith.subi %4, %c1_i32 : i32
    %c0_i32_2 = arith.constant 0 : i32
    %9 = arith.maxsi %8, %c0_i32_2 : i32
    %c0_3 = arith.constant 0 : index
    %10 = arith.index_cast %9 : i32 to index
    %c0_4 = arith.constant 0 : index
    %11 = vector.load %arg2[%c0_3, %10, %c0_4] : memref<1x256x128xf32, #tpu.memory_space<vmem>>, vector<1x1x128xf32>
    %12 = vector.shape_cast %11 : vector<1x1x128xf32> to vector<1x128xf32>
    %c128_i32_5 = arith.constant 128 : i32
    %13 = arith.addi %4, %c128_i32_5 : i32
    %c255_i32 = arith.constant 255 : i32
    %14 = arith.minsi %13, %c255_i32 : i32
    %c0_6 = arith.constant 0 : index
    %15 = arith.index_cast %14 : i32 to index
    %c0_7 = arith.constant 0 : index
    %16 = vector.load %arg2[%c0_6, %15, %c0_7] : memref<1x256x128xf32, #tpu.memory_space<vmem>>, vector<1x1x128xf32>
    %17 = vector.shape_cast %16 : vector<1x1x128xf32> to vector<1x128xf32>
    %c0_i32_8 = arith.constant 0 : i32
    %18 = arith.cmpi eq, %4, %c0_i32_8 : i32
    %cst = arith.constant 0.000000e+00 : f32
    %19 = vector.broadcast %cst : f32 to vector<1x128xf32>
    %20 = arith.select %18, %19, %12 : vector<1x128xf32>
    %c128_i32_9 = arith.constant 128 : i32
    %21 = arith.addi %4, %c128_i32_9 : i32
    %c256_i32 = arith.constant 256 : i32
    %22 = arith.cmpi eq, %21, %c256_i32 : i32
    %cst_10 = arith.constant 0.000000e+00 : f32
    %23 = vector.broadcast %cst_10 : f32 to vector<1x128xf32>
    %24 = arith.select %22, %23, %17 : vector<1x128xf32>
    %25 = tpu.iota {dimensions = array<i32: 0>} : vector<128x1xi32>
    %c0_i32_11 = arith.constant 0 : i32
    %26 = vector.broadcast %c0_i32_11 : i32 to vector<128x1xi32>
    %27 = arith.cmpi eq, %25, %26 : vector<128x1xi32>
    %c1_i32_12 = arith.constant 1 : i32
    %28 = tpu.dynamic_rotate %7 by %c1_i32_12 dim 0 : vector<128x128xf32>, i32 -> vector<128x128xf32>
    %29 = vector.shape_cast %27 : vector<128x1xi1> to vector<128x1xi1>
    %30 = vector.broadcast %29 : vector<128x1xi1> to vector<128x128xi1>
    %31 = vector.shape_cast %20 : vector<1x128xf32> to vector<1x128xf32>
    %32 = vector.broadcast %31 : vector<1x128xf32> to vector<128x128xf32>
    %33 = arith.select %30, %32, %28 : vector<128x128xi1>, vector<128x128xf32>
    %c127_i32 = arith.constant 127 : i32
    %34 = vector.broadcast %c127_i32 : i32 to vector<128x1xi32>
    %35 = arith.cmpi eq, %25, %34 : vector<128x1xi32>
    %c127_i32_13 = arith.constant 127 : i32
    %36 = tpu.dynamic_rotate %7 by %c127_i32_13 dim 0 : vector<128x128xf32>, i32 -> vector<128x128xf32>
    %37 = vector.shape_cast %35 : vector<128x1xi1> to vector<128x1xi1>
    %38 = vector.broadcast %37 : vector<128x1xi1> to vector<128x128xi1>
    %39 = vector.shape_cast %24 : vector<1x128xf32> to vector<1x128xf32>
    %40 = vector.broadcast %39 : vector<1x128xf32> to vector<128x128xf32>
    %41 = arith.select %38, %40, %36 : vector<128x128xi1>, vector<128x128xf32>
    %42 = tpu.concatenate %33, %7, %41 in 1 : vector<128x128xf32>, vector<128x128xf32>, vector<128x128xf32> -> vector<128x384xf32>
    %c0_14 = arith.constant 0 : index
    %c0_15 = arith.constant 0 : index
    %43 = vector.load %arg5[%c0_14, %c0_15] : memref<384x128xf32, #tpu.memory_space<vmem>>, vector<384x128xf32>
    %cst_16 = arith.constant dense<0.000000e+00> : vector<128x128xf32>
    %44 = tpu.matmul %42, %43, %cst_16 {dimension_numbers = #tpu.dot_dimension_numbers<[1], [0], [0], [1], [0, 0, 1, 1], [], []>} : vector<128x384xf32>, vector<384x128xf32>, vector<128x128xf32> -> vector<128x128xf32>
    %c0_17 = arith.constant 0 : index
    %c0_18 = arith.constant 0 : index
    %45 = vector.load %arg6[%c0_17, %c0_18] : memref<1x128xf32, #tpu.memory_space<vmem>>, vector<1x128xf32>
    %46 = vector.broadcast %45 : vector<1x128xf32> to vector<128x128xf32>
    %47 = arith.addf %44, %46 : vector<128x128xf32>
    %c0_19 = arith.constant 0 : index
    %c0_20 = arith.constant 0 : index
    %48 = vector.load %arg14[%c0_19, %c0_20] : memref<256x128xf32, #tpu.memory_space<vmem>>, vector<256x128xf32>
    %cst_21 = arith.constant dense<0.000000e+00> : vector<128x256xf32>
    %49 = tpu.matmul %47, %48, %cst_21 {dimension_numbers = #tpu.dot_dimension_numbers<[1], [1], [0], [0], [0, 0, 1, 0], [], []>} : vector<128x128xf32>, vector<256x128xf32>, vector<128x256xf32> -> vector<128x256xf32>
    %cst_22 = arith.constant 0.0883883461 : f32
    %50 = vector.broadcast %cst_22 : f32 to vector<128x256xf32>
    %51 = arith.mulf %49, %50 : vector<128x256xf32>
    %cst_23 = arith.constant dense<0xFF800000> : vector<128xf32>
    %52 = vector.multi_reduction <maximumf>, %51, %cst_23 [1] : vector<128x256xf32> to vector<128xf32>
    %53 = vector.shape_cast %52 : vector<128xf32> to vector<128x1xf32>
    %54 = vector.broadcast %53 : vector<128x1xf32> to vector<128x256xf32>
    %55 = arith.subf %51, %54 : vector<128x256xf32>
    %56 = math.exp %55 : vector<128x256xf32>
    %cst_24 = arith.constant dense<0.000000e+00> : vector<128xf32>
    %57 = vector.multi_reduction <add>, %56, %cst_24 [1] : vector<128x256xf32> to vector<128xf32>
    %58 = vector.shape_cast %57 : vector<128xf32> to vector<128x1xf32>
    %59 = tpu.reciprocal %58 {approx = true} : vector<128x1xf32> -> vector<128x1xf32>
    %60 = arith.mulf %58, %59 : vector<128x1xf32>
    %cst_25 = arith.constant 2.000000e+00 : f32
    %61 = vector.broadcast %cst_25 : f32 to vector<128x1xf32>
    %62 = arith.subf %61, %60 : vector<128x1xf32>
    %63 = arith.mulf %59, %62 : vector<128x1xf32>
    %c0_26 = arith.constant 0 : index
    %c0_27 = arith.constant 0 : index
    %64 = vector.load %arg15[%c0_26, %c0_27] : memref<256x128xf32, #tpu.memory_space<vmem>>, vector<256x128xf32>
    %cst_28 = arith.constant dense<0.000000e+00> : vector<128x128xf32>
    %65 = tpu.matmul %56, %64, %cst_28 {dimension_numbers = #tpu.dot_dimension_numbers<[1], [0], [0], [1], [0, 0, 1, 1], [], []>} : vector<128x256xf32>, vector<256x128xf32>, vector<128x128xf32> -> vector<128x128xf32>
    %c0_29 = arith.constant 0 : index
    %66 = memref.load %arg11[%c0_29] : memref<1xf32, #tpu.memory_space<smem>>
    %67 = vector.broadcast %66 : f32 to vector<128x1xf32>
    %68 = arith.mulf %63, %67 : vector<128x1xf32>
    %69 = vector.broadcast %68 : vector<128x1xf32> to vector<128x128xf32>
    %70 = arith.mulf %65, %69 : vector<128x128xf32>
    %c0_30 = arith.constant 0 : index
    %c0_31 = arith.constant 0 : index
    %c0_32 = arith.constant 0 : index
    %71 = vector.load %arg12[%c0_30, %c0_31, %c0_32] : memref<1x128x128xf32, #tpu.memory_space<vmem>>, vector<1x128x128xf32>
    %72 = vector.shape_cast %71 : vector<1x128x128xf32> to vector<128x128xf32>
    %73 = vector.shape_cast %70 : vector<128x128xf32> to vector<1x128x128xf32>
    tpu.vector_store %arg12[%c0_30, %c0_31, %c0_32], %73 {strides = array<i32>} : memref<1x128x128xf32, #tpu.memory_space<vmem>>, vector<1x128x128xf32>,
    %74 = vector.broadcast %63 : vector<128x1xf32> to vector<128x256xf32>
    %75 = arith.mulf %56, %74 : vector<128x256xf32>
    %c0_33 = arith.constant 0 : index
    %c0_34 = arith.constant 0 : index
    %c0_35 = arith.constant 0 : index
    %76 = vector.load %arg13[%c0_33, %c0_34, %c0_35] : memref<1x128x256xf32, #tpu.memory_space<vmem>>, vector<1x128x256xf32>
    %77 = vector.shape_cast %76 : vector<1x128x256xf32> to vector<128x256xf32>
    %78 = vector.shape_cast %75 : vector<128x256xf32> to vector<1x128x256xf32>
    tpu.vector_store %arg13[%c0_33, %c0_34, %c0_35], %78 {strides = array<i32>} : memref<1x128x256xf32, #tpu.memory_space<vmem>>, vector<1x128x256xf32>,
    return
  }
  func.func @transform_0(%arg0: i32, %arg1: i32) -> (i32, i32, i32) {
    %c0_i32 = arith.constant 0 : i32
    %c0_i32_0 = arith.constant 0 : i32
    %c0_i32_1 = arith.constant 0 : i32
    return %arg0, %c0_i32, %c0_i32_0 : i32, i32, i32
  }
  func.func @transform_1(%arg0: i32, %arg1: i32) -> (i32, i32, i32) {
    %c0_i32 = arith.constant 0 : i32
    %c0_i32_0 = arith.constant 0 : i32
    %c0_i32_1 = arith.constant 0 : i32
    return %arg0, %c0_i32, %c0_i32_0 : i32, i32, i32
  }
  func.func @transform_2(%arg0: i32, %arg1: i32) -> (i32, i32, i32) {
    %c0_i32 = arith.constant 0 : i32
    %c0_i32_0 = arith.constant 0 : i32
    %c0_i32_1 = arith.constant 0 : i32
    return %arg0, %c0_i32, %c0_i32_0 : i32, i32, i32
  }
  func.func @transform_3(%arg0: i32, %arg1: i32) -> (i32, i32) {
    %c0_i32 = arith.constant 0 : i32
    %c0_i32_0 = arith.constant 0 : i32
    %c0_i32_1 = arith.constant 0 : i32
    return %c0_i32, %c0_i32_0 : i32, i32
  }
  func.func @transform_4(%arg0: i32, %arg1: i32) -> (i32, i32) {
    %c0_i32 = arith.constant 0 : i32
    %c0_i32_0 = arith.constant 0 : i32
    %c0_i32_1 = arith.constant 0 : i32
    return %c0_i32, %c0_i32_0 : i32, i32
  }
  func.func @transform_5(%arg0: i32, %arg1: i32) -> (i32, i32) {
    %c0_i32 = arith.constant 0 : i32
    %c0_i32_0 = arith.constant 0 : i32
    %c0_i32_1 = arith.constant 0 : i32
    return %c0_i32, %c0_i32_0 : i32, i32
  }
  func.func @transform_6(%arg0: i32, %arg1: i32) -> (i32, i32) {
    %c0_i32 = arith.constant 0 : i32
    %c0_i32_0 = arith.constant 0 : i32
    %c0_i32_1 = arith.constant 0 : i32
    return %c0_i32, %c0_i32_0 : i32, i32
  }
  func.func @transform_7(%arg0: i32, %arg1: i32) -> (i32, i32) {
    %c0_i32 = arith.constant 0 : i32
    %c0_i32_0 = arith.constant 0 : i32
    %c0_i32_1 = arith.constant 0 : i32
    return %c0_i32, %c0_i32_0 : i32, i32
  }
  func.func @transform_8(%arg0: i32, %arg1: i32) -> (i32, i32) {
    %c0_i32 = arith.constant 0 : i32
    %c0_i32_0 = arith.constant 0 : i32
    %c0_i32_1 = arith.constant 0 : i32
    return %c0_i32, %c0_i32_0 : i32, i32
  }
  func.func @transform_9(%arg0: i32, %arg1: i32) -> i32 {
    %c0_i32 = arith.constant 0 : i32
    %c0_i32_0 = arith.constant 0 : i32
    return %c0_i32 : i32
  }
  func.func @transform_10(%arg0: i32, %arg1: i32) -> (i32, i32, i32) {
    %c0_i32 = arith.constant 0 : i32
    %c0_i32_0 = arith.constant 0 : i32
    return %arg0, %arg1, %c0_i32 : i32, i32, i32
  }
  func.func @transform_11(%arg0: i32, %arg1: i32) -> (i32, i32, i32) {
    %c0_i32 = arith.constant 0 : i32
    %c0_i32_0 = arith.constant 0 : i32
    return %arg0, %arg1, %c0_i32 : i32, i32, i32
  }
}

</mosaic_0001>

<bundles_post_ra>
// kernel: tpu_custom_call.1
= control target key start
LH: loop header
LB: loop body
LE: loop exit
PB: predicated region body
PF: predicated region fallthrough
CT: control target
= control target key end

     0   :  { %s7671_s0 = inlined_call_operand.hbm [shape: f32[2,256,128], index: 0, kind: input, shape index: {}]   ;;  %s7672_s1 = inlined_call_operand.hbm [shape: f32[2,256,128], index: 1, kind: input, shape index: {}]   ;;  %s7673_s2 = inlined_call_operand.hbm [shape: f32[2,256,128], index: 2, kind: input, shape index: {}]   ;;  %s7674_s3 = inlined_call_operand.hbm [shape: f32[384,128], index: 3, kind: input, shape index: {}]   ;;  %s7675_s4 = inlined_call_operand.vmem [shape: f32[1,128], index: 4, kind: input, shape index: {}]   ;;  %s7676_s5 = inlined_call_operand.hbm [shape: f32[384,128], index: 5, kind: input, shape index: {}]   ;;  %s7677_s6 = inlined_call_operand.vmem [shape: f32[1,128], index: 6, kind: input, shape index: {}]   ;;  %s7678_s7 = inlined_call_operand.hbm [shape: f32[384,128], index: 7, kind: input, shape index: {}]   ;;  %s7679_s8 = inlined_call_operand.vmem [shape: f32[1,128], index: 8, kind: input, shape index: {}]   ;;  %s7680_s9 = inlined_call_operand.<no memory space> [shape: f32[1], index: 9, kind: input, shape index: {}]   ;;  %s7681_s10 = inlined_call_operand.hbm [shape: f32[2,256,128], index: 10, kind: output, shape index: {0}]   ;;  %s7682_s11 = inlined_call_operand.hbm [shape: f32[2,256,256], index: 11, kind: output, shape index: {1}]  }
   0x1   :  { %7716 = sst [smem:[#allocation38_spill]] %s7672_s1 }
   0x2   :  { %7717 = sst [smem:[#allocation39_spill]] %s7674_s3 }
   0x3   :  { %7718 = sst [smem:[#allocation40_spill]] %s7675_s4 }
   0x4   :  { %7719 = sst [smem:[#allocation41_spill]] %s7677_s6 }
   0x5   :  { %7720 = sst [smem:[#allocation42_spill]] %s7679_s8 }
   0x6   :  { %7721 = sst [smem:[#allocation43_spill]] %s7681_s10 }
   0x7   :  { %7722 = sst [smem:[#allocation44_spill]] %s7682_s11 }
   0x8   :  { %17 = sst [smem:[#allocation4]] %s7680_s9 }
   0x9   :  { %18 = vsyncpa [#allocation6], 0 }
   0xa   :  { %20 = vsyncpa [#allocation6 + $0x1], 0 }
   0xb   :  { %21 = vsyncpa [#allocation9], 0 }
   0xc   :  { %23 = vsyncpa [#allocation9 + $0x1], 0 }
   0xd   :  { %24 = vsyncpa [#allocation12], 0 }
   0xe   :  { %25 = vsyncpa [#allocation15], 0 }
   0xf   :  { %26 = vsyncpa [#allocation7], 0 }
  0x10   :  { %28 = vsyncpa [#allocation7 + $0x1], 0 }
  0x11   :  { %29 = vsyncpa [#allocation18], 0 }
  0x12   :  { %31 = vsyncpa [#allocation18 + $0x1], 0  ;;  %s5520_s19 = smov 0   ;;  %s5522_s20 = smov 0  }
  0x13   :  { %s5524_s21 = smov 0   ;;  %s5526_s22 = smov 0  }
  0x14   :  { %s5528_s23 = smov 0   ;;  %s5530_s9 = smov 0  }
  0x15   :  { %s5532_s24 = smov 0   ;;  %s5534_s25 = smov 0  }
  0x16   :  { %s5536_s26 = smov 0   ;;  %s5538_s27 = smov 0  }
  0x17   :  { %s5540_s28 = smov 0  }
  0x18 LB: > { %7723 = sst [smem:[#allocation25_spill]] %s5400_s19  ;;  %s5574_s29 = sadd.s32 4294967295, %s5440_s28   ;;  %s5440_s28 = sphi %s5540_s28, %s37_s28   ;;  %s5436_s27 = sphi %s5538_s27, %s7790_s27   ;;  %s5432_s26 = sphi %s5536_s26, %s7789_s26   ;;  %s5428_s25 = sphi %s5534_s25, %s7788_s25   ;;  %s5424_s24 = sphi %s5532_s24, %s7787_s24   ;;  %s5420_s9 = sphi %s5530_s9, %s7795_s9   ;;  %s5416_s23 = sphi %s5528_s23, %s7794_s23   ;;  %s5412_s22 = sphi %s5526_s22, %s7793_s22   ;;  %s5408_s21 = sphi %s5524_s21, %s7785_s21   ;;  %s5404_s20 = sphi %s5522_s20, %s7792_s20   ;;  %s5400_s19 = sphi %s5520_s19, %s7791_s19  }
  0x19   : > { %7724 = sst [smem:[#allocation26_spill]] %s5408_s21  ;;  %s3922_s30 = sadd.s32 4294967294, %s5440_s28  }
  0x1a   : > { %7725 = sst [smem:[#allocation27_spill]] %s5424_s24  ;;  %p63_p0 = scmp.ne.s32.totalorder %s5420_s9, %s5416_s23 }
  0x1b   : > { %7726 = sst [smem:[#allocation28_spill]] %s5428_s25  ;;  %p64_p1 = scmp.eq.s32.totalorder %s5440_s28, 0 }
  0x1c   : > { %7727 = sst [smem:[#allocation29_spill]] %s5432_s26  ;;  %p69_p2 = scmp.ne.s32.totalorder %s5416_s23, %s5412_s22 }
  0x1d   : > { %7728 = sst [smem:[#allocation30_spill]] %s5436_s27  ;;  %p7690_p3 = scmp.eq.s32.totalorder %s5574_s29, 0 }
  0x1e   : > { %7729 = sst [smem:[#allocation31_spill]] %s5440_s28  ;;  %p5584_p4 = por %p64_p1, %p63_p0 }
  0x1f   : > { %p293_p5 = scmp.ne.s32.totalorder %s5408_s21, %s5404_s20  ;;  %p5592_p6 = por %p7690_p3, %p69_p2 }
  0x20   : > { %s7730_s14 = scalar_select %p5584_p4, 1, 0 }
  0x21   : > { %s7731_s15 = scalar_select %p5592_p6, 1, 0 }
  0x22   : > { %p294_p7 = scmp.eq.s32.totalorder %s5574_s29, 3  ;;  %p299_p8 = scmp.ne.s32.totalorder %s5404_s20, %s5400_s19 }
  0x23   : > { %p300_p9 = scmp.eq.s32.totalorder %s3922_s30, 3  ;;  %p3923_p11 = scmp.ge.s32.totalorder %s5440_s28, 1 }
  0x24   : > { %p5599_p10 = por %p294_p7, %p293_p5  ;;  %p335_p13 = scmp.lt.s32.totalorder %s5440_s28, 5 }
  0x25   : > { %p5604_p12 = por %p300_p9, %p299_p8  ;;  %s5442_s22 = smov [#allocation11]  }
  0x26   : > { %s7732_s16 = scalar_select %p5599_p10, 1, 0 }
  0x27   : > { %s7734_s17 = scalar_select %p5604_p12, 1, 0 }
  0x28   : > { %7733 = sst [smem:[#allocation32_spill]] %s7732_s16  ;;  %p5609_p0 = pnand %p3923_p11, %p335_p13 }
  0x29   : > { %7735 = sst [smem:[#allocation33_spill]] %s7734_s17  ;;  %s347_s13 = sshll.u32 %s5442_s22, 4  ;;  %s348_s13 = int_to_ptr.vmem [resolvable:$true] %s347_s13 }
  0x2a   : > { %s7736_s18 = scalar_select %p5609_p0, 1, 0 }
  0x2b   : > { %p4871_p1 = pneg %p5609_p0  ;;  %s46_s12 = sadd.s32 1, %s5432_s26 }
  0x2c   : > { %s7738_s3 = sld [smem:[#allocation39_spill]] }
  0x2d   : > { %p5617_p2 = pnand %p4871_p1, %p7690_p3 }
  0x2f   : > { %s7737_s30 = scalar_select %p5617_p2, 1, 0 }
  0x30   : > { %p5630_p7 = pneg %p5617_p2 }
  0x32   : > { %s5100_s10 = scalar_lea.hbm %s7738_s3, 6144 }
  0x33   : > { %p5101_p5 = scmp.ne.s32.totalorder %s7738_s3, %s5100_s10  ;;  %p5107_p11 = scmp.lt.u32.totalorder %s5100_s10, %s7738_s3 }
  0x34   : > { %s7739_s22 = scalar_select %p5630_p7, 1, 0 }
  0x35   : > { %p5103_p8 = pnand %p5630_p7, %p5101_p5 }
  0x37   : > { %p5104_p9 = pneg %p5103_p8 }
  0x39   : > { %p5109_p13 = pnand %p5107_p11, %p5104_p9 }
  0x3b   : > { %5112 = shalt.err (!%p5109_p13)
}
  0x3c   : > { %s5113_s19 = scalar_lea.vmem %s348_s13, 6144  ;;  %p5121_p10 = scmp.lt.s32.totalorder %s348_s13, %s348_s13 }
  0x3d   : > { %p5114_p1 = scmp.ne.s32.totalorder %s348_s13, %s5113_s19  ;;  %p5122_p6 = scmp.lt.s32.totalorder %s5113_s19, %s5113_s19 }
  0x3f   : > { %p5116_p3 = pnand %p5114_p1, %p5630_p7  ;;  %p5123_p0 = por %p5122_p6, %p5121_p10 }
  0x41   : > { %p5117_p12 = pneg %p5116_p3 }
  0x43   : > { %p5124_p4 = pnand %p5123_p0, %p5117_p12 }
  0x45   : > { %5127 = shalt.err (!%p5124_p4)
}
  0x46   : > { %s7694_s11 = smov 128   ;;  %s7696_s4 = smov 8  }
  0x47   : > { %4874 = dma.hbm_to_vmem [thread:$0]  (!%p5617_p2), %s7738_s3, 6144, %s348_s13, [#allocation12], %s7694_s11, %s7694_s11, %s7696_s4  }
  0x48   : > { %p47_p3 = scmp.ge.s32.totalorder %s46_s12, 2  ;;  %s49_s16 = sadd.s32 1, %s5436_s27 }
  0x49   : > { %p4901_p4 = scmp.lt.s32.totalorder %s5440_s28, 4  ;;  %s7698_s17 = sand.u32 1, %s5420_s9  }
  0x4a   : > { %s7797_s12 = smov (%p47_p3, %s46_s12), 0  ;;  %s7799_s16 = smov (!%p47_p3, %s49_s16), %s5436_s27 }
  0x4b   : > { %7740 = sst [smem:[#allocation34_spill]] %s7797_s12  ;;  %s279_s19 = ssub.s32 %s5432_s26, %s7797_s12 }
  0x4c   : > { %s5659_s8 = sshll.u32 %s7698_s17, 8  ;;  %p51_p6 = scmp.ge.s32.totalorder %s7799_s16, 2 }
  0x4d   : > { %s5662_s10 = sshll.u32 %s5436_s27, 12  ;;  %p7741_p10 = scmp.ne.s32.totalorder %s7730_s14, 0 }
  0x4e   : > { %s420_s25 = sand.u32 1, %s5440_s28   ;;  %s7801_s16 = smov (%p51_p6, %s7799_s16), 0 }
  0x4f   : > { %p5666_p12 = pnand %p4901_p4, %p7741_p10  ;;  %7743 = sst [smem:[#allocation35_spill]] %s7801_s16 }
  0x50   : > { %s53_s11 = ssub.s32 %s5436_s27, %s7801_s16  ;;  %s7744_s1 = sld [smem:[#allocation38_spill]] }
  0x51   : > { %s7742_s13 = scalar_select %p5666_p12, 1, 0 }
  0x52   : > { %p54_p0 = scmp.eq.s32.totalorder %s53_s11, 0  ;;  %s280_s4 = sor.u32 %s279_s19, %s53_s11 }
  0x53   : > { %p281_p5 = scmp.eq.s32.totalorder %s280_s4, 0  ;;  %s7745_s14 = sadd.s32 1, %s5420_s9 }
  0x54   : > { %s5684_s26 = scalar_select %p54_p0, %s5420_s9, %s7745_s14  }
  0x55   : > { %s7747_s28 = sadd.s32 1, %s5408_s21  ;;  %s424_s24 = scalar_lea.vmem [#allocation8], %s5659_s8 }
  0x56   : > { %s5679_s12 = scalar_lea.hbm %s7744_s1, %s5662_s10  ;;  %7746 = sst [smem:[#allocation36_spill]] %s5684_s26 }
  0x57   : > { %s5689_s6 = scalar_select %p281_p5, %s5408_s21, %s7747_s28  }
  0x58   : > { %s431_s16 = sshll.u32 %s424_s24, 4  ;;  %s5445_s11 = smov [#allocation13]   ;;  %s5692_s16 = int_to_ptr.vmem [resolvable:$true] %s431_s16 }
  0x59   : > { %7748 = sst [smem:[#allocation37_spill]] %s5689_s6  ;;  %s5694_s4 = sshll.u32 %s5445_s11, 4  ;;  %s364_s4 = int_to_ptr.vmem [resolvable:$true] %s5694_s4 }
  0x5a   : > { %s5696_s3 = scalar_lea.sflag [#allocation9], %s420_s25  ;;  %s5128_s17 = scalar_lea.hbm %s5679_s12, 4096 }
  0x5b   : > { %p5129_p8 = scmp.ne.s32.totalorder %s5679_s12, %s5128_s17  ;;  %p5702_p9 = pneg %p5666_p12 }
  0x5c   : > { %s5133_s14 = scalar_lea.hbm %s7744_s1, 8192  ;;  %p5134_p1 = scmp.lt.u32.totalorder %s5679_s12, %s7744_s1 }
  0x5d   : > { %s7749_s19 = scalar_select %p5702_p9, 1, 0 }
  0x5e   : > { %p5131_p11 = pnand %p5702_p9, %p5129_p8  ;;  %p5135_p3 = scmp.lt.u32.totalorder %s5133_s14, %s5128_s17 }
  0x5f   : > { %p5137_p6 = scmp.lt.u32.totalorder %s5128_s17, %s5679_s12 }
  0x60   : > { %p5132_p13 = pneg %p5131_p11  ;;  %p5136_p4 = por %p5135_p3, %p5134_p1 }
  0x62   : > { %p5138_p10 = por %p5137_p6, %p5136_p4 }
  0x64   : > { %p5139_p0 = pnand %p5138_p10, %p5132_p13 }
  0x66   : > { %5142 = shalt.err (!%p5139_p0)
}
  0x67   : > { %s5143_s25 = scalar_lea.vmem %s5692_s16, 4096  ;;  %s5446_s28 = smov [#allocation8]  }
  0x68   : > { %p5144_p5 = scmp.ne.s32.totalorder %s5692_s16, %s5143_s25  ;;  %s5148_s24 = sshll.u32 %s5446_s28, 4  ;;  %s5149_s24 = int_to_ptr.vmem [resolvable:$false] %s5148_s24 }
  0x69   : > { %s5150_s27 = scalar_lea.vmem %s5149_s24, 8192  ;;  %p5151_p2 = scmp.lt.s32.totalorder %s5692_s16, %s5149_s24 }
  0x6a   : > { %p5146_p8 = pnand %p5144_p5, %p5702_p9  ;;  %p5152_p7 = scmp.lt.s32.totalorder %s5150_s27, %s5143_s25 }
  0x6c   : > { %p5147_p11 = pneg %p5146_p8  ;;  %p5153_p1 = por %p5152_p7, %p5151_p2 }
  0x6e   : > { %p5154_p3 = pnand %p5153_p1, %p5147_p11 }
  0x70   : > { %5157 = shalt.err (!%p5154_p3)
}
  0x71   : > { %s7750_s17 = smov 8   ;;  %s7751_s14 = smov 128  }
  0x72   : > { %4887 = dma.hbm_to_vmem [thread:$0]  (!%p5666_p12), %s5679_s12, 4096, %s5692_s16, %s5696_s3, %s7751_s14, %s7751_s14, %s7750_s17  }
  0x73   : > { %s5158_s24 = scalar_lea.hbm %s7676_s5, 6144  ;;  %p7752_p7 = scmp.ne.s32.totalorder %s7739_s22, 0 }
  0x74   : > { %p5159_p2 = scmp.ne.s32.totalorder %s7676_s5, %s5158_s24  ;;  %p5165_p6 = scmp.lt.u32.totalorder %s5158_s24, %s7676_s5 }
  0x76   : > { %p5161_p13 = pnand %p5159_p2, %p7752_p7 }
  0x78   : > { %p5162_p4 = pneg %p5161_p13 }
  0x7a   : > { %p5167_p10 = pnand %p5165_p6, %p5162_p4 }
  0x7c   : > { %5170 = shalt.err (!%p5167_p10)
}
  0x7d   : > { %s5171_s6 = scalar_lea.vmem %s364_s4, 6144  ;;  %p5179_p11 = scmp.lt.s32.totalorder %s364_s4, %s364_s4 }
  0x7e   : > { %p5172_p0 = scmp.ne.s32.totalorder %s364_s4, %s5171_s6  ;;  %p5180_p1 = scmp.lt.s32.totalorder %s5171_s6, %s5171_s6 }
  0x80   : > { %p5174_p5 = pnand %p5172_p0, %p7752_p7  ;;  %p5181_p3 = por %p5180_p1, %p5179_p11 }
  0x82   : > { %p5175_p8 = pneg %p5174_p5 }
  0x84   : > { %p5182_p12 = pnand %p5181_p3, %p5175_p8 }
  0x86   : > { %5185 = shalt.err (!%p5182_p12)
}
  0x87   : > { %p7753_p2 = scmp.ne.s32.totalorder %s7737_s30, 0  ;;  %s5447_s12 = smov [#allocation14]  }
  0x88   : > { %s379_s16 = sshll.u32 %s5447_s12, 4  ;;  %s5186_s6 = scalar_lea.hbm %s7678_s7, 6144  ;;  %s380_s16 = int_to_ptr.vmem [resolvable:$true] %s379_s16 }
  0x89   : > { %4877 = dma.hbm_to_vmem [thread:$0]  (!%p7753_p2), %s7676_s5, 6144, %s364_s4, [#allocation12], %s7751_s14, %s7751_s14, %s7750_s17  }
  0x8a   : > { %p5187_p12 = scmp.ne.s32.totalorder %s7678_s7, %s5186_s6  ;;  %p5193_p6 = scmp.lt.u32.totalorder %s5186_s6, %s7678_s7 }
  0x8c   : > { %p5189_p13 = pnand %p5187_p12, %p7752_p7 }
  0x8e   : > { %p5190_p4 = pneg %p5189_p13 }
  0x90   : > { %p5195_p10 = pnand %p5193_p6, %p5190_p4 }
  0x92   : > { %5198 = shalt.err (!%p5195_p10)
}
  0x93   : > { %s5199_s4 = scalar_lea.vmem %s380_s16, 6144  ;;  %p5207_p11 = scmp.lt.s32.totalorder %s380_s16, %s380_s16 }
  0x94   : > { %p5200_p0 = scmp.ne.s32.totalorder %s380_s16, %s5199_s4  ;;  %p5208_p1 = scmp.lt.s32.totalorder %s5199_s4, %s5199_s4 }
  0x96   : > { %p5202_p5 = pnand %p5200_p0, %p7752_p7  ;;  %p5209_p3 = por %p5208_p1, %p5207_p11 }
  0x98   : > { %p5203_p8 = pneg %p5202_p5 }
  0x9a   : > { %p5210_p9 = pnand %p5209_p3, %p5203_p8 }
  0x9c   : > { %5213 = shalt.err (!%p5210_p9)
}
  0x9d   : > { %4880 = dma.hbm_to_vmem [thread:$0]  (!%p7753_p2), %s7678_s7, 6144, %s380_s16, [#allocation15], %s7751_s14, %s7751_s14, %s7750_s17  }
  0x9e   : > { %s5776_s12 = scalar_lea.hbm %s7671_s0, %s5662_s10  ;;  %s403_s30 = scalar_lea.vmem [#allocation5], %s5659_s8 }
  0x9f   : > { %s410_s11 = sshll.u32 %s403_s30, 4  ;;  %s7754_s28 = sand.u32 1, %s5420_s9   ;;  %s5779_s11 = int_to_ptr.vmem [resolvable:$true] %s410_s11 }
  0xa0   : > { %s5783_s6 = scalar_lea.sflag [#allocation6], %s7754_s28  ;;  %s5214_s24 = scalar_lea.hbm %s5776_s12, 4096 }
  0xa1   : > { %p5215_p9 = scmp.ne.s32.totalorder %s5776_s12, %s5214_s24  ;;  %p7755_p7 = scmp.ne.s32.totalorder %s7749_s19, 0 }
  0xa2   : > { %s5219_s27 = scalar_lea.hbm %s7671_s0, 8192  ;;  %p5220_p13 = scmp.lt.u32.totalorder %s5776_s12, %s7671_s0 }
  0xa3   : > { %p5217_p2 = pnand %p5215_p9, %p7755_p7  ;;  %p5221_p4 = scmp.lt.u32.totalorder %s5219_s27, %s5214_s24 }
  0xa4   : > { %p5223_p10 = scmp.lt.u32.totalorder %s5214_s24, %s5776_s12 }
  0xa5   : > { %p5218_p12 = pneg %p5217_p2  ;;  %p5222_p6 = por %p5221_p4, %p5220_p13 }
  0xa7   : > { %p5224_p0 = por %p5223_p10, %p5222_p6 }
  0xa9   : > { %p5225_p5 = pnand %p5224_p0, %p5218_p12 }
  0xab   : > { %5228 = shalt.err (!%p5225_p5)
}
  0xac   : > { %s5229_s1 = scalar_lea.vmem %s5779_s11, 4096  ;;  %s5448_s22 = smov [#allocation5]  }
  0xad   : > { %p5230_p8 = scmp.ne.s32.totalorder %s5779_s11, %s5229_s1  ;;  %s5234_s26 = sshll.u32 %s5448_s22, 4  ;;  %s5235_s26 = int_to_ptr.vmem [resolvable:$false] %s5234_s26 }
  0xae   : > { %s5236_s30 = scalar_lea.vmem %s5235_s26, 8192  ;;  %p5237_p3 = scmp.lt.s32.totalorder %s5779_s11, %s5235_s26 }
  0xaf   : > { %p5232_p11 = pnand %p5230_p8, %p7755_p7  ;;  %p5238_p9 = scmp.lt.s32.totalorder %s5236_s30, %s5229_s1 }
  0xb1   : > { %p5233_p1 = pneg %p5232_p11  ;;  %p5239_p2 = por %p5238_p9, %p5237_p3 }
  0xb3   : > { %p5240_p13 = pnand %p5239_p2, %p5233_p1 }
  0xb5   : > { %5243 = shalt.err (!%p5240_p13)
}
  0xb6   : > { %p7756_p12 = scmp.ne.s32.totalorder %s7742_s13, 0  ;;  %s5814_s16 = scalar_lea.hbm %s7673_s2, %s5662_s10 }
  0xb7   : > { %s445_s25 = scalar_lea.vmem [#allocation10], %s5659_s8  ;;  %s5244_s4 = scalar_lea.hbm %s5814_s16, 4096 }
  0xb8   : > { %4884 = dma.hbm_to_vmem [thread:$0]  (!%p7756_p12), %s5776_s12, 4096, %s5779_s11, %s5783_s6, %s7751_s14, %s7751_s14, %s7750_s17  }
  0xb9   : > { %s452_s27 = sshll.u32 %s445_s25, 4  ;;  %p5245_p4 = scmp.ne.s32.totalorder %s5814_s16, %s5244_s4  ;;  %s5817_s27 = int_to_ptr.vmem [resolvable:$true] %s452_s27 }
  0xba   : > { %s5249_s11 = scalar_lea.hbm %s7673_s2, 8192  ;;  %p5250_p0 = scmp.lt.u32.totalorder %s5814_s16, %s7673_s2 }
  0xbb   : > { %p5247_p6 = pnand %p5245_p4, %p7755_p7  ;;  %p5251_p5 = scmp.lt.u32.totalorder %s5249_s11, %s5244_s4 }
  0xbc   : > { %p5253_p11 = scmp.lt.u32.totalorder %s5244_s4, %s5814_s16 }
  0xbd   : > { %p5248_p10 = pneg %p5247_p6  ;;  %p5252_p8 = por %p5251_p5, %p5250_p0 }
  0xbf   : > { %p5254_p1 = por %p5253_p11, %p5252_p8 }
  0xc1   : > { %p5255_p3 = pnand %p5254_p1, %p5248_p10 }
  0xc3   : > { %5258 = shalt.err (!%p5255_p3)
}
  0xc4   : > { %s5259_s8 = scalar_lea.vmem %s5817_s27, 4096  ;;  %s5449_s1 = smov [#allocation10]  }
  0xc5   : > { %p5260_p9 = scmp.ne.s32.totalorder %s5817_s27, %s5259_s8  ;;  %s5264_s22 = sshll.u32 %s5449_s1, 4  ;;  %s5265_s22 = int_to_ptr.vmem [resolvable:$false] %s5264_s22 }
  0xc6   : > { %s5266_s26 = scalar_lea.vmem %s5265_s22, 8192  ;;  %p5267_p4 = scmp.lt.s32.totalorder %s5817_s27, %s5265_s22 }
  0xc7   : > { %p5262_p2 = pnand %p5260_p9, %p7755_p7  ;;  %p5268_p6 = scmp.lt.s32.totalorder %s5266_s26, %s5259_s8 }
  0xc9   : > { %p5263_p13 = pneg %p5262_p2  ;;  %p5269_p0 = por %p5268_p6, %p5267_p4 }
  0xcb   : > { %p5270_p5 = pnand %p5269_p0, %p5263_p13 }
  0xcd   : > { %5273 = shalt.err (!%p5270_p5)
}
  0xce   : > { %4890 = dma.hbm_to_vmem [thread:$0]  (!%p7756_p12), %s5814_s16, 4096, %s5817_s27, %s5696_s3, %s7751_s14, %s7751_s14, %s7750_s17  }
  0xcf   : > { %p7757_p7 = scmp.ne.s32.totalorder %s7736_s18, 0 }
  0xd0   : > { %s466_s19 = sand.u32 (!%p7757_p7), 1, %s5416_s23   ;;  %p7758_p10 = scmp.ne.s32.totalorder (!%p7757_p7), %s7731_s15, 0 }
  0xd1   : > { %464 = sbr.rel (%p7757_p7) target bundleno = 1613 (0x64d), region = 60  ;;  %s3938_s30 = sshll.u32 (!%p7757_p7), %s466_s19, 8 }
  0xd2   : > { %s467_s28 = scalar_lea.sflag (!%p7757_p7), [#allocation6], %s466_s19  ;;  %s5847_s24 = scalar_lea.vmem (!%p7757_p7), [#allocation5], %s3938_s30 }
  0xd8   : > { %5375 = dma.done.wait (%p7758_p10), %s467_s28, 4096  }
  0xd9   : > { %5377 = vsyncadd (%p7758_p10), %s467_s28, 4294963200  ;;  %s475_s13 = sand.u32 1, %s5574_s29   ;;  %s5854_s3 = scalar_lea.vmem [#allocation8], %s3938_s30 }
  0xda   : > { %s476_s25 = scalar_lea.sflag [#allocation9], %s475_s13 }
  0xdb   : > { %5379 = dma.done.wait (%p7758_p10), %s476_s25, 8192  }
  0xdc   : > { %5381 = vsyncadd (%p7758_p10), %s476_s25, 4294959104  ;;  %s5860_s18 = scalar_lea.vmem [#allocation10], %s3938_s30  ;;  %p7759_p12 = scmp.eq.s32.totalorder %s5574_s29, 0 }
  0xde   : > { %5383 = dma.done.wait (%p7759_p12), [#allocation12], 12288   ;;  %p7760_p8 = pmov %p7759_p12 }
  0xe0   : > { %5385 = vsyncadd (%p7760_p8), [#allocation12], 4294955008  ;;  %p7761_p11 = pmov %p7760_p8 }
  0xe1   : > { %p7762_p1 = pmov %p7760_p8 }
  0xe2   : > { %5387 = dma.done.wait (%p7761_p11), [#allocation15], 6144  }
  0xe3   : > { %5389 = vsyncadd (%p7762_p1), [#allocation15], 4294961152  ;;  %s5871_s17 = sand.u32 1, %s5404_s20   ;;  %s7763_s4 = sld [smem:[#allocation27_spill]] }
  0xe4   : > { %s3944_s15 = sshll.u32 %s5871_s17, 7  ;;  %s3945_s14 = sshll.u32 %s5871_s17, 8 }
  0xe5   : > { %s5875_s16 = scalar_lea.vmem [#allocation16], %s3944_s15  ;;  %s5877_s27 = scalar_lea.vmem [#allocation17], %s3945_s14 }
  0xe9   : > { %p3946_p3 = scmp.ne.s32.totalorder %s7763_s4, 0 }
  0xea   : > { %v1011_v0 = vld [vmem:[#allocation13] sm:$0xff] (!%p3946_p3)  ;;  %v1012_v1 = vld [vmem:[#allocation13 + $0x8] sm:$0xff] (!%p3946_p3)  ;;  %v5450_v3 = vmov (!%p3946_p3), 0.0|0.0   ;;  %v1013_v6 = vld [vmem:[#allocation13 + $0x10] sm:$0xff] (!%p3946_p3)  ;;  %v592_v15 = vlaneseq (!%p3946_p3)  ;;  %s7765_s12 = sld [smem:[#allocation41_spill]] (!%p3946_p3)  ;;  %s7766_s10 = sld [smem:[#allocation42_spill]] (!%p3946_p3) }
  0xeb   : > { %559 = sbr.rel (%p3946_p3) target bundleno = 690 (0x2b2), region = 88  ;;  %v1043_v2 = vld [vmem:[#allocation13 + $0x100] sm:$0xff] (!%p3946_p3)  ;;  %4545 = vmatprep.subr.bf16.mxu0 (!%p3946_p3), %v5450_v3  ;;  %v4546_v4 = vpack.c.bf16 (!%p3946_p3), %v1012_v1, %v1011_v0  ;;  %v1044_v5 = vld [vmem:[#allocation13 + $0x108] sm:$0xff] (!%p3946_p3)  ;;  %v1014_v7 = vld [vmem:[#allocation13 + $0x18] sm:$0xff] (!%p3946_p3) }
  0xec   : > { %v4593_v8 = vpack.c.bf16 (!%p3946_p3), %v1044_v5, %v1043_v2  ;;  %v1045_v9 = vld [vmem:[#allocation13 + $0x110] sm:$0xff] (!%p3946_p3)  ;;  %v1046_v10 = vld [vmem:[#allocation13 + $0x118] sm:$0xff] (!%p3946_p3)  ;;  %v4549_v11 = vpack.c.bf16 (!%p3946_p3), %v1014_v7, %v1013_v6  ;;  %v1047_v13 = vld [vmem:[#allocation13 + $0x120] sm:$0xff] (!%p3946_p3)  ;;  %v5882_v22 = vshrl.u32 (!%p3946_p3), %v592_v15, 7 }
  0xed   : > { %4547 = vmatpush1.bf16.msra.mxu0 (!%p3946_p3), %v4546_v4  ;;  %v4597_v12 = vpack.c.bf16 (!%p3946_p3), %v1046_v10, %v1045_v9  ;;  %v1048_v14 = vld [vmem:[#allocation13 + $0x128] sm:$0xff] (!%p3946_p3)  ;;  %v1015_v16 = vld [vmem:[#allocation13 + $0x20] sm:$0xff] (!%p3946_p3)  ;;  %v1049_v20 = vld [vmem:[#allocation13 + $0x130] sm:$0xff] (!%p3946_p3) }
  0xee   : > { %4594 = vmatprep.subr.bf16.mxu1 (!%p3946_p3), %v4593_v8  ;;  %4548 = vmatprep.subr.bf16.mxu0 (!%p3946_p3), %v5450_v3  ;;  %v1016_v17 = vld [vmem:[#allocation13 + $0x28] sm:$0xff] (!%p3946_p3)  ;;  %v4601_v18 = vpack.c.bf16 (!%p3946_p3), %v1048_v14, %v1047_v13  ;;  %v1050_v21 = vld [vmem:[#allocation13 + $0x138] sm:$0xff] (!%p3946_p3)  ;;  %v1017_v23 = vld [vmem:[#allocation13 + $0x30] sm:$0xff] (!%p3946_p3)  ;;  %vm882_vm0 = vcmp.lt.s32.totalorder (!%p3946_p3), %v5882_v22, 7  ;;  %vm689_vm1 = vcmp.lt.s32.totalorder (!%p3946_p3), %v5882_v22, 1  ;;  %vm3975_vm2 = vcmp.ne.s32.totalorder (!%p3946_p3), %v5882_v22, 0 }
  0xef   : > { %4596 = vmatpush3.bf16.msra.mxu1 (!%p3946_p3), %v4593_v8  ;;  %v4552_v19 = vpack.c.bf16 (!%p3946_p3), %v1016_v17, %v1015_v16  ;;  %v1018_v24 = vld [vmem:[#allocation13 + $0x38] sm:$0xff] (!%p3946_p3)  ;;  %v4605_v25 = vpack.c.bf16 (!%p3946_p3), %v1050_v21, %v1049_v20  ;;  %v5886_v26 = vld [vmem:[%s5854_s3] sm:$0xff] (!%p3946_p3)  ;;  %v1052_v29 = vld [vmem:[#allocation13 + $0x148] sm:$0xff] (!%p3946_p3) }
  0xf0   : > { %4598 = vmatprep.subr.bf16.mxu1 (!%p3946_p3), %v4597_v12  ;;  %v4555_v27 = vpack.c.bf16 (!%p3946_p3), %v1018_v24, %v1017_v23  ;;  %v1051_v28 = vld [vmem:[#allocation13 + $0x140] sm:$0xff] (!%p3946_p3)  ;;  %v5889_v30 = vld [vmem:[%s5854_s3 + $0x8] sm:$0xff] (!%p3946_p3)  ;;  %v850_v31 = vrot.slane (!%p3946_p3), %v5886_v26, 1  ;;  %1130 = vmatprep.mubr.f32.mxu0 (!%p3946_p3), %v5886_v26  ;;  %v1053_v38 = vld [vmem:[#allocation13 + $0x150] sm:$0xff] (!%p3946_p3) }
  0xf1   : > { %4550 = vmatpush1.bf16.msra.mxu0 (!%p3946_p3), %v4549_v11  ;;  %v1019_v32 = vld [vmem:[#allocation13 + $0x40] sm:$0xff] (!%p3946_p3)  ;;  %v1020_v33 = vld [vmem:[#allocation13 + $0x48] sm:$0xff] (!%p3946_p3)  ;;  %v851_v34 = vrot.slane (!%p3946_p3), %v5889_v30, 1  ;;  %v4609_v35 = vpack.c.bf16 (!%p3946_p3), %v1052_v29, %v1051_v28  ;;  %v1054_v39 = vld [vmem:[#allocation13 + $0x158] sm:$0xff] (!%p3946_p3) }
  0xf2   : > { %4551 = vmatprep.subr.bf16.mxu0 %v5450_v3  ;;  %v4558_v37 = vpack.c.bf16 %v1020_v33, %v1019_v32  ;;  %v1021_v40 = vld [vmem:[#allocation13 + $0x50] sm:$0xff]  ;;  %v1022_v41 = vld [vmem:[#allocation13 + $0x58] sm:$0xff]  ;;  %v4613_v42 = vpack.c.bf16 %v1054_v39, %v1053_v38  ;;  %v1055_v44 = vld [vmem:[#allocation13 + $0x160] sm:$0xff] }
  0xf3   : > { %4600 = vmatpush3.bf16.msra.mxu1 %v4597_v12  ;;  %v913_v36 = vsel %vm882_vm0, %v850_v31, %v851_v34  ;;  %v4561_v43 = vpack.c.bf16 %v1022_v41, %v1021_v40  ;;  %v1056_v45 = vld [vmem:[#allocation13 + $0x168] sm:$0xff]  ;;  %v1023_v46 = vld [vmem:[#allocation13 + $0x60] sm:$0xff]  ;;  %v1057_v50 = vld [vmem:[#allocation13 + $0x170] sm:$0xff] }
  0xf4   : > { %4602 = vmatprep.subr.bf16.mxu1 %v4601_v18  ;;  %4361 = vmatprep.mubr.f32.mxu1 %v913_v36  ;;  %v1024_v47 = vld [vmem:[#allocation13 + $0x68] sm:$0xff]  ;;  %v4617_v48 = vpack.c.bf16 %v1056_v45, %v1055_v44  ;;  %v1058_v51 = vld [vmem:[#allocation13 + $0x178] sm:$0xff]  ;;  %v1025_v52 = vld [vmem:[#allocation13 + $0x70] sm:$0xff] }
  0xf5   : > { %4553 = vmatpush1.bf16.msra.mxu0 %v4552_v19  ;;  %v4564_v49 = vpack.c.bf16 %v1024_v47, %v1023_v46  ;;  %v1026_v53 = vld [vmem:[#allocation13 + $0x78] sm:$0xff]  ;;  %v4621_v54 = vpack.c.bf16 %v1058_v51, %v1057_v50  ;;  %v5904_v55 = vld [vmem:[%s5854_s3 + $0x10] sm:$0xff]  ;;  %v1027_v58 = vld [vmem:[#allocation13 + $0x80] sm:$0xff] }
  0xf6   : > { %4554 = vmatprep.subr.bf16.mxu0 %v5450_v3  ;;  %v4567_v56 = vpack.c.bf16 %v1026_v53, %v1025_v52  ;;  %v5907_v57 = vld [vmem:[%s5854_s3 + $0x18] sm:$0xff]  ;;  %v1028_v59 = vld [vmem:[#allocation13 + $0x88] sm:$0xff]  ;;  %v852_v60 = vrot.slane %v5904_v55, 1  ;;  %v1772_v61 = vld [vmem:[#allocation14] sm:$0xff] }
  0xf7   : > { %4604 = vmatpush3.bf16.msra.mxu1 %v4601_v18  ;;  %v1773_v62 = vld [vmem:[#allocation14 + $0x8] sm:$0xff]  ;;  %v853_v63 = vrot.slane %v5907_v57, 1  ;;  %v5913_v0 = vld [vmem:[%s5854_s3 + $0x20] sm:$0xff]  ;;  %v4570_v1 = vpack.c.bf16 %v1028_v59, %v1027_v58  ;;  %v1029_v4 = vld [vmem:[#allocation13 + $0x90] sm:$0xff] }
  0xf8   : > { %4606 = vmatprep.subr.bf16.mxu1 %v4605_v25  ;;  %v5916_v2 = vld [vmem:[%s5854_s3 + $0x28] sm:$0xff]  ;;  %v1030_v5 = vld [vmem:[#allocation13 + $0x98] sm:$0xff]  ;;  %v912_v6 = vsel %vm882_vm0, %v851_v34, %v852_v60  ;;  %v4626_v7 = vpack.c.bf16 %v1773_v62, %v1772_v61  ;;  %v854_v8 = vrot.slane %v5913_v0, 1  ;;  %v1774_v10 = vld [vmem:[#allocation14 + $0x10] sm:$0xff] }
  0xf9   : > { %4556 = vmatpush1.bf16.msra.mxu0 %v4555_v27  ;;  %v911_v9 = vsel %vm882_vm0, %v852_v60, %v853_v63  ;;  %v1775_v11 = vld [vmem:[#allocation14 + $0x18] sm:$0xff]  ;;  %v855_v12 = vrot.slane %v5916_v2, 1  ;;  %v5927_v13 = vld [vmem:[%s5854_s3 + $0x30] sm:$0xff]  ;;  %v4573_v14 = vpack.c.bf16 %v1030_v5, %v1029_v4  ;;  %v1031_v16 = vld [vmem:[#allocation13 + $0xa0] sm:$0xff] }
  0xfa   : > { %4557 = vmatprep.subr.bf16.mxu0 %v5450_v3  ;;  %v5930_v15 = vld [vmem:[%s5854_s3 + $0x38] sm:$0xff]  ;;  %v1032_v17 = vld [vmem:[#allocation13 + $0xa8] sm:$0xff]  ;;  %v910_v18 = vsel %vm882_vm0, %v853_v63, %v854_v8  ;;  %v4629_v19 = vpack.c.bf16 %v1775_v11, %v1774_v10  ;;  %v856_v20 = vrot.slane %v5927_v13, 1  ;;  %v1776_v23 = vld [vmem:[#allocation14 + $0x20] sm:$0xff] }
  0xfb   : > { %4608 = vmatpush3.bf16.msra.mxu1 %v4605_v25  ;;  %v909_v21 = vsel %vm882_vm0, %v854_v8, %v855_v12  ;;  %v1777_v24 = vld [vmem:[#allocation14 + $0x28] sm:$0xff]  ;;  %v857_v25 = vrot.slane %v5930_v15, 1  ;;  %v5941_v27 = vld [vmem:[%s5854_s3 + $0x40] sm:$0xff]  ;;  %v4576_v28 = vpack.c.bf16 %v1032_v17, %v1031_v16  ;;  %v1033_v32 = vld [vmem:[#allocation13 + $0xb0] sm:$0xff] }
  0xfc   : > { %4610 = vmatprep.subr.bf16.mxu1 %v4609_v35  ;;  %v5944_v29 = vld [vmem:[%s5854_s3 + $0x48] sm:$0xff]  ;;  %v1034_v33 = vld [vmem:[#allocation13 + $0xb8] sm:$0xff]  ;;  %v908_v34 = vsel %vm882_vm0, %v855_v12, %v856_v20  ;;  %v858_v36 = vrot.slane %v5941_v27, 1  ;;  %v1778_v38 = vld [vmem:[#allocation14 + $0x30] sm:$0xff] }
  0xfd   : > { %4559 = vmatpush1.bf16.msra.mxu0 %v4558_v37  ;;  %v907_v37 = vsel %vm882_vm0, %v856_v20, %v857_v25  ;;  %v1779_v39 = vld [vmem:[#allocation14 + $0x38] sm:$0xff]  ;;  %v859_v40 = vrot.slane %v5944_v29, 1  ;;  %v5955_v41 = vld [vmem:[%s5854_s3 + $0x50] sm:$0xff]  ;;  %v1035_v44 = vld [vmem:[#allocation13 + $0xc0] sm:$0xff] }
  0xfe   : > { %4560 = vmatprep.subr.bf16.mxu0 %v5450_v3  ;;  %v1036_v45 = vld [vmem:[#allocation13 + $0xc8] sm:$0xff]  ;;  %v906_v46 = vsel %vm882_vm0, %v857_v25, %v858_v36  ;;  %v4635_v47 = vpack.c.bf16 %v1779_v39, %v1778_v38  ;;  %v1780_v50 = vld [vmem:[#allocation14 + $0x40] sm:$0xff]  ;;  %v1037_v58 = vld [vmem:[#allocation13 + $0xd0] sm:$0xff] }
  0xff   : > { %4612 = vmatpush3.bf16.msra.mxu1 %v4609_v35  ;;  %v4632_v35 = vpack.c.bf16 %v1777_v24, %v1776_v23  ;;  %v1781_v51 = vld [vmem:[#allocation14 + $0x48] sm:$0xff]  ;;  %v5969_v53 = vld [vmem:[%s5854_s3 + $0x60] sm:$0xff]  ;;  %v1038_v59 = vld [vmem:[#allocation13 + $0xd8] sm:$0xff] }
 0x100   : > { %4614 = vmatprep.subr.bf16.mxu1 %v4613_v42  ;;  %v4638_v61 = vpack.c.bf16 %v1781_v51, %v1780_v50  ;;  %v862_v62 = vrot.slane %v5969_v53, 1  ;;  %v1783_v4 = vld [vmem:[#allocation14 + $0x58] sm:$0xff]  ;;  %v1040_v10 = vld [vmem:[#allocation13 + $0xe8] sm:$0xff]  ;;  %v1784_v17 = vld [vmem:[#allocation14 + $0x60] sm:$0xff] }
 0x101   : > { %4562 = vmatpush1.bf16.msra.mxu0 %v4561_v43  ;;  %v5958_v43 = vld [vmem:[%s5854_s3 + $0x58] sm:$0xff]  ;;  %v5997_v20 = vld [vmem:[%s5854_s3 + $0x80] sm:$0xff]  ;;  %v6000_v23 = vld [vmem:[%s5854_s3 + $0x88] sm:$0xff] }
 0x102   : > { %4563 = vmatprep.subr.bf16.mxu0 %v5450_v3  ;;  %v861_v52 = vrot.slane %v5958_v43, 1  ;;  %v5986_v8 = vld [vmem:[%s5854_s3 + $0x78] sm:$0xff]  ;;  %v1041_v24 = vld [vmem:[#allocation13 + $0xf0] sm:$0xff] }
 0x103   : > { %4616 = vmatpush3.bf16.msra.mxu1 %v4613_v42  ;;  %v4579_v42 = vpack.c.bf16 %v1034_v33, %v1033_v32  ;;  %v1042_v25 = vld [vmem:[#allocation13 + $0xf8] sm:$0xff]  ;;  %v1786_v38 = vld [vmem:[#allocation14 + $0x70] sm:$0xff] }
 0x104   : > { %4618 = vmatprep.subr.bf16.mxu1 %v4617_v48  ;;  %v902_v11 = vsel %vm882_vm0, %v861_v52, %v862_v62  ;;  %v1787_v39 = vld [vmem:[#allocation14 + $0x78] sm:$0xff] }
 0x105   : > { %4565 = vmatpush1.bf16.msra.mxu0 %v4564_v49  ;;  %v905_v49 = vsel %vm882_vm0, %v858_v36, %v859_v40  ;;  %v1805_v36 = vld [vmem:[#allocation14 + $0x108] sm:$0xff]  ;;  %v4647_v50 = vpack.c.bf16 %v1787_v39, %v1786_v38 }
 0x106   : > { %4566 = vmatprep.subr.bf16.mxu0 %v5450_v3 }
 0x107   : > { %4620 = vmatpush3.bf16.msra.mxu1 %v4617_v48  ;;  %v860_v48 = vrot.slane %v5955_v41, 1 }
 0x108   : > { %4622 = vmatprep.subr.bf16.mxu1 %v4621_v54 }
 0x109   : > { %4568 = vmatpush1.bf16.msra.mxu0 %v4567_v56  ;;  %v5972_v56 = vld [vmem:[%s5854_s3 + $0x68] sm:$0xff]  ;;  %v904_v60 = vsel %vm882_vm0, %v859_v40, %v860_v48  ;;  %v903_v63 = vsel %vm882_vm0, %v860_v48, %v861_v52  ;;  %v867_v40 = vrot.slane %v6000_v23, 1  ;;  %v1806_v52 = vld [vmem:[#allocation14 + $0x110] sm:$0xff] }
 0x10a   : > { %4569 = vmatprep.subr.bf16.mxu0 %v5450_v3  ;;  %v863_v5 = vrot.slane %v5972_v56, 1 }
 0x10b   : > { %4624 = vmatpush3.bf16.msra.mxu1 %v4621_v54  ;;  %v4582_v54 = vpack.c.bf16 %v1036_v45, %v1035_v44  ;;  %v4591_v44 = vpack.c.bf16 %v1042_v25, %v1041_v24  ;;  %v657_v45 = vrot.slane %v5886_v26, 7  ;;  %v6063_v24 = vld [vmem:[%s5854_s3 + $0xb0] sm:$0xff] }
 0x10c   : > { %4625 = vmatprep.subr.bf16.mxu1 %v5450_v3  ;;  %v901_v16 = vsel %vm882_vm0, %v862_v62, %v863_v5  ;;  %v6033_v62 = vld [vmem:[%s5854_s3 + $0xa0] sm:$0xff] }
 0x10d   : > { %4571 = vmatpush1.bf16.msra.mxu0 %v4570_v1  ;;  %v1782_v1 = vld [vmem:[#allocation14 + $0x50] sm:$0xff] }
 0x10e   : > { %4362 = vmatmul.mubr.f32.vlgmr.msra.gmra.mrb[0].mxu1 %v912_v6  ;;  %4572 = vmatprep.subr.bf16.mxu0 %v5450_v3  ;;  %v5983_v6 = vld [vmem:[%s5854_s3 + $0x70] sm:$0xff]  ;;  %v4641_v12 = vpack.c.bf16 %v1783_v4, %v1782_v1  ;;  %v658_v1 = vrot.slane %v5889_v30, 7  ;;  %v6042_v4 = vld [vmem:[%s5854_s3 + $0xa8] sm:$0xff] }
 0x10f   : > { %4627 = vmatpush1.bf16.msra.mxu1 %v4626_v7  ;;  %4364 = vmatprep.mubr.f32.mxu1 %v911_v9  ;;  %v4585_v7 = vpack.c.bf16 %v1038_v59, %v1037_v58  ;;  %v1039_v9 = vld [vmem:[#allocation13 + $0xe0] sm:$0xff] }
 0x110   : > { %4628 = vmatprep.subr.bf16.mxu1 %v5450_v3  ;;  %v1788_v59 = vld [vmem:[#allocation14 + $0x80] sm:$0xff] }
 0x111   : > { %4574 = vmatpush1.bf16.msra.mxu0 %v4573_v14  ;;  %v864_v14 = vrot.slane %v5983_v6, 1 }
 0x112   : > { %4365 = vmatmul.mubr.f32.gmra.mrb[2].mxu1 %v910_v18  ;;  %4575 = vmatprep.subr.bf16.mxu0 %v5450_v3  ;;  %v1785_v18 = vld [vmem:[#allocation14 + $0x68] sm:$0xff] }
 0x113   : > { %4630 = vmatpush1.bf16.msra.mxu1 %v4629_v19  ;;  %4367 = vmatprep.mubr.f32.mxu1 %v909_v21  ;;  %v865_v19 = vrot.slane %v5986_v8, 1  ;;  %v4588_v21 = vpack.c.bf16 %v1040_v10, %v1039_v9  ;;  %v900_v32 = vsel %vm882_vm0, %v863_v5, %v864_v14  ;;  %v4644_v33 = vpack.c.bf16 %v1785_v18, %v1784_v17  ;;  %v1790_v5 = vld [vmem:[#allocation14 + $0x90] sm:$0xff]  ;;  %v6048_v9 = vld [vmem:[%s5860_s18] sm:$0xff]  ;;  %v6054_v17 = vld [vmem:[%s5860_s18 + $0x8] sm:$0xff] }
 0x114   : > { %4631 = vmatprep.subr.bf16.mxu1 %v5450_v3  ;;  %v7715_v25 = vrot.slane %v6048_v9, 1  ;;  %v1581_v26 = vrot.slane %v6054_v17, 7 }
 0x115   : > { %4577 = vmatpush1.bf16.msra.mxu0 %v4576_v28  ;;  %v6004_v28 = vld [vmem:[%s5854_s3 + $0xf8] sm:$0xff] }
 0x116   : > { %4368 = vmatmul.mubr.f32.gmra.mrb[4].mxu1 %v908_v34  ;;  %4578 = vmatprep.subr.bf16.mxu0 %v5450_v3  ;;  %v866_v34 = vrot.slane %v5997_v20, 1 }
 0x117   : > { %4633 = vmatpush1.bf16.msra.mxu1 %v4632_v35  ;;  %4370 = vmatprep.mubr.f32.mxu1 %v907_v37  ;;  %v1804_v35 = vld [vmem:[#allocation14 + $0x100] sm:$0xff]  ;;  %v899_v37 = vsel %vm882_vm0, %v864_v14, %v865_v19 }
 0x118   : > { %4634 = vmatprep.subr.bf16.mxu1 %v5450_v3  ;;  %v6023_v48 = vpack.c.bf16 %v1805_v36, %v1804_v35  ;;  %v897_v58 = vsel %vm882_vm0, %v866_v34, %v867_v40  ;;  %v1808_v14 = vld [vmem:[#allocation14 + $0x120] sm:$0xff]  ;;  %v659_v35 = vrot.slane %v5904_v55, 7  ;;  %v6076_v36 = vld [vmem:[%s5854_s3 + $0xb8] sm:$0xff] }
 0x119   : > { %4580 = vmatpush1.bf16.msra.mxu0 %v4579_v42  ;;  %v6014_v42 = vld [vmem:[%s5854_s3 + $0x90] sm:$0xff] }
 0x11a   : > { %4371 = vmatmul.mubr.f32.gmra.mrb[6].mxu1 %v906_v46  ;;  %4581 = vmatprep.subr.bf16.mxu0 %v5450_v3  ;;  %v688_v46 = vrot.slane %v6004_v28, 7  ;;  %v868_v51 = vrot.slane %v6014_v42, 1 }
 0x11b   : > { %4636 = vmatpush1.bf16.msra.mxu1 %v4635_v47  ;;  %4373 = vmatprep.mubr.f32.mxu1 %v905_v49  ;;  %v6019_v47 = vld [vmem:[%s5854_s3 + $0x98] sm:$0xff]  ;;  %v898_v49 = vsel %vm882_vm0, %v865_v19, %v866_v34  ;;  %v720_v34 = vsel %vm689_vm1, %v657_v45, %v658_v1 }
 0x11c   : > { %4637 = vmatprep.subr.bf16.mxu1 %v5450_v3  ;;  %v896_v10 = vsel %vm882_vm0, %v867_v40, %v868_v51  ;;  %v1791_v19 = vld [vmem:[#allocation14 + $0x98] sm:$0xff]  ;;  %v872_v40 = vrot.slane %v6063_v24, 1 }
 0x11d   : > { %4583 = vmatpush1.bf16.msra.mxu0 %v4582_v54  ;;  %v1807_v54 = vld [vmem:[#allocation14 + $0x118] sm:$0xff]  ;;  %v4653_v39 = vpack.c.bf16 %v1791_v19, %v1790_v5 }
 0x11e   : > { %4374 = vmatmul.mubr.f32.gmra.mrb[8].mxu1 %v904_v60  ;;  %4584 = vmatprep.subr.bf16.mxu0 %v5450_v3  ;;  %v1789_v60 = vld [vmem:[#allocation14 + $0x88] sm:$0xff] }
 0x11f   : > { %4639 = vmatpush1.bf16.msra.mxu1 %v4638_v61  ;;  %4376 = vmatprep.mubr.f32.mxu1 %v903_v63  ;;  %v869_v61 = vrot.slane %v6019_v47, 1  ;;  %v721_v63 = vsel %vm689_vm1, %v688_v46, %v657_v45  ;;  %v1811_v45 = vld [vmem:[#allocation14 + $0x138] sm:$0xff] }
 0x120   : > { %4640 = vmatprep.subr.bf16.mxu1 %v5450_v3 }
 0x121   : > { %4586 = vmatpush1.bf16.msra.mxu0 %v4585_v7  ;;  %v6045_v7 = vpack.c.bf16 %v1807_v54, %v1806_v52  ;;  %v895_v18 = vsel %vm882_vm0, %v868_v51, %v869_v61  ;;  %v1793_v51 = vld [vmem:[#allocation14 + $0xa8] sm:$0xff]  ;;  %v873_v52 = vrot.slane %v6076_v36, 1  ;;  %v6090_v54 = vld [vmem:[%s5854_s3 + $0xc0] sm:$0xff] }
 0x122   : > { %4377 = vmatmul.mubr.f32.gmra.mrb[10].mxu1 %v902_v11  ;;  %4587 = vmatprep.subr.bf16.mxu0 %v5450_v3  ;;  %v4650_v11 = vpack.c.bf16 %v1789_v60, %v1788_v59  ;;  %v719_v59 = vsel %vm689_vm1, %v658_v1, %v659_v35  ;;  %v660_v60 = vrot.slane %v5907_v57, 7 }
 0x123   : > { %4642 = vmatpush1.bf16.msra.mxu1 %v4641_v12  ;;  %4379 = vmatprep.mubr.f32.mxu1 %v901_v16  ;;  %v870_v12 = vrot.slane %v6033_v62, 1  ;;  %v1809_v16 = vld [vmem:[#allocation14 + $0x128] sm:$0xff] }
 0x124   : > { %4643 = vmatprep.subr.bf16.mxu1 %v5450_v3  ;;  %v6080_v38 = vpack.c.bf16 %v1809_v16, %v1808_v14  ;;  %v891_v14 = vsel %vm882_vm0, %v872_v40, %v873_v52  ;;  %v1794_v16 = vld [vmem:[#allocation14 + $0xb0] sm:$0xff] }
 0x125   : > { %4589 = vmatpush1.bf16.msra.mxu0 %v4588_v21  ;;  %v871_v21 = vrot.slane %v6042_v4, 1 }
 0x126   : > { %4380 = vmatmul.mubr.f32.gmra.mrb[12].mxu1 %v900_v32  ;;  %4590 = vmatprep.subr.bf16.mxu0 %v5450_v3  ;;  %v1677_v32 = vrot.slane %v6054_v17, 1 }
 0x127   : > { %4645 = vmatpush1.bf16.msra.mxu1 %v4644_v33  ;;  %4382 = vmatprep.mubr.f32.mxu1 %v899_v37  ;;  %v6068_v33 = vld [vmem:[%s5860_s18 + $0x10] sm:$0xff]  ;;  %v892_v1 = vsel %vm882_vm0, %v871_v21, %v872_v40 }
 0x128   : > { %4646 = vmatprep.subr.bf16.mxu1 %v5450_v3  ;;  %v1678_v37 = vrot.slane %v6068_v33, 1 }
 0x129   : > { %4592 = vmatpush1.bf16.msra.mxu0 %v4591_v44  ;;  %v1810_v44 = vld [vmem:[#allocation14 + $0x130] sm:$0xff] }
 0x12a   : > { %4383 = vmatmul.mubr.f32.gmra.mrb[14].mxu1 %v898_v49  ;;  %4674 = vmatprep.subr.bf16.mxu0 %v6023_v48  ;;  %v893_v49 = vsel %vm882_vm0, %v870_v12, %v871_v21  ;;  %v718_v21 = vsel %vm689_vm1, %v659_v35, %v660_v60 }
 0x12b   : > { %4648 = vmatpush1.bf16.msra.mxu1 %v4647_v50  ;;  %4385 = vmatprep.mubr.f32.mxu1 %v897_v58  ;;  %v1792_v50 = vld [vmem:[#allocation14 + $0xa0] sm:$0xff]  ;;  %v6096_v58 = vsel %vm882_vm0, %v7715_v25, %v1677_v32  ;;  %v1801_v25 = vld [vmem:[#allocation14 + $0xe8] sm:$0xff] }
 0x12c   : > { %3949 = vmatmul.mubr.msk.f32.vlgmr.msra.gmra.mrb[0].mxu0 %vm3975_vm2, %v721_v63  ;;  %4649 = vmatprep.subr.bf16.mxu1 %v5450_v3  ;;  %v6110_v63 = vsel %vm882_vm0, %v1677_v32, %v1678_v37  ;;  %v4656_v5 = vpack.c.bf16 %v1793_v51, %v1792_v50  ;;  %v6123_v32 = vld [vmem:[%s5854_s3 + $0xd0] sm:$0xff]  ;;  %v1796_v50 = vld [vmem:[#allocation14 + $0xc0] sm:$0xff]  ;;  %v1797_v51 = vld [vmem:[#allocation14 + $0xc8] sm:$0xff] }
 0x12d   : > { %4676 = vmatpush3.bf16.msra.mxu0 %v6023_v48  ;;  %1135 = vmatprep.mubr.f32.mxu0 %v5889_v30  ;;  %v894_v30 = vsel %vm882_vm0, %v869_v61, %v870_v12  ;;  %v6103_v61 = vld [vmem:[%s5854_s3 + $0xc8] sm:$0xff]  ;;  %v876_v35 = vrot.slane %v6123_v32, 1 }
 0x12e   : > { %4386 = vmatmul.mubr.f32.gmra.mrb[16].mxu1 %v896_v10  ;;  %4678 = vmatprep.subr.bf16.mxu0 %v6045_v7  ;;  %v874_v10 = vrot.slane %v6090_v54, 1  ;;  %v1813_v12 = vld [vmem:[#allocation14 + $0x148] sm:$0xff]  ;;  %v875_v19 = vrot.slane %v6103_v61, 1 }
 0x12f   : > { %4651 = vmatpush1.bf16.msra.mxu1 %v4650_v11  ;;  %4388 = vmatprep.mubr.f32.mxu1 %v895_v18  ;;  %v1812_v11 = vld [vmem:[#allocation14 + $0x140] sm:$0xff]  ;;  %v1795_v18 = vld [vmem:[#allocation14 + $0xb8] sm:$0xff] }
 0x130   : > { %1136 = vmatmul.mubr.f32.gmra.mrb[2].mxu0 %v720_v34  ;;  %4652 = vmatprep.subr.bf16.mxu1 %v5450_v3  ;;  %v661_v34 = vrot.slane %v5913_v0, 7  ;;  %v4659_v40 = vpack.c.bf16 %v1795_v18, %v1794_v16  ;;  %v1817_v16 = vld [vmem:[#allocation14 + $0x168] sm:$0xff] }
 0x131   : > { %1140 = vmatprep.mubr.f32.mxu0 %v5904_v55  ;;  %4680 = vmatpush3.bf16.msra.mxu0 %v6045_v7  ;;  %v6113_v55 = vpack.c.bf16 %v1811_v45, %v1810_v44  ;;  %v1814_v44 = vld [vmem:[#allocation14 + $0x150] sm:$0xff]  ;;  %v1815_v45 = vld [vmem:[#allocation14 + $0x158] sm:$0xff] }
 0x132   : > { %4389 = vmatmul.mubr.f32.gmra.mrb[18].mxu1 %v894_v30  ;;  %4682 = vmatprep.subr.bf16.mxu0 %v6080_v38  ;;  %v6130_v30 = vld [vmem:[%s5854_s3 + $0xd8] sm:$0xff] }
 0x133   : > { %4654 = vmatpush1.bf16.msra.mxu1 %v4653_v39  ;;  %4391 = vmatprep.mubr.f32.mxu1 %v893_v49  ;;  %v6134_v39 = vpack.c.bf16 %v1813_v12, %v1812_v11  ;;  %v889_v49 = vsel %vm882_vm0, %v874_v10, %v875_v19  ;;  %v6151_v11 = vld [vmem:[%s5854_s3 + $0xe8] sm:$0xff]  ;;  %v4662_v12 = vpack.c.bf16 %v1797_v51, %v1796_v50  ;;  %v1818_v51 = vld [vmem:[#allocation14 + $0x170] sm:$0xff] }
 0x134   : > { %1141 = vmatmul.mubr.f32.gmra.mrb[4].mxu0 %v719_v59  ;;  %4655 = vmatprep.subr.bf16.mxu1 %v5450_v3  ;;  %v877_v59 = vrot.slane %v6130_v30, 1 }
 0x135   : > { %1145 = vmatprep.mubr.f32.mxu0 %v5907_v57  ;;  %4684 = vmatpush3.bf16.msra.mxu0 %v6080_v38  ;;  %v890_v57 = vsel %vm882_vm0, %v873_v52, %v874_v10  ;;  %v717_v52 = vsel %vm689_vm1, %v660_v60, %v661_v34  ;;  %v6155_v10 = vpack.c.bf16 %v1815_v45, %v1814_v44  ;;  %v879_v44 = vrot.slane %v6151_v11, 1 }
 0x136   : > { %4392 = vmatmul.mubr.f32.gmra.mrb[20].mxu1 %v892_v1  ;;  %4686 = vmatprep.subr.bf16.mxu0 %v6113_v55  ;;  %v6144_v1 = vld [vmem:[%s5854_s3 + $0xe0] sm:$0xff]  ;;  %v887_v18 = vsel %vm882_vm0, %v876_v35, %v877_v59  ;;  %v663_v45 = vrot.slane %v5927_v13, 7 }
 0x137   : > { %4657 = vmatpush1.bf16.msra.mxu1 %v4656_v5  ;;  %4394 = vmatprep.mubr.f32.mxu1 %v891_v14  ;;  %v662_v5 = vrot.slane %v5916_v2, 7  ;;  %v878_v60 = vrot.slane %v6144_v1, 1  ;;  %v1816_v14 = vld [vmem:[#allocation14 + $0x160] sm:$0xff] }
 0x138   : > { %1146 = vmatmul.mubr.f32.gmra.mrb[6].mxu0 %v718_v21  ;;  %4658 = vmatprep.subr.bf16.mxu1 %v5450_v3  ;;  %v1798_v21 = vld [vmem:[#allocation14 + $0xd0] sm:$0xff] }
 0x139   : > { %1150 = vmatprep.mubr.f32.mxu0 %v5913_v0  ;;  %4688 = vmatpush3.bf16.msra.mxu0 %v6113_v55  ;;  %v888_v0 = vsel %vm882_vm0, %v875_v19, %v876_v35  ;;  %v716_v19 = vsel %vm689_vm1, %v661_v34, %v662_v5  ;;  %v886_v35 = vsel %vm882_vm0, %v877_v59, %v878_v60 }
 0x13a   : > { %4395 = vmatmul.mubr.f32.gmra.mrb[22].mxu1 %v890_v57  ;;  %4690 = vmatprep.subr.bf16.mxu0 %v6134_v39  ;;  %v1799_v57 = vld [vmem:[#allocation14 + $0xd8] sm:$0xff]  ;;  %v885_v34 = vsel %vm882_vm0, %v878_v60, %v879_v44  ;;  %v715_v59 = vsel %vm689_vm1, %v662_v5, %v663_v45 }
 0x13b   : > { %4660 = vmatpush1.bf16.msra.mxu1 %v4659_v40  ;;  %4397 = vmatprep.mubr.f32.mxu1 %v889_v49  ;;  %v6165_v40 = vld [vmem:[%s5854_s3 + $0xf0] sm:$0xff]  ;;  %v6173_v49 = vpack.c.bf16 %v1817_v16, %v1816_v14  ;;  %v4665_v50 = vpack.c.bf16 %v1799_v57, %v1798_v21  ;;  %v881_v14 = vrot.slane %v6004_v28, 1  ;;  %v6188_v16 = vadd.s32 248, %v5882_v22  ;;  %v1803_v57 = vld [vmem:[#allocation14 + $0xf8] sm:$0xff] }
 0x13c   : > { %1151 = vmatmul.mubr.f32.gmra.mrb[8].mxu0 %v717_v52  ;;  %4661 = vmatprep.subr.bf16.mxu1 %v5450_v3  ;;  %v1819_v52 = vld [vmem:[#allocation14 + $0x178] sm:$0xff]  ;;  %v1802_v21 = vld [vmem:[#allocation14 + $0xf0] sm:$0xff] }
 0x13d   : > { %1155 = vmatprep.mubr.f32.mxu0 %v5916_v2  ;;  %4692 = vmatpush3.bf16.msra.mxu0 %v6134_v39  ;;  %v880_v2 = vrot.slane %v6165_v40, 1  ;;  %v6191_v60 = vpack.c.bf16 %v1819_v52, %v1818_v51  ;;  %vm3976_vm3 = vcmp.ne.s32.totalorder %v6188_v16, 255  ;;  %v666_v51 = vrot.slane %v5944_v29, 7 }
 0x13e   : > { %4398 = vmatmul.mubr.f32.gmra.mrb[24].mxu1 %v888_v0  ;;  %4694 = vmatprep.subr.bf16.mxu0 %v6155_v10  ;;  %v1800_v0 = vld [vmem:[#allocation14 + $0xe0] sm:$0xff] }
 0x13f   : > { %4663 = vmatpush1.bf16.msra.mxu1 %v4662_v12  ;;  %4400 = vmatprep.mubr.f32.mxu1 %v887_v18  ;;  %v664_v12 = vrot.slane %v5930_v15, 7  ;;  %v4668_v18 = vpack.c.bf16 %v1801_v25, %v1800_v0  ;;  %v883_v5 = vsel %vm882_vm0, %v880_v2, %v881_v14  ;;  %v914_v25 = vsel %vm882_vm0, %v881_v14, %v850_v31 }
 0x140   : > { %1156 = vmatmul.mubr.f32.gmra.mrb[10].mxu0 %v716_v19  ;;  %4664 = vmatprep.subr.bf16.mxu1 %v5450_v3  ;;  %v6199_v19 = vld [vmem:[%s5860_s18 + $0xf8] sm:$0xff] }
 0x141   : > { %1160 = vmatprep.mubr.f32.mxu0 %v5927_v13  ;;  %4696 = vmatpush3.bf16.msra.mxu0 %v6155_v10  ;;  %v884_v13 = vsel %vm882_vm0, %v879_v44, %v880_v2  ;;  %v1580_v44 = vrot.slane %v6048_v9, 7 }
 0x142   : > { %4401 = vmatmul.mubr.f32.gmra.mrb[26].mxu1 %v886_v35  ;;  %4698 = vmatprep.subr.bf16.mxu0 %v6173_v49  ;;  %v714_v35 = vsel %vm689_vm1, %v663_v45, %v664_v12  ;;  %v1611_v45 = vrot.slane %v6199_v19, 7 }
 0x143   : > { %4666 = vmatpush1.bf16.msra.mxu1 %v4665_v50  ;;  %4403 = vmatprep.mubr.f32.mxu1 %v885_v34  ;;  %v665_v50 = vrot.slane %v5941_v27, 7  ;;  %v1642_v52 = vsel %vm689_vm1, %v1580_v44, %v1581_v26  ;;  %v1582_v34 = vrot.slane %v6068_v33, 7 }
 0x144   : > { %1161 = vmatmul.mubr.f32.gmra.mrb[12].mxu0 %v715_v59  ;;  %4667 = vmatprep.subr.bf16.mxu1 %v5450_v3  ;;  %v6254_v59 = vld [vmem:[%s5860_s18 + $0x20] sm:$0xff] }
 0x145   : > { %1165 = vmatprep.mubr.f32.mxu0 %v5930_v15  ;;  %4700 = vmatpush3.bf16.msra.mxu0 %v6173_v49  ;;  %v4671_v15 = vpack.c.bf16 %v1803_v57, %v1802_v21  ;;  %v713_v2 = vsel %vm689_vm1, %v664_v12, %v665_v50  ;;  %v712_v31 = vsel %vm689_vm1, %v665_v50, %v666_v51  ;;  %v669_v12 = vrot.slane %v5969_v53, 7  ;;  %v6280_v57 = vld [vmem:[%s5860_s18 + $0x30] sm:$0xff] }
 0x146   : > { %4404 = vmatmul.mubr.f32.gmra.mrb[28].mxu1 %v884_v13  ;;  %4702 = vmatprep.subr.bf16.mxu0 %v6191_v60 }
 0x147   : > { %4669 = vmatpush1.bf16.msra.mxu1 %v4668_v18  ;;  %4406 = vmatprep.mubr.f32.mxu1 %v883_v5  ;;  %v6267_v18 = vld [vmem:[%s5860_s18 + $0x28] sm:$0xff]  ;;  %v670_v5 = vrot.slane %v5972_v56, 7 }
 0x148   : > { %1166 = vmatmul.mubr.f32.gmra.mrb[14].mxu0 %v714_v35  ;;  %4670 = vmatprep.subr.bf16.mxu1 %v5450_v3  ;;  %v1643_v3 = vsel %vm689_vm1, %v1611_v45, %v1580_v44  ;;  %v671_v35 = vrot.slane %v5983_v6, 7 }
 0x149   : > { %1170 = vmatprep.mubr.f32.mxu0 %v5941_v27  ;;  %4704 = vmatpush3.bf16.msra.mxu0 %v6191_v60  ;;  %v667_v27 = vrot.slane %v5955_v41, 7 }
 0x14a   : > { %4407 = vmatmul.mubr.msk.f32.gmra.mrb[30].mxu1 %vm3976_vm3, %v914_v25  ;;  %v6293_v25 = vld [vmem:[%s5860_s18 + $0x38] sm:$0xff] }
 0x14b   : > { %4672 = vmatpush1.bf16.msra.mxu1 %v4671_v15  ;;  %1891 = vmatprep.mubr.f32.mxu1 %v6048_v9  ;;  %v711_v0 = vsel %vm689_vm1, %v666_v51, %v667_v27  ;;  %v672_v15 = vrot.slane %v5986_v8, 7  ;;  %v673_v51 = vrot.slane %v5997_v20, 7 }
 0x14c   : > { %1171 = vmatmul.mubr.f32.gmra.mrb[16].mxu0 %v713_v2  ;;  %4833 = vmatprep.subr.bf16.mxu1 %v6023_v48  ;;  %v6306_v2 = vld [vmem:[%s5860_s18 + $0x40] sm:$0xff] }
 0x14d   : > { %1175 = vmatprep.mubr.f32.mxu0 %v5944_v29  ;;  %v6241_v29 = vld [vmem:[%s5860_s18 + $0x18] sm:$0xff] }
 0x14e   : > { %3954 = vmatmul.mubr.msk.f32.vlgmr.msra.gmra.mrb[32].mxu1 %vm3975_vm2, %v1643_v3  ;;  %v1583_v14 = vrot.slane %v6241_v29, 7 }
 0x14f   : > { %4841 = vmatpush3.bf16.msra.mxu1 %v6023_v48  ;;  %1896 = vmatprep.mubr.f32.mxu1 %v6054_v17  ;;  %v668_v48 = vrot.slane %v5958_v43, 7  ;;  %v1641_v17 = vsel %vm689_vm1, %v1581_v26, %v1582_v34  ;;  %v6319_v26 = vld [vmem:[%s5860_s18 + $0x48] sm:$0xff] }
 0x150   : > { %1176 = vmatmul.mubr.f32.gmra.mrb[18].mxu0 %v712_v31  ;;  %4834 = vmatprep.subr.bf16.mxu1 %v6045_v7  ;;  %v1640_v13 = vsel %vm689_vm1, %v1582_v34, %v1583_v14  ;;  %v674_v31 = vrot.slane %v6000_v23, 7  ;;  %v675_v34 = vrot.slane %v6014_v42, 7 }
 0x151   : > { %1180 = vmatprep.mubr.f32.mxu0 %v5955_v41  ;;  %v710_v41 = vsel %vm689_vm1, %v667_v27, %v668_v48 }
 0x152   : > { %1897 = vmatmul.mubr.f32.gmra.mrb[34].mxu1 %v1642_v52  ;;  %v6332_v52 = vld [vmem:[%s5860_s18 + $0x50] sm:$0xff] }
 0x153   : > { %1901 = vmatprep.mubr.f32.mxu1 %v6068_v33  ;;  %4842 = vmatpush3.bf16.msra.mxu1 %v6045_v7  ;;  %v1584_v7 = vrot.slane %v6254_v59, 7 }
 0x154   : > { %1181 = vmatmul.mubr.f32.gmra.mrb[20].mxu0 %v711_v0  ;;  %4835 = vmatprep.subr.bf16.mxu1 %v6080_v38 }
 0x155   : > { %1185 = vmatprep.mubr.f32.mxu0 %v5958_v43  ;;  %v709_v43 = vsel %vm689_vm1, %v668_v48, %v669_v12  ;;  %v1639_v21 = vsel %vm689_vm1, %v1583_v14, %v1584_v7  ;;  %v1590_v48 = vrot.slane %v6332_v52, 7 }
 0x156   : > { %1902 = vmatmul.mubr.f32.gmra.mrb[36].mxu1 %v1641_v17  ;;  %v676_v17 = vrot.slane %v6019_v47, 7 }
 0x157   : > { %1906 = vmatprep.mubr.f32.mxu1 %v6241_v29  ;;  %4843 = vmatpush3.bf16.msra.mxu1 %v6080_v38  ;;  %v1585_v38 = vrot.slane %v6267_v18, 7 }
 0x158   : > { %1186 = vmatmul.mubr.f32.gmra.mrb[22].mxu0 %v710_v41  ;;  %4836 = vmatprep.subr.bf16.mxu1 %v6113_v55 }
 0x159   : > { %1190 = vmatprep.mubr.f32.mxu0 %v5969_v53  ;;  %v708_v53 = vsel %vm689_vm1, %v669_v12, %v670_v5  ;;  %v1638_v50 = vsel %vm689_vm1, %v1584_v7, %v1585_v38  ;;  %v6354_v12 = vld [vmem:[%s5860_s18 + $0x60] sm:$0xff] }
 0x15a   : > { %1907 = vmatmul.mubr.f32.gmra.mrb[38].mxu1 %v1640_v13  ;;  %v677_v13 = vrot.slane %v6033_v62, 7 }
 0x15b   : > { %1911 = vmatprep.mubr.f32.mxu1 %v6254_v59  ;;  %4844 = vmatpush3.bf16.msra.mxu1 %v6113_v55  ;;  %v1586_v55 = vrot.slane %v6280_v57, 7 }
 0x15c   : > { %1191 = vmatmul.mubr.f32.gmra.mrb[24].mxu0 %v709_v43  ;;  %4837 = vmatprep.subr.bf16.mxu1 %v6134_v39  ;;  %v1592_v43 = vrot.slane %v6354_v12, 7 }
 0x15d   : > { %1195 = vmatprep.mubr.f32.mxu0 %v5972_v56  ;;  %v707_v56 = vsel %vm689_vm1, %v670_v5, %v671_v35  ;;  %v1637_v44 = vsel %vm689_vm1, %v1585_v38, %v1586_v55  ;;  %v6365_v5 = vld [vmem:[%s5860_s18 + $0x68] sm:$0xff] }
 0x15e   : > { %1912 = vmatmul.mubr.f32.gmra.mrb[40].mxu1 %v1639_v21  ;;  %v678_v21 = vrot.slane %v6042_v4, 7 }
 0x15f   : > { %1916 = vmatprep.mubr.f32.mxu1 %v6267_v18  ;;  %4845 = vmatpush3.bf16.msra.mxu1 %v6134_v39  ;;  %v1587_v39 = vrot.slane %v6293_v25, 7 }
 0x160   : > { %1196 = vmatmul.mubr.f32.gmra.mrb[26].mxu0 %v708_v53  ;;  %4838 = vmatprep.subr.bf16.mxu1 %v6155_v10  ;;  %v1593_v53 = vrot.slane %v6365_v5, 7 }
 0x161   : > { %1200 = vmatprep.mubr.f32.mxu0 %v5983_v6  ;;  %v706_v6 = vsel %vm689_vm1, %v671_v35, %v672_v15  ;;  %v1636_v3 = vsel %vm689_vm1, %v1586_v55, %v1587_v39  ;;  %v6376_v35 = vld [vmem:[%s5860_s18 + $0x70] sm:$0xff] }
 0x162   : > { %1917 = vmatmul.mubr.f32.gmra.mrb[42].mxu1 %v1638_v50  ;;  %v679_v50 = vrot.slane %v6063_v24, 7  ;;  %v1630_v55 = vsel %vm689_vm1, %v1592_v43, %v1593_v53 }
 0x163   : > { %1921 = vmatprep.mubr.f32.mxu1 %v6280_v57  ;;  %4846 = vmatpush3.bf16.msra.mxu1 %v6155_v10  ;;  %v1588_v10 = vrot.slane %v6306_v2, 7 }
 0x164   : > { %1201 = vmatmul.mubr.f32.gmra.mrb[28].mxu0 %v707_v56  ;;  %4839 = vmatprep.subr.bf16.mxu1 %v6173_v49  ;;  %v1594_v56 = vrot.slane %v6376_v35, 7 }
 0x165   : > { %1205 = vmatprep.mubr.f32.mxu0 %v5986_v8  ;;  %v705_v8 = vsel %vm689_vm1, %v672_v15, %v673_v51  ;;  %v1635_v27 = vsel %vm689_vm1, %v1587_v39, %v1588_v10  ;;  %v6387_v15 = vld [vmem:[%s5860_s18 + $0x78] sm:$0xff] }
 0x166   : > { %1922 = vmatmul.mubr.f32.gmra.mrb[44].mxu1 %v1637_v44  ;;  %v680_v44 = vrot.slane %v6076_v36, 7  ;;  %v1629_v39 = vsel %vm689_vm1, %v1593_v53, %v1594_v56 }
 0x167   : > { %1926 = vmatprep.mubr.f32.mxu1 %v6293_v25  ;;  %4847 = vmatpush3.bf16.msra.mxu1 %v6173_v49  ;;  %v1589_v49 = vrot.slane %v6319_v26, 7 }
 0x168   : > { %1206 = vmatmul.mubr.f32.gmra.mrb[30].mxu0 %v706_v6  ;;  %4840 = vmatprep.subr.bf16.mxu1 %v6191_v60  ;;  %v1595_v6 = vrot.slane %v6387_v15, 7 }
 0x169   : > { %1210 = vmatprep.mubr.f32.mxu0 %v5997_v20  ;;  %v704_v20 = vsel %vm689_vm1, %v673_v51, %v674_v31  ;;  %v1634_v0 = vsel %vm689_vm1, %v1588_v10, %v1589_v49  ;;  %v1633_v14 = vsel %vm689_vm1, %v1589_v49, %v1590_v48  ;;  %v6398_v51 = vld [vmem:[%s5860_s18 + $0x80] sm:$0xff] }
 0x16a   : > { %1927 = vmatmul.mubr.f32.gmra.mrb[46].mxu1 %v1636_v3  ;;  %v681_v3 = vrot.slane %v6090_v54, 7  ;;  %v1628_v10 = vsel %vm689_vm1, %v1594_v56, %v1595_v6 }
 0x16b   : > { %1931 = vmatprep.mubr.f32.mxu1 %v6306_v2  ;;  %4848 = vmatpush3.bf16.msra.mxu1 %v6191_v60  ;;  %v6343_v60 = vld [vmem:[%s5860_s18 + $0x58] sm:$0xff] }
 0x16c   : > { %1211 = vmatmul.mubr.f32.gmra.mrb[32].mxu0 %v705_v8  ;;  %v1591_v41 = vrot.slane %v6343_v60, 7  ;;  %v1596_v8 = vrot.slane %v6398_v51, 7 }
 0x16d   : > { %1215 = vmatprep.mubr.f32.mxu0 %v6000_v23  ;;  %v703_v23 = vsel %vm689_vm1, %v674_v31, %v675_v34  ;;  %v6409_v31 = vld [vmem:[%s5860_s18 + $0x88] sm:$0xff] }
 0x16e   : > { %1932 = vmatmul.mubr.f32.gmra.mrb[48].mxu1 %v1635_v27  ;;  %v1632_v7 = vsel %vm689_vm1, %v1590_v48, %v1591_v41  ;;  %v1631_v38 = vsel %vm689_vm1, %v1591_v41, %v1592_v43  ;;  %v682_v27 = vrot.slane %v6103_v61, 7  ;;  %v1627_v49 = vsel %vm689_vm1, %v1595_v6, %v1596_v8 }
 0x16f   : > { %1936 = vmatprep.mubr.f32.mxu1 %v6319_v26 }
 0x170   : > { %1216 = vmatmul.mubr.f32.gmra.mrb[34].mxu0 %v704_v20  ;;  %v1597_v20 = vrot.slane %v6409_v31, 7 }
 0x171   : > { %1220 = vmatprep.mubr.f32.mxu0 %v6014_v42  ;;  %v702_v42 = vsel %vm689_vm1, %v675_v34, %v676_v17  ;;  %v6420_v34 = vld [vmem:[%s5860_s18 + $0x90] sm:$0xff] }
 0x172   : > { %1937 = vmatmul.mubr.f32.gmra.mrb[50].mxu1 %v1634_v0  ;;  %v683_v0 = vrot.slane %v6123_v32, 7  ;;  %v1626_v48 = vsel %vm689_vm1, %v1596_v8, %v1597_v20 }
 0x173   : > { %1941 = vmatprep.mubr.f32.mxu1 %v6332_v52 }
 0x174   : > { %1221 = vmatmul.mubr.f32.gmra.mrb[36].mxu0 %v703_v23  ;;  %v1598_v23 = vrot.slane %v6420_v34, 7 }
 0x175   : > { %1225 = vmatprep.mubr.f32.mxu0 %v6019_v47  ;;  %v701_v47 = vsel %vm689_vm1, %v676_v17, %v677_v13  ;;  %v6431_v17 = vld [vmem:[%s5860_s18 + $0x98] sm:$0xff] }
 0x176   : > { %1942 = vmatmul.mubr.f32.gmra.mrb[52].mxu1 %v1633_v14  ;;  %v684_v14 = vrot.slane %v6130_v30, 7  ;;  %v1625_v41 = vsel %vm689_vm1, %v1597_v20, %v1598_v23 }
 0x177   : > { %1946 = vmatprep.mubr.f32.mxu1 %v6343_v60 }
 0x178   : > { %1226 = vmatmul.mubr.f32.gmra.mrb[38].mxu0 %v702_v42  ;;  %v1599_v42 = vrot.slane %v6431_v17, 7 }
 0x179   : > { %1230 = vmatprep.mubr.f32.mxu0 %v6033_v62  ;;  %v700_v62 = vsel %vm689_vm1, %v677_v13, %v678_v21  ;;  %v6442_v13 = vld [vmem:[%s5860_s18 + $0xa0] sm:$0xff] }
 0x17a   : > { %1947 = vmatmul.mubr.f32.gmra.mrb[54].mxu1 %v1632_v7  ;;  %v685_v7 = vrot.slane %v6144_v1, 7  ;;  %v1624_v43 = vsel %vm689_vm1, %v1598_v23, %v1599_v42 }
 0x17b   : > { %1951 = vmatprep.mubr.f32.mxu1 %v6354_v12 }
 0x17c   : > { %1231 = vmatmul.mubr.f32.gmra.mrb[40].mxu0 %v701_v47  ;;  %v1600_v47 = vrot.slane %v6442_v13, 7 }
 0x17d   : > { %1235 = vmatprep.mubr.f32.mxu0 %v6042_v4  ;;  %v699_v4 = vsel %vm689_vm1, %v678_v21, %v679_v50  ;;  %v6453_v21 = vld [vmem:[%s5860_s18 + $0xa8] sm:$0xff] }
 0x17e   : > { %1952 = vmatmul.mubr.f32.gmra.mrb[56].mxu1 %v1631_v38  ;;  %v686_v38 = vrot.slane %v6151_v11, 7  ;;  %v1623_v53 = vsel %vm689_vm1, %v1599_v42, %v1600_v47 }
 0x17f   : > { %1956 = vmatprep.mubr.f32.mxu1 %v6365_v5 }
 0x180   : > { %1236 = vmatmul.mubr.f32.gmra.mrb[42].mxu0 %v700_v62  ;;  %v1601_v62 = vrot.slane %v6453_v21, 7 }
 0x181   : > { %1240 = vmatprep.mubr.f32.mxu0 %v6063_v24  ;;  %v698_v24 = vsel %vm689_vm1, %v679_v50, %v680_v44  ;;  %v6464_v50 = vld [vmem:[%s5860_s18 + $0xb0] sm:$0xff] }
 0x182   : > { %1957 = vmatmul.mubr.f32.gmra.mrb[58].mxu1 %v1630_v55  ;;  %v687_v55 = vrot.slane %v6165_v40, 7  ;;  %v1622_v56 = vsel %vm689_vm1, %v1600_v47, %v1601_v62  ;;  %v1689_v47 = vrot.slane %v6365_v5, 1 }
 0x183   : > { %1961 = vmatprep.mubr.f32.mxu1 %v6376_v35 }
 0x184   : > { %1241 = vmatmul.mubr.f32.gmra.mrb[44].mxu0 %v699_v4  ;;  %v1602_v4 = vrot.slane %v6464_v50, 7 }
 0x185   : > { %1245 = vmatprep.mubr.f32.mxu0 %v6076_v36  ;;  %v697_v36 = vsel %vm689_vm1, %v680_v44, %v681_v3  ;;  %v6475_v44 = vld [vmem:[%s5860_s18 + $0xb8] sm:$0xff] }
 0x186   : > { %1962 = vmatmul.mubr.f32.gmra.mrb[60].mxu1 %v1629_v39  ;;  %v1621_v39 = vsel %vm689_vm1, %v1601_v62, %v1602_v4  ;;  %v1603_v6 = vrot.slane %v6475_v44, 7  ;;  %v6565_v62 = vld [vmem:[%s5860_s18 + $0xf0] sm:$0xff] }
 0x187   : > { %1966 = vmatprep.mubr.f32.mxu1 %v6387_v15 }
 0x188   : > { %1246 = vmatmul.mubr.f32.gmra.mrb[46].mxu0 %v698_v24  ;;  %v6485_v24 = vld [vmem:[%s5860_s18 + $0xc0] sm:$0xff] }
 0x189   : > { %1250 = vmatprep.mubr.f32.mxu0 %v6090_v54  ;;  %v696_v54 = vsel %vm689_vm1, %v681_v3, %v682_v27  ;;  %v1679_v3 = vrot.slane %v6241_v29, 1  ;;  %v1604_v8 = vrot.slane %v6485_v24, 7 }
 0x18a   : > { %1967 = vmatmul.mubr.f32.gmra.mrb[62].mxu1 %v1628_v10  ;;  %v1620_v10 = vsel %vm689_vm1, %v1602_v4, %v1603_v6  ;;  %v1610_v4 = vrot.slane %v6565_v62, 7 }
 0x18b   : > { %1971 = vmatprep.mubr.f32.mxu1 %v6398_v51  ;;  %v1619_v29 = vsel %vm689_vm1, %v1603_v6, %v1604_v8 }
 0x18c   : > { %1251 = vmatmul.mubr.f32.gmra.mrb[48].mxu0 %v697_v36  ;;  %v6498_v36 = vld [vmem:[%s5860_s18 + $0xc8] sm:$0xff] }
 0x18d   : > { %1255 = vmatprep.mubr.f32.mxu0 %v6103_v61  ;;  %v695_v61 = vsel %vm689_vm1, %v682_v27, %v683_v0  ;;  %v1680_v27 = vrot.slane %v6254_v59, 1  ;;  %v6513_v59 = vld [vmem:[%s5860_s18 + $0xd0] sm:$0xff] }
 0x18e   : > { %1972 = vmatmul.mubr.f32.gmra.mrb[64].mxu1 %v1627_v49  ;;  %v1605_v49 = vrot.slane %v6498_v36, 7  ;;  %v1606_v20 = vrot.slane %v6513_v59, 7 }
 0x18f   : > { %1976 = vmatprep.mubr.f32.mxu1 %v6409_v31  ;;  %v1735_v33 = vsel %vm882_vm0, %v1679_v3, %v1680_v27 }
 0x190   : > { %1256 = vmatmul.mubr.f32.gmra.mrb[50].mxu0 %v696_v54  ;;  %v1684_v54 = vrot.slane %v6306_v2, 1  ;;  %v1617_v23 = vsel %vm689_vm1, %v1605_v49, %v1606_v20  ;;  %v6539_v2 = vld [vmem:[%s5860_s18 + $0xe0] sm:$0xff] }
 0x191   : > { %1260 = vmatprep.mubr.f32.mxu0 %v6123_v32  ;;  %v694_v32 = vsel %vm689_vm1, %v683_v0, %v684_v14  ;;  %v1685_v0 = vrot.slane %v6319_v26, 1 }
 0x192   : > { %1977 = vmatmul.mubr.f32.gmra.mrb[66].mxu1 %v1626_v48 }
 0x193   : > { %1981 = vmatprep.mubr.f32.mxu1 %v6420_v34  ;;  %v1730_v42 = vsel %vm882_vm0, %v1684_v54, %v1685_v0 }
 0x194   : > { %1261 = vmatmul.mubr.f32.gmra.mrb[52].mxu0 %v695_v61 }
 0x195   : > { %1265 = vmatprep.mubr.f32.mxu0 %v6130_v30  ;;  %v693_v30 = vsel %vm689_vm1, %v684_v14, %v685_v7  ;;  %v1686_v14 = vrot.slane %v6332_v52, 1  ;;  %v6552_v52 = vld [vmem:[%s5860_s18 + $0xe8] sm:$0xff] }
 0x196   : > { %1982 = vmatmul.mubr.f32.gmra.mrb[68].mxu1 %v1625_v41  ;;  %v1687_v41 = vrot.slane %v6343_v60, 1 }
 0x197   : > { %1986 = vmatprep.mubr.f32.mxu1 %v6431_v17  ;;  %v1729_v60 = vsel %vm882_vm0, %v1685_v0, %v1686_v14  ;;  %v7764_v0 = vrot.slane %v6048_v9, 1 }
 0x198   : > { %1266 = vmatmul.mubr.f32.gmra.mrb[54].mxu0 %v694_v32 }
 0x199   : > { %1270 = vmatprep.mubr.f32.mxu0 %v6144_v1  ;;  %v692_v1 = vsel %vm689_vm1, %v685_v7, %v686_v38  ;;  %v1608_v7 = vrot.slane %v6539_v2, 7 }
 0x19a   : > { %1987 = vmatmul.mubr.f32.gmra.mrb[70].mxu1 %v1624_v43  ;;  %v1688_v43 = vrot.slane %v6354_v12, 1  ;;  %v1690_v12 = vrot.slane %v6376_v35, 1  ;;  %v1692_v35 = vrot.slane %v6398_v51, 1  ;;  %v1694_v51 = vrot.slane %v6420_v34, 1 }
 0x19b   : > { %1991 = vmatprep.mubr.f32.mxu1 %v6442_v13 }
 0x19c   : > { %1271 = vmatmul.mubr.f32.gmra.mrb[56].mxu0 %v693_v30  ;;  %v1728_v30 = vsel %vm882_vm0, %v1686_v14, %v1687_v41  ;;  %v1727_v5 = vsel %vm882_vm0, %v1687_v41, %v1688_v43 }
 0x19d   : > { %1275 = vmatprep.mubr.f32.mxu0 %v6151_v11  ;;  %v691_v11 = vsel %vm689_vm1, %v686_v38, %v687_v55 }
 0x19e   : > { %1992 = vmatmul.mubr.f32.gmra.mrb[72].mxu1 %v1623_v53  ;;  %v1609_v53 = vrot.slane %v6552_v52, 7 }
 0x19f   : > { %1996 = vmatprep.mubr.f32.mxu1 %v6453_v21 }
 0x1a0   : > { %1276 = vmatmul.mubr.f32.gmra.mrb[58].mxu0 %v692_v1  ;;  %v1691_v1 = vrot.slane %v6387_v15, 1  ;;  %v1693_v15 = vrot.slane %v6409_v31, 1  ;;  %v1613_v6 = vsel %vm689_vm1, %v1609_v53, %v1610_v4 }
 0x1a1   : > { %1280 = vmatprep.mubr.f32.mxu0 %v6165_v40  ;;  %v690_v40 = vsel %vm689_vm1, %v687_v55, %v688_v46  ;;  %v1736_v46 = vsel %vm882_vm0, %v1678_v37, %v1679_v3  ;;  %v1683_v37 = vrot.slane %v6293_v25, 1  ;;  %v1726_v55 = vsel %vm882_vm0, %v1688_v43, %v1689_v47 }
 0x1a2   : > { %1997 = vmatmul.mubr.f32.gmra.mrb[74].mxu1 %v1622_v56  ;;  %v1614_v56 = vsel %vm689_vm1, %v1608_v7, %v1609_v53  ;;  %v1701_v3 = vrot.slane %v6498_v36, 1  ;;  %v1723_v31 = vsel %vm882_vm0, %v1691_v1, %v1692_v35 }
 0x1a3   : > { %2001 = vmatprep.mubr.f32.mxu1 %v6464_v50  ;;  %v1731_v26 = vsel %vm882_vm0, %v1683_v37, %v1684_v54 }
 0x1a4   : > { %1281 = vmatmul.mubr.f32.gmra.mrb[60].mxu0 %v691_v11  ;;  %v1725_v11 = vsel %vm882_vm0, %v1689_v47, %v1690_v12  ;;  %v6662_v47 = vld [vmem:[%s7765_s12] ss:$0 sm:$0xff] }
 0x1a5   : > { %1285 = vmatprep.mubr.f32.mxu0 %v6004_v28  ;;  %v1681_v28 = vrot.slane %v6267_v18, 1 }
 0x1a6   : > { %2002 = vmatmul.mubr.f32.gmra.mrb[76].mxu1 %v1621_v39  ;;  %v1724_v39 = vsel %vm882_vm0, %v1690_v12, %v1691_v1 }
 0x1a7   : > { %2006 = vmatprep.mubr.f32.mxu1 %v6475_v44  ;;  %v1734_v18 = vsel %vm882_vm0, %v1680_v27, %v1681_v28  ;;  %v1702_v27 = vrot.slane %v6513_v59, 1 }
 0x1a8   : > { %1286 = vmatmul.mubr.f32.gmra.mrb[62].mxu0 %v690_v40  ;;  %v1700_v40 = vrot.slane %v6485_v24, 1 }
 0x1a9   : > { %4441 = vmatprep.mubr.f32.mxu0 %v6096_v58  ;;  %v1682_v58 = vrot.slane %v6280_v57, 1  ;;  %v6526_v57 = vld [vmem:[%s5860_s18 + $0xd8] sm:$0xff] }
 0x1aa   : > { %2007 = vmatmul.mubr.f32.gmra.mrb[78].mxu1 %v1620_v10  ;;  %v1607_v61 = vrot.slane %v6526_v57, 7  ;;  %v1695_v10 = vrot.slane %v6431_v17, 1  ;;  %v1703_v34 = vrot.slane %v6526_v57, 1  ;;  %v1696_v17 = vrot.slane %v6442_v13, 1 }
 0x1ab   : > { %2011 = vmatprep.mubr.f32.mxu1 %v6485_v24  ;;  %v1733_v25 = vsel %vm882_vm0, %v1681_v28, %v1682_v58  ;;  %v1732_v48 = vsel %vm882_vm0, %v1682_v58, %v1683_v37  ;;  %v1612_v24 = vsel %vm689_vm1, %v1610_v4, %v1611_v45  ;;  %v1721_v28 = vsel %vm882_vm0, %v1693_v15, %v1694_v51 }
 0x1ac   : > { %4442 = vmatmul.mubr.f32.vlgmr.msra.gmra.mrb[64].mxu0 %v6110_v63  ;;  %v1618_v63 = vsel %vm689_vm1, %v1604_v8, %v1605_v49  ;;  %v1616_v32 = vsel %vm689_vm1, %v1606_v20, %v1607_v61  ;;  %v1615_v38 = vsel %vm689_vm1, %v1607_v61, %v1608_v7  ;;  %v1722_v8 = vsel %vm882_vm0, %v1692_v35, %v1693_v15 }
 0x1ad   : > { %4444 = vmatprep.mubr.f32.mxu0 %v1736_v46  ;;  %v1697_v46 = vrot.slane %v6453_v21, 1  ;;  %v1704_v45 = vrot.slane %v6539_v2, 1  ;;  %v1713_v49 = vsel %vm882_vm0, %v1701_v3, %v1702_v27  ;;  %v1712_v13 = vsel %vm882_vm0, %v1702_v27, %v1703_v34 }
 0x1ae   : > { %2012 = vmatmul.mubr.f32.gmra.mrb[80].mxu1 %v1619_v29  ;;  %v1720_v29 = vsel %vm882_vm0, %v1694_v51, %v1695_v10  ;;  %v1698_v58 = vrot.slane %v6464_v50, 1  ;;  %v1719_v21 = vsel %vm882_vm0, %v1695_v10, %v1696_v17  ;;  %v1707_v20 = vrot.slane %v6199_v19, 1 }
 0x1af   : > { %2016 = vmatprep.mubr.f32.mxu1 %v6498_v36  ;;  %v1714_v36 = vsel %vm882_vm0, %v1700_v40, %v1701_v3  ;;  %v1718_v37 = vsel %vm882_vm0, %v1696_v17, %v1697_v46 }
 0x1b0   : > { %4445 = vmatmul.mubr.f32.gmra.mrb[66].mxu0 %v1735_v33  ;;  %v1699_v33 = vrot.slane %v6475_v44, 1  ;;  %v1717_v44 = vsel %vm882_vm0, %v1697_v46, %v1698_v58 }
 0x1b1   : > { %4447 = vmatprep.mubr.f32.mxu0 %v1734_v18  ;;  %v1706_v18 = vrot.slane %v6565_v62, 1 }
 0x1b2   : > { %2017 = vmatmul.mubr.f32.gmra.mrb[82].mxu1 %v1618_v63  ;;  %v1711_v63 = vsel %vm882_vm0, %v1703_v34, %v1704_v45 }
 0x1b3   : > { %2021 = vmatprep.mubr.f32.mxu1 %v6513_v59  ;;  %v1705_v59 = vrot.slane %v6552_v52, 1 }
 0x1b4   : > { %4448 = vmatmul.mubr.f32.gmra.mrb[68].mxu0 %v1733_v25  ;;  %v1708_v25 = vsel %vm882_vm0, %v1706_v18, %v1707_v20 }
 0x1b5   : > { %4450 = vmatprep.mubr.f32.mxu0 %v1732_v48  ;;  %v1710_v50 = vsel %vm882_vm0, %v1704_v45, %v1705_v59  ;;  %v1709_v54 = vsel %vm882_vm0, %v1705_v59, %v1706_v18  ;;  %v1739_v48 = vsel %vm882_vm0, %v1707_v20, %v7764_v0 }
 0x1b6   : > { %2022 = vmatmul.mubr.f32.gmra.mrb[84].mxu1 %v1617_v23 }
 0x1b7   : > { %2026 = vmatprep.mubr.f32.mxu1 %v6526_v57  ;;  %v1716_v57 = vsel %vm882_vm0, %v1698_v58, %v1699_v33 }
 0x1b8   : > { %4451 = vmatmul.mubr.f32.gmra.mrb[70].mxu0 %v1731_v26 }
 0x1b9   : > { %4453 = vmatprep.mubr.f32.mxu0 %v1730_v42 }
 0x1ba   : > { %2027 = vmatmul.mubr.f32.gmra.mrb[86].mxu1 %v1616_v32 }
 0x1bb   : > { %2031 = vmatprep.mubr.f32.mxu1 %v6539_v2 }
 0x1bc   : > { %4454 = vmatmul.mubr.f32.gmra.mrb[72].mxu0 %v1729_v60 }
 0x1bd   : > { %4456 = vmatprep.mubr.f32.mxu0 %v1728_v30 }
 0x1be   : > { %2032 = vmatmul.mubr.f32.gmra.mrb[88].mxu1 %v1615_v38 }
 0x1bf   : > { %2036 = vmatprep.mubr.f32.mxu1 %v6552_v52 }
 0x1c0   : > { %4457 = vmatmul.mubr.f32.gmra.mrb[74].mxu0 %v1727_v5 }
 0x1c1   : > { %4459 = vmatprep.mubr.f32.mxu0 %v1726_v55 }
 0x1c2   : > { %2037 = vmatmul.mubr.f32.gmra.mrb[90].mxu1 %v1614_v56 }
 0x1c3   : > { %2041 = vmatprep.mubr.f32.mxu1 %v6565_v62 }
 0x1c4   : > { %4460 = vmatmul.mubr.f32.gmra.mrb[76].mxu0 %v1725_v11 }
 0x1c5   : > { %4462 = vmatprep.mubr.f32.mxu0 %v1724_v39 }
 0x1c6   : > { %2042 = vmatmul.mubr.f32.gmra.mrb[92].mxu1 %v1613_v6 }
 0x1c7   : > { %2046 = vmatprep.mubr.f32.mxu1 %v6199_v19  ;;  %v1715_v19 = vsel %vm882_vm0, %v1699_v33, %v1700_v40 }
 0x1c8   : > { %4463 = vmatmul.mubr.f32.gmra.mrb[78].mxu0 %v1723_v31 }
 0x1c9   : > { %4465 = vmatprep.mubr.f32.mxu0 %v1722_v8 }
 0x1ca   : > { %2047 = vmatmul.mubr.f32.gmra.mrb[94].mxu1 %v1612_v24 }
 0x1cb   : > { %4477 = vmatprep.mubr.f32.mxu1 %v1714_v36 }
 0x1cc   : > { %4466 = vmatmul.mubr.f32.gmra.mrb[80].mxu0 %v1721_v28 }
 0x1cd   : > { %4468 = vmatprep.mubr.f32.mxu0 %v1720_v29 }
 0x1ce   : > { %4478 = vmatmul.mubr.f32.vlgmr.msra.gmra.mrb[96].mxu1 %v1713_v49 }
 0x1cf   : > { %4480 = vmatprep.mubr.f32.mxu1 %v1712_v13 }
 0x1d0   : > { %4469 = vmatmul.mubr.f32.gmra.mrb[82].mxu0 %v1719_v21 }
 0x1d1   : > { %4471 = vmatprep.mubr.f32.mxu0 %v1718_v37 }
 0x1d2   : > { %4481 = vmatmul.mubr.f32.gmra.mrb[98].mxu1 %v1711_v63 }
 0x1d3   : > { %4483 = vmatprep.mubr.f32.mxu1 %v1710_v50 }
 0x1d4   : > { %4472 = vmatmul.mubr.f32.gmra.mrb[84].mxu0 %v1717_v44 }
 0x1d5   : > { %4474 = vmatprep.mubr.f32.mxu0 %v1716_v57 }
 0x1d6   : > { %4484 = vmatmul.mubr.f32.gmra.mrb[100].mxu1 %v1709_v54 }
 0x1d7   : > { %4486 = vmatprep.mubr.f32.mxu1 %v1708_v25 }
 0x1d8   : > { %4475 = vmatmul.mubr.f32.gmra.mrb[86].mxu0 %v1715_v19 }
 0x1da   : > { %4487 = vmatmul.mubr.msk.f32.gmra.mrb[102].mxu1 %vm3976_vm3, %v1739_v48 }
 0x1e1   : > { %v4363_v23 = vpop.f32.mrb[0].mxu1 }
 0x1e2   : > { %v1357_v61 = vpop.f32.mrb[1].mxu1 }
 0x1e5   : > { %v4366_v2 = vpop.f32.mrb[2].mxu1 }
 0x1e6   : > { %v1367_v14 = vpop.f32.mrb[3].mxu1 }
 0x1e9   : > { %v4369_v26 = vpop.f32.mrb[4].mxu1 }
 0x1ea   : > { %v1377_v41 = vpop.f32.mrb[5].mxu1 }
 0x1ed   : > { %v6643_v42 = vpop.f32.mrb[6].mxu1 }
 0x1ee   : > { %v1387_v32 = vpop.f32.mrb[7].mxu1 }
 0x1f1   : > { %v6645_v7 = vpop.f32.mrb[8].mxu1 }
 0x1f2   : > { %v6647_v52 = vpop.f32.mrb[9].mxu1 }
 0x1f5   : > { %v6649_v9 = vpop.f32.mrb[10].mxu1 }
 0x1f6   : > { %v6651_v22 = vpop.f32.mrb[11].mxu1 }
 0x1f9   : > { %v6653_v43 = vpop.f32.mrb[12].mxu1 }
 0x1fa   : > { %v6655_v16 = vpop.f32.mrb[13].mxu1 }
 0x1fd   : > { %v6657_v60 = vpop.f32.mrb[14].mxu1 }
 0x1fe   : > { %v6664_v30 = vpop.f32.mrb[15].mxu1 }
 0x1ff   : > { %v1132_v38 = vpop.f32.mrb[0].mxu0 }
 0x200   : > { %v1133_v53 = vadd.f32 %v6662_v47, %v1132_v38  ;;  %v1134_v62 = vpop.f32.mrb[1].mxu0 }
 0x201   : > { %v6667_v12 = vpop.f32.mrb[16].mxu1 }
 0x202   : > { %v1358_v5 = vadd.f32 %v1357_v61, %v1133_v53  ;;  %v6669_v1 = vpop.f32.mrb[17].mxu1 }
 0x203   : > { %v1137_v55 = vpop.f32.mrb[2].mxu0 }
 0x204   : > { %1516 = vst [vmem:[#allocation2] sm:$0xff] %v1358_v5  ;;  %v1138_v56 = vadd.f32 %v6662_v47, %v1137_v55  ;;  %v1139_v4 = vpop.f32.mrb[3].mxu0 }
 0x205   : > { %v6672_v35 = vpop.f32.mrb[18].mxu1 }
 0x206   : > { %v1363_v11 = vadd.f32 %v4363_v23, %v1138_v56  ;;  %v6674_v15 = vpop.f32.mrb[19].mxu1 }
 0x207   : > { %v1142_v39 = vpop.f32.mrb[4].mxu0 }
 0x208   : > { %1517 = vst [vmem:[#allocation2 + $0x8] sm:$0xff] %v1363_v11  ;;  %v1143_v6 = vadd.f32 %v6662_v47, %v1142_v39  ;;  %v1144_v40 = vpop.f32.mrb[5].mxu0 }
 0x209   : > { %v6677_v3 = vpop.f32.mrb[20].mxu1 }
 0x20a   : > { %v1368_v51 = vadd.f32 %v1367_v14, %v1143_v6  ;;  %v6679_v31 = vpop.f32.mrb[21].mxu1 }
 0x20b   : > { %v1147_v10 = vpop.f32.mrb[6].mxu0 }
 0x20c   : > { %1518 = vst [vmem:[#allocation2 + $0x10] sm:$0xff] %v1368_v51  ;;  %v1148_v8 = vadd.f32 %v6662_v47, %v1147_v10  ;;  %v1149_v27 = vpop.f32.mrb[7].mxu0 }
 0x20d   : > { %v6682_v24 = vpop.f32.mrb[22].mxu1 }
 0x20e   : > { %v1373_v34 = vadd.f32 %v4366_v2, %v1148_v8  ;;  %v6684_v36 = vpop.f32.mrb[23].mxu1 }
 0x20f   : > { %v1152_v17 = vpop.f32.mrb[8].mxu0 }
 0x210   : > { %1519 = vst [vmem:[#allocation2 + $0x18] sm:$0xff] %v1373_v34  ;;  %v1153_v28 = vadd.f32 %v6662_v47, %v1152_v17  ;;  %v1154_v46 = vpop.f32.mrb[9].mxu0 }
 0x211   : > { %v6687_v29 = vpop.f32.mrb[24].mxu1 }
 0x212   : > { %v1378_v45 = vadd.f32 %v1377_v41, %v1153_v28  ;;  %v6689_v49 = vpop.f32.mrb[25].mxu1 }
 0x213   : > { %v1157_v59 = vpop.f32.mrb[10].mxu0 }
 0x214   : > { %1520 = vst [vmem:[#allocation2 + $0x20] sm:$0xff] %v1378_v45  ;;  %v1158_v13 = vadd.f32 %v6662_v47, %v1157_v59  ;;  %v1159_v58 = vpop.f32.mrb[11].mxu0 }
 0x215   : > { %v6692_v21 = vpop.f32.mrb[26].mxu1 }
 0x216   : > { %v1383_v33 = vadd.f32 %v4369_v26, %v1158_v13  ;;  %v6694_v37 = vpop.f32.mrb[27].mxu1 }
 0x217   : > { %v1162_v18 = vpop.f32.mrb[12].mxu0 }
 0x218   : > { %1521 = vst [vmem:[#allocation2 + $0x28] sm:$0xff] %v1383_v33  ;;  %v1163_v63 = vadd.f32 %v6662_v47, %v1162_v18  ;;  %v1164_v50 = vpop.f32.mrb[13].mxu0 }
 0x219   : > { %v6697_v20 = vpop.f32.mrb[28].mxu1 }
 0x21a   : > { %v1388_v44 = vadd.f32 %v1387_v32, %v1163_v63  ;;  %v6699_v57 = vpop.f32.mrb[29].mxu1 }
 0x21b   : > { %v1167_v54 = vpop.f32.mrb[14].mxu0 }
 0x21c   : > { %1522 = vst [vmem:[#allocation2 + $0x30] sm:$0xff] %v1388_v44  ;;  %v1168_v25 = vadd.f32 %v6662_v47, %v1167_v54  ;;  %v1169_v19 = vpop.f32.mrb[15].mxu0 }
 0x21d   : > { %v6702_v0 = vpop.f32.mrb[30].mxu1 }
 0x21e   : > { %v1393_v48 = vadd.f32 %v6643_v42, %v1168_v25  ;;  %v6705_v23 = vpop.f32.mrb[31].mxu1 }
 0x21f   : > { %v1172_v61 = vpop.f32.mrb[16].mxu0 }
 0x220   : > { %1523 = vst [vmem:[#allocation2 + $0x38] sm:$0xff] %v1393_v48  ;;  %v1173_v2 = vadd.f32 %v6662_v47, %v1172_v61  ;;  %v1174_v14 = vpop.f32.mrb[17].mxu0 }
 0x221   : > { %v6708_v26 = vpop.f32.mrb[32].mxu1 }
 0x222   : > { %v1398_v41 = vadd.f32 %v6647_v52, %v1173_v2  ;;  %v1895_v32 = vpop.f32.mrb[33].mxu1 }
 0x223   : > { %v1177_v38 = vpop.f32.mrb[18].mxu0 }
 0x224   : > { %1524 = vst [vmem:[#allocation2 + $0x40] sm:$0xff] %v1398_v41  ;;  %v1178_v53 = vadd.f32 %v6662_v47, %v1177_v38  ;;  %v1179_v62 = vpop.f32.mrb[19].mxu0 }
 0x225   : > { %v6712_v5 = vpop.f32.mrb[34].mxu1 }
 0x226   : > { %v1403_v42 = vadd.f32 %v6645_v7, %v1178_v53  ;;  %v1900_v55 = vpop.f32.mrb[35].mxu1 }
 0x227   : > { %v1182_v56 = vpop.f32.mrb[20].mxu0 }
 0x228   : > { %1525 = vst [vmem:[#allocation2 + $0x48] sm:$0xff] %v1403_v42  ;;  %v1183_v4 = vadd.f32 %v6662_v47, %v1182_v56  ;;  %v1184_v11 = vpop.f32.mrb[21].mxu0 }
 0x229   : > { %v6716_v39 = vpop.f32.mrb[36].mxu1 }
 0x22a   : > { %v1408_v52 = vadd.f32 %v6651_v22, %v1183_v4  ;;  %v1905_v6 = vpop.f32.mrb[37].mxu1 }
 0x22b   : > { %v1187_v40 = vpop.f32.mrb[22].mxu0 }
 0x22c   : > { %1526 = vst [vmem:[#allocation2 + $0x50] sm:$0xff] %v1408_v52  ;;  %v1188_v51 = vadd.f32 %v6662_v47, %v1187_v40  ;;  %v1189_v10 = vpop.f32.mrb[23].mxu0 }
 0x22d   : > { %v6720_v8 = vpop.f32.mrb[38].mxu1 }
 0x22e   : > { %v1413_v7 = vadd.f32 %v6649_v9, %v1188_v51  ;;  %v1910_v27 = vpop.f32.mrb[39].mxu1 }
 0x22f   : > { %v1192_v34 = vpop.f32.mrb[24].mxu0 }
 0x230   : > { %1527 = vst [vmem:[#allocation2 + $0x58] sm:$0xff] %v1413_v7  ;;  %v1193_v17 = vadd.f32 %v6662_v47, %v1192_v34  ;;  %v1194_v28 = vpop.f32.mrb[25].mxu0 }
 0x231   : > { %v6724_v46 = vpop.f32.mrb[40].mxu1 }
 0x232   : > { %v1418_v22 = vadd.f32 %v6655_v16, %v1193_v17  ;;  %v1915_v45 = vpop.f32.mrb[41].mxu1 }
 0x233   : > { %v1197_v59 = vpop.f32.mrb[26].mxu0 }
 0x234   : > { %1528 = vst [vmem:[#allocation2 + $0x60] sm:$0xff] %v1418_v22  ;;  %v1198_v13 = vadd.f32 %v6662_v47, %v1197_v59  ;;  %v1199_v58 = vpop.f32.mrb[27].mxu0 }
 0x235   : > { %v6728_v33 = vpop.f32.mrb[42].mxu1 }
 0x236   : > { %v1423_v9 = vadd.f32 %v6653_v43, %v1198_v13  ;;  %v1920_v18 = vpop.f32.mrb[43].mxu1 }
 0x237   : > { %v1202_v63 = vpop.f32.mrb[28].mxu0 }
 0x238   : > { %1529 = vst [vmem:[#allocation2 + $0x68] sm:$0xff] %v1423_v9  ;;  %v1203_v50 = vadd.f32 %v6662_v47, %v1202_v63  ;;  %v1204_v44 = vpop.f32.mrb[29].mxu0 }
 0x239   : > { %v6732_v54 = vpop.f32.mrb[44].mxu1 }
 0x23a   : > { %v1428_v16 = vadd.f32 %v6664_v30, %v1203_v50  ;;  %v1925_v25 = vpop.f32.mrb[45].mxu1 }
 0x23b   : > { %v1207_v19 = vpop.f32.mrb[30].mxu0 }
 0x23c   : > { %1530 = vst [vmem:[#allocation2 + $0x70] sm:$0xff] %v1428_v16  ;;  %v1208_v48 = vadd.f32 %v6662_v47, %v1207_v19  ;;  %v1209_v61 = vpop.f32.mrb[31].mxu0 }
 0x23d   : > { %v6736_v2 = vpop.f32.mrb[46].mxu1 }
 0x23e   : > { %v1433_v43 = vadd.f32 %v6657_v60, %v1208_v48  ;;  %v1930_v14 = vpop.f32.mrb[47].mxu1 }
 0x23f   : > { %v1212_v41 = vpop.f32.mrb[32].mxu0 }
 0x240   : > { %1531 = vst [vmem:[#allocation2 + $0x78] sm:$0xff] %v1433_v43  ;;  %v1213_v32 = vadd.f32 %v6662_v47, %v1212_v41  ;;  %v1214_v38 = vpop.f32.mrb[33].mxu0 }
 0x241   : > { %v6740_v53 = vpop.f32.mrb[48].mxu1 }
 0x242   : > { %v1438_v30 = vadd.f32 %v6669_v1, %v1213_v32  ;;  %v1935_v62 = vpop.f32.mrb[49].mxu1 }
 0x243   : > { %v1217_v42 = vpop.f32.mrb[34].mxu0 }
 0x244   : > { %1532 = vst [vmem:[#allocation2 + $0x80] sm:$0xff] %v1438_v30  ;;  %v1218_v55 = vadd.f32 %v6662_v47, %v1217_v42  ;;  %v1219_v56 = vpop.f32.mrb[35].mxu0 }
 0x245   : > { %v6744_v4 = vpop.f32.mrb[50].mxu1 }
 0x246   : > { %v1443_v60 = vadd.f32 %v6667_v12, %v1218_v55  ;;  %v1940_v11 = vpop.f32.mrb[51].mxu1 }
 0x247   : > { %v1222_v52 = vpop.f32.mrb[36].mxu0 }
 0x248   : > { %1533 = vst [vmem:[#allocation2 + $0x88] sm:$0xff] %v1443_v60  ;;  %v1223_v6 = vadd.f32 %v6662_v47, %v1222_v52  ;;  %v1224_v40 = vpop.f32.mrb[37].mxu0 }
 0x249   : > { %v6748_v51 = vpop.f32.mrb[52].mxu1 }
 0x24a   : > { %v1448_v1 = vadd.f32 %v6674_v15, %v1223_v6  ;;  %v1945_v10 = vpop.f32.mrb[53].mxu1 }
 0x24b   : > { %v1227_v7 = vpop.f32.mrb[38].mxu0 }
 0x24c   : > { %1534 = vst [vmem:[#allocation2 + $0x90] sm:$0xff] %v1448_v1  ;;  %v1228_v27 = vadd.f32 %v6662_v47, %v1227_v7  ;;  %v1229_v34 = vpop.f32.mrb[39].mxu0 }
 0x24d   : > { %v6752_v17 = vpop.f32.mrb[54].mxu1 }
 0x24e   : > { %v1453_v12 = vadd.f32 %v6672_v35, %v1228_v27  ;;  %v1950_v28 = vpop.f32.mrb[55].mxu1 }
 0x24f   : > { %v1232_v22 = vpop.f32.mrb[40].mxu0 }
 0x250   : > { %1535 = vst [vmem:[#allocation2 + $0x98] sm:$0xff] %v1453_v12  ;;  %v1233_v45 = vadd.f32 %v6662_v47, %v1232_v22  ;;  %v1234_v59 = vpop.f32.mrb[41].mxu0 }
 0x251   : > { %v6756_v13 = vpop.f32.mrb[56].mxu1 }
 0x252   : > { %v1458_v15 = vadd.f32 %v6679_v31, %v1233_v45  ;;  %v1955_v58 = vpop.f32.mrb[57].mxu1 }
 0x253   : > { %v1237_v9 = vpop.f32.mrb[42].mxu0 }
 0x254   : > { %1536 = vst [vmem:[#allocation2 + $0xa0] sm:$0xff] %v1458_v15  ;;  %v1238_v18 = vadd.f32 %v6662_v47, %v1237_v9  ;;  %v1239_v63 = vpop.f32.mrb[43].mxu0 }
 0x255   : > { %v6760_v50 = vpop.f32.mrb[58].mxu1 }
 0x256   : > { %v1463_v35 = vadd.f32 %v6677_v3, %v1238_v18  ;;  %v1960_v44 = vpop.f32.mrb[59].mxu1 }
 0x257   : > { %v1242_v16 = vpop.f32.mrb[44].mxu0 }
 0x258   : > { %1537 = vst [vmem:[#allocation2 + $0xa8] sm:$0xff] %v1463_v35  ;;  %v1243_v25 = vadd.f32 %v6662_v47, %v1242_v16  ;;  %v1244_v19 = vpop.f32.mrb[45].mxu0 }
 0x259   : > { %v6764_v48 = vpop.f32.mrb[60].mxu1 }
 0x25a   : > { %v1468_v31 = vadd.f32 %v6684_v36, %v1243_v25  ;;  %v1965_v61 = vpop.f32.mrb[61].mxu1 }
 0x25b   : > { %v1247_v43 = vpop.f32.mrb[46].mxu0 }
 0x25c   : > { %1538 = vst [vmem:[#allocation2 + $0xb0] sm:$0xff] %v1468_v31  ;;  %v1248_v14 = vadd.f32 %v6662_v47, %v1247_v43  ;;  %v1249_v41 = vpop.f32.mrb[47].mxu0 }
 0x25d   : > { %v6768_v32 = vpop.f32.mrb[62].mxu1 }
 0x25e   : > { %v1473_v3 = vadd.f32 %v6682_v24, %v1248_v14  ;;  %v1970_v38 = vpop.f32.mrb[63].mxu1 }
 0x25f   : > { %v1252_v30 = vpop.f32.mrb[48].mxu0  ;;  %v6802_v38 = vld [vmem:[%s7766_s10] ss:$0 sm:$0xff] }
 0x260   : > { %1539 = vst [vmem:[#allocation2 + $0xb8] sm:$0xff] %v1473_v3  ;;  %v1253_v62 = vadd.f32 %v6662_v47, %v1252_v30  ;;  %v1254_v42 = vpop.f32.mrb[49].mxu0 }
 0x261   : > { %v6772_v55 = vpop.f32.mrb[64].mxu1  ;;  %v1899_v42 = vadd.f32 %v6802_v38, %v6712_v5  ;;  %v1904_v5 = vadd.f32 %v6802_v38, %v6716_v39 }
 0x262   : > { %v1478_v36 = vadd.f32 %v6689_v49, %v1253_v62  ;;  %v1975_v56 = vpop.f32.mrb[65].mxu1 }
 0x263   : > { %v1257_v60 = vpop.f32.mrb[50].mxu0 }
 0x264   : > { %1540 = vst [vmem:[#allocation2 + $0xc0] sm:$0xff] %v1478_v36  ;;  %v1258_v11 = vadd.f32 %v6662_v47, %v1257_v60  ;;  %v1259_v52 = vpop.f32.mrb[51].mxu0 }
 0x265   : > { %v6776_v6 = vpop.f32.mrb[66].mxu1 }
 0x266   : > { %v1483_v24 = vadd.f32 %v6687_v29, %v1258_v11  ;;  %v1980_v40 = vpop.f32.mrb[67].mxu1 }
 0x267   : > { %v1262_v1 = vpop.f32.mrb[52].mxu0 }
 0x268   : > { %1541 = vst [vmem:[#allocation2 + $0xc8] sm:$0xff] %v1483_v24  ;;  %v1263_v10 = vadd.f32 %v6662_v47, %v1262_v1  ;;  %v1264_v7 = vpop.f32.mrb[53].mxu0 }
 0x269   : > { %v6780_v27 = vpop.f32.mrb[68].mxu1 }
 0x26a   : > { %v1488_v49 = vadd.f32 %v6694_v37, %v1263_v10  ;;  %v1985_v34 = vpop.f32.mrb[69].mxu1 }
 0x26b   : > { %v1267_v12 = vpop.f32.mrb[54].mxu0  ;;  %v1919_v34 = vadd.f32 %v6802_v38, %v6728_v33  ;;  %v1924_v33 = vadd.f32 %v6802_v38, %v6732_v54 }
 0x26c   : > { %1542 = vst [vmem:[#allocation2 + $0xd0] sm:$0xff] %v1488_v49  ;;  %v1268_v28 = vadd.f32 %v6662_v47, %v1267_v12  ;;  %v1269_v22 = vpop.f32.mrb[55].mxu0 }
 0x26d   : > { %v6784_v45 = vpop.f32.mrb[70].mxu1 }
 0x26e   : > { %v1493_v29 = vadd.f32 %v6692_v21, %v1268_v28  ;;  %v1990_v59 = vpop.f32.mrb[71].mxu1 }
 0x26f   : > { %v1272_v15 = vpop.f32.mrb[56].mxu0 }
 0x270   : > { %1543 = vst [vmem:[#allocation2 + $0xd8] sm:$0xff] %v1493_v29  ;;  %v1273_v58 = vadd.f32 %v6662_v47, %v1272_v15  ;;  %v1274_v9 = vpop.f32.mrb[57].mxu0  ;;  %v1929_v15 = vadd.f32 %v6802_v38, %v6736_v2 }
 0x271   : > { %v6788_v18 = vpop.f32.mrb[72].mxu1 }
 0x272   : > { %v1498_v37 = vadd.f32 %v6699_v57, %v1273_v58  ;;  %v1995_v63 = vpop.f32.mrb[73].mxu1 }
 0x273   : > { %v1277_v35 = vpop.f32.mrb[58].mxu0 }
 0x274   : > { %1544 = vst [vmem:[#allocation2 + $0xe0] sm:$0xff] %v1498_v37  ;;  %v1278_v44 = vadd.f32 %v6662_v47, %v1277_v35  ;;  %v1279_v16 = vpop.f32.mrb[59].mxu0 }
 0x275   : > { %v6792_v25 = vpop.f32.mrb[74].mxu1 }
 0x276   : > { %v1503_v21 = vadd.f32 %v6697_v20, %v1278_v44  ;;  %v2000_v19 = vpop.f32.mrb[75].mxu1  ;;  %v1939_v44 = vadd.f32 %v6802_v38, %v6744_v4  ;;  %v1944_v4 = vadd.f32 %v6802_v38, %v6748_v51 }
 0x277   : > { %v1282_v31 = vpop.f32.mrb[60].mxu0 }
 0x278   : > { %1545 = vst [vmem:[#allocation2 + $0xe8] sm:$0xff] %v1503_v21  ;;  %v1283_v61 = vadd.f32 %v6662_v47, %v1282_v31  ;;  %v1284_v43 = vpop.f32.mrb[61].mxu0  ;;  %v1934_v21 = vadd.f32 %v6802_v38, %v6740_v53 }
 0x279   : > { %v6796_v14 = vpop.f32.mrb[76].mxu1  ;;  %v1949_v43 = vadd.f32 %v6802_v38, %v6752_v17 }
 0x27a   : > { %v1508_v57 = vadd.f32 %v6705_v23, %v1283_v61  ;;  %v2005_v41 = vpop.f32.mrb[77].mxu1  ;;  %v1894_v23 = vadd.f32 %v6802_v38, %v6708_v26 }
 0x27b   : > { %v1287_v3 = vpop.f32.mrb[62].mxu0 }
 0x27c   : > { %1546 = vst [vmem:[#allocation2 + $0xf0] sm:$0xff] %v1508_v57  ;;  %v1288_v20 = vadd.f32 %v6662_v47, %v1287_v3  ;;  %v1289_v30 = vpop.f32.mrb[63].mxu0  ;;  %v1909_v47 = vadd.f32 %v6802_v38, %v6720_v8  ;;  %v1914_v8 = vadd.f32 %v6802_v38, %v6724_v46 }
 0x27d   : > { %v6805_v62 = vpop.f32.mrb[78].mxu1 }
 0x27e   : > { %v1513_v36 = vadd.f32 %v6702_v0, %v1288_v20  ;;  %v2010_v56 = vpop.f32.mrb[79].mxu1 }
 0x27f   : > { %v4443_v60 = vpop.f32.mrb[64].mxu0  ;;  %v1954_v56 = vadd.f32 %v6802_v38, %v6756_v13 }
 0x280   : > { %1547 = vst [vmem:[#allocation2 + $0xf8] sm:$0xff] %v1513_v36  ;;  %v2124_v11 = vadd.f32 %v4443_v60, %v1899_v42  ;;  %v2118_v52 = vpop.f32.mrb[65].mxu0  ;;  %v1959_v42 = vadd.f32 %v6802_v38, %v6760_v50  ;;  %v1964_v50 = vadd.f32 %v6802_v38, %v6764_v48 }
 0x281   : > { %v6812_v24 = vpop.f32.mrb[80].mxu1  ;;  %v2119_v40 = vadd.f32 %v2118_v52, %v1894_v23  ;;  %v1969_v52 = vadd.f32 %v6802_v38, %v6768_v32 }
 0x282   : > { %2278 = vst [vmem:[#allocation3 + $0x8] sm:$0xff] %v2124_v11  ;;  %v2015_v1 = vpop.f32.mrb[81].mxu1 }
 0x283   : > { %2277 = vst [vmem:[#allocation3] sm:$0xff] %v2119_v40  ;;  %v4446_v0 = vpop.f32.mrb[66].mxu0 }
 0x284   : > { %v2134_v10 = vadd.f32 %v4446_v0, %v1909_v47  ;;  %v2128_v7 = vpop.f32.mrb[67].mxu0 }
 0x285   : > { %v6818_v26 = vpop.f32.mrb[82].mxu1  ;;  %v2129_v49 = vadd.f32 %v2128_v7, %v1904_v5 }
 0x286   : > { %2280 = vst [vmem:[#allocation3 + $0x18] sm:$0xff] %v2134_v10  ;;  %v2020_v12 = vpop.f32.mrb[83].mxu1  ;;  %v1979_v10 = vadd.f32 %v6802_v38, %v6776_v6  ;;  %v1989_v6 = vadd.f32 %v6802_v38, %v6784_v45 }
 0x287   : > { %2279 = vst [vmem:[#allocation3 + $0x10] sm:$0xff] %v2129_v49  ;;  %v4449_v28 = vpop.f32.mrb[68].mxu0  ;;  %v1974_v49 = vadd.f32 %v6802_v38, %v6772_v55  ;;  %v1984_v55 = vadd.f32 %v6802_v38, %v6780_v27 }
 0x288   : > { %v2144_v22 = vadd.f32 %v4449_v28, %v1919_v34  ;;  %v2138_v29 = vpop.f32.mrb[69].mxu0  ;;  %v2019_v34 = vadd.f32 %v6802_v38, %v6818_v26 }
 0x289   : > { %v6824_v39 = vpop.f32.mrb[84].mxu1  ;;  %v2139_v59 = vadd.f32 %v2138_v29, %v1914_v8  ;;  %v2014_v8 = vadd.f32 %v6802_v38, %v6812_v24 }
 0x28a   : > { %2282 = vst [vmem:[#allocation3 + $0x28] sm:$0xff] %v2144_v22  ;;  %v2025_v58 = vpop.f32.mrb[85].mxu1  ;;  %v2024_v24 = vadd.f32 %v6802_v38, %v6824_v39 }
 0x28b   : > { %2281 = vst [vmem:[#allocation3 + $0x20] sm:$0xff] %v2139_v59  ;;  %v4452_v9 = vpop.f32.mrb[70].mxu0 }
 0x28c   : > { %v2154_v37 = vadd.f32 %v4452_v9, %v1929_v15  ;;  %v2148_v63 = vpop.f32.mrb[71].mxu0 }
 0x28d   : > { %v2028_v46 = vpop.f32.mrb[86].mxu1  ;;  %v2149_v35 = vadd.f32 %v2148_v63, %v1924_v33  ;;  %v1999_v63 = vadd.f32 %v6802_v38, %v6792_v25 }
 0x28e   : > { %2284 = vst [vmem:[#allocation3 + $0x38] sm:$0xff] %v2154_v37  ;;  %v2030_v16 = vpop.f32.mrb[87].mxu1  ;;  %v2029_v26 = vadd.f32 %v6802_v38, %v2028_v46 }
 0x28f   : > { %2283 = vst [vmem:[#allocation3 + $0x30] sm:$0xff] %v2149_v35  ;;  %v4455_v2 = vpop.f32.mrb[72].mxu0 }
 0x290   : > { %v2164_v19 = vadd.f32 %v4455_v2, %v1939_v44  ;;  %v2158_v31 = vpop.f32.mrb[73].mxu0  ;;  %v1994_v44 = vadd.f32 %v6802_v38, %v6788_v18 }
 0x291   : > { %v6834_v61 = vpop.f32.mrb[88].mxu1  ;;  %v2159_v54 = vadd.f32 %v2158_v31, %v1934_v21 }
 0x292   : > { %2286 = vst [vmem:[#allocation3 + $0x48] sm:$0xff] %v2164_v19  ;;  %v2035_v57 = vpop.f32.mrb[89].mxu1  ;;  %v2034_v19 = vadd.f32 %v6802_v38, %v6834_v61 }
 0x293   : > { %2285 = vst [vmem:[#allocation3 + $0x40] sm:$0xff] %v2159_v54  ;;  %v4458_v41 = vpop.f32.mrb[74].mxu0  ;;  %v2009_v54 = vadd.f32 %v6802_v38, %v6805_v62  ;;  %v2004_v57 = vadd.f32 %v6802_v38, %v6796_v14 }
 0x294   : > { %v2174_v3 = vadd.f32 %v4458_v41, %v1949_v43  ;;  %v2168_v20 = vpop.f32.mrb[75].mxu0 }
 0x295   : > { %v2038_v53 = vpop.f32.mrb[90].mxu1  ;;  %v2169_v30 = vadd.f32 %v2168_v20, %v1944_v4 }
 0x296   : > { %2288 = vst [vmem:[#allocation3 + $0x58] sm:$0xff] %v2174_v3  ;;  %v2040_v36 = vpop.f32.mrb[91].mxu1  ;;  %v2039_v21 = vadd.f32 %v6802_v38, %v2038_v53 }
 0x297   : > { %2287 = vst [vmem:[#allocation3 + $0x50] sm:$0xff] %v2169_v30  ;;  %v4461_v17 = vpop.f32.mrb[76].mxu0 }
 0x298   : > { %v2184_v23 = vadd.f32 %v4461_v17, %v1959_v42  ;;  %v2178_v60 = vpop.f32.mrb[77].mxu0 }
 0x299   : > { %v6844_v11 = vpop.f32.mrb[92].mxu1  ;;  %v2179_v51 = vadd.f32 %v2178_v60, %v1954_v56 }
 0x29a   : > { %2290 = vst [vmem:[#allocation3 + $0x68] sm:$0xff] %v2184_v23  ;;  %v2045_v40 = vpop.f32.mrb[93].mxu1  ;;  %v2044_v53 = vadd.f32 %v6802_v38, %v6844_v11 }
 0x29b   : > { %2289 = vst [vmem:[#allocation3 + $0x60] sm:$0xff] %v2179_v51  ;;  %v4464_v47 = vpop.f32.mrb[78].mxu0 }
 0x29c   : > { %v2194_v1 = vadd.f32 %v4464_v47, %v1969_v52  ;;  %v2188_v5 = vpop.f32.mrb[79].mxu0 }
 0x29d   : > { %v2048_v13 = vpop.f32.mrb[94].mxu1  ;;  %v2189_v0 = vadd.f32 %v2188_v5, %v1964_v50 }
 0x29e   : > { %2292 = vst [vmem:[#allocation3 + $0x78] sm:$0xff] %v2194_v1  ;;  %v2050_v7 = vpop.f32.mrb[95].mxu1  ;;  %v2049_v3 = vadd.f32 %v6802_v38, %v2048_v13 }
 0x29f   : > { %2291 = vst [vmem:[#allocation3 + $0x70] sm:$0xff] %v2189_v0  ;;  %v4467_v32 = vpop.f32.mrb[80].mxu0 }
 0x2a0   : > { %v2204_v48 = vadd.f32 %v4467_v32, %v1979_v10  ;;  %v2198_v12 = vpop.f32.mrb[81].mxu0 }
 0x2a1   : > { %v2199_v28 = vadd.f32 %v2198_v12, %v1974_v49  ;;  %v4479_v22 = vpop.f32.mrb[96].mxu1 }
 0x2a2   : > { %2294 = vst [vmem:[#allocation3 + $0x88] sm:$0xff] %v2204_v48  ;;  %v2244_v29 = vadd.f32 %v4479_v22, %v2019_v34  ;;  %v2238_v59 = vpop.f32.mrb[97].mxu1 }
 0x2a3   : > { %2293 = vst [vmem:[#allocation3 + $0x80] sm:$0xff] %v2199_v28  ;;  %v2239_v15 = vadd.f32 %v2238_v59, %v2014_v8  ;;  %v4470_v58 = vpop.f32.mrb[82].mxu0 }
 0x2a4   : > { %2302 = vst [vmem:[#allocation3 + $0xc8] sm:$0xff] %v2244_v29  ;;  %v2214_v33 = vadd.f32 %v4470_v58, %v1989_v6  ;;  %v2208_v9 = vpop.f32.mrb[83].mxu0 }
 0x2a5   : > { %2301 = vst [vmem:[#allocation3 + $0xc0] sm:$0xff] %v2239_v15  ;;  %v2209_v37 = vadd.f32 %v2208_v9, %v1984_v55  ;;  %v4482_v45 = vpop.f32.mrb[98].mxu1 }
 0x2a6   : > { %2296 = vst [vmem:[#allocation3 + $0x98] sm:$0xff] %v2214_v33  ;;  %v2254_v35 = vadd.f32 %v4482_v45, %v2029_v26  ;;  %v2248_v27 = vpop.f32.mrb[99].mxu1 }
 0x2a7   : > { %2295 = vst [vmem:[#allocation3 + $0x90] sm:$0xff] %v2209_v37  ;;  %v2249_v46 = vadd.f32 %v2248_v27, %v2024_v24  ;;  %v4473_v16 = vpop.f32.mrb[84].mxu0 }
 0x2a8   : > { %2304 = vst [vmem:[#allocation3 + $0xd8] sm:$0xff] %v2254_v35  ;;  %v2224_v2 = vadd.f32 %v4473_v16, %v1999_v63  ;;  %v2218_v39 = vpop.f32.mrb[85].mxu0 }
 0x2a9   : > { %2303 = vst [vmem:[#allocation3 + $0xd0] sm:$0xff] %v2249_v46  ;;  %v2219_v31 = vadd.f32 %v2218_v39, %v1994_v44  ;;  %v4485_v25 = vpop.f32.mrb[100].mxu1 }
 0x2aa   : > { %2298 = vst [vmem:[#allocation3 + $0xa8] sm:$0xff] %v2224_v2  ;;  %v2264_v43 = vadd.f32 %v4485_v25, %v2039_v21  ;;  %v2258_v18 = vpop.f32.mrb[101].mxu1 }
 0x2ab   : > { %2297 = vst [vmem:[#allocation3 + $0xa0] sm:$0xff] %v2219_v31  ;;  %v2259_v4 = vadd.f32 %v2258_v18, %v2034_v19  ;;  %v4476_v41 = vpop.f32.mrb[86].mxu0 }
 0x2ac   : > { %2306 = vst [vmem:[#allocation3 + $0xe8] sm:$0xff] %v2264_v43  ;;  %v2234_v20 = vadd.f32 %v4476_v41, %v2009_v54  ;;  %v2228_v61 = vpop.f32.mrb[87].mxu0 }
 0x2ad   : > { %2305 = vst [vmem:[#allocation3 + $0xe0] sm:$0xff] %v2259_v4  ;;  %v2229_v30 = vadd.f32 %v2228_v61, %v2004_v57  ;;  %v4488_v62 = vpop.f32.mrb[102].mxu1 }
 0x2ae   : > { %2300 = vst [vmem:[#allocation3 + $0xb8] sm:$0xff] %v2234_v20  ;;  %v2274_v42 = vadd.f32 %v4488_v62, %v2049_v3  ;;  %v2268_v36 = vpop.f32.mrb[103].mxu1 }
 0x2af   : > { %2299 = vst [vmem:[#allocation3 + $0xb0] sm:$0xff] %v2229_v30  ;;  %v2269_v56 = vadd.f32 %v2268_v36, %v2044_v53 }
 0x2b0   : > { %2308 = vst [vmem:[#allocation3 + $0xf8] sm:$0xff] %v2274_v42 }
 0x2b1   : > { %2307 = vst [vmem:[#allocation3 + $0xf0] sm:$0xff] %v2269_v56 }
 0x2b2 PF: > { %v2582_v14 = vld [vmem:[#allocation11 + $0x80] sm:$0xff]  ;;  %v2583_v17 = vld [vmem:[#allocation11 + $0x88] sm:$0xff]  ;;  %s7767_s8 = sld [smem:[#allocation27_spill]]  ;;  %v2584_v11 = vld [vmem:[#allocation11 + $0x90] sm:$0xff]  ;;  %v2347_v27 = vlaneseq  ;;  %s7773_s14 = sld [smem:[#allocation40_spill]] }
 0x2b3   : > { %v2566_v23 = vld [vmem:[#allocation11] sm:$0xff]  ;;  %v4705_v60 = vpack.c.bf16 %v2583_v17, %v2582_v14  ;;  %v2567_v51 = vld [vmem:[#allocation11 + $0x8] sm:$0xff]  ;;  %v2585_v47 = vld [vmem:[#allocation11 + $0x98] sm:$0xff]  ;;  %s3569_s4 = sld [smem:[#allocation4]]  ;;  %s3723_s6 = sshll.u32 %s5877_s27, 4  ;;  %s7520_s6 = int_to_ptr.vmem [resolvable:$true] %s3723_s6 }
 0x2b4   : > { %v2598_v52 = vld [vmem:[#allocation11 + $0x100] sm:$0xff]  ;;  %v2599_v40 = vld [vmem:[#allocation11 + $0x108] sm:$0xff]  ;;  %v4707_v50 = vpack.c.bf16 %v2567_v51, %v2566_v23  ;;  %v2568_v1 = vld [vmem:[#allocation11 + $0x10] sm:$0xff]  ;;  %v4709_v5 = vpack.c.bf16 %v2585_v47, %v2584_v11  ;;  %v6903_v43 = vshrl.u32 %v2347_v27, 7  ;;  %s7774_s29 = sld [smem:[#allocation28_spill]] }
 0x2b5   : > { %v4737_v38 = vpack.c.bf16 %v2599_v40, %v2598_v52  ;;  %4706 = vmatprep.subr.bf16.mxu0 %v4705_v60  ;;  %v2569_v13 = vld [vmem:[#allocation11 + $0x18] sm:$0xff]  ;;  %v2600_v0 = vld [vmem:[#allocation11 + $0x110] sm:$0xff]  ;;  %v2586_v32 = vld [vmem:[#allocation11 + $0xa0] sm:$0xff] }
 0x2b6   : > { %v2601_v10 = vld [vmem:[#allocation11 + $0x118] sm:$0xff]  ;;  %4708 = vmatpush3.bf16.msra.mxu0 %v4707_v50  ;;  %v4711_v7 = vpack.c.bf16 %v2569_v13, %v2568_v1  ;;  %v2587_v34 = vld [vmem:[#allocation11 + $0xa8] sm:$0xff]  ;;  %v2570_v48 = vld [vmem:[#allocation11 + $0x20] sm:$0xff]  ;;  %vm2497_vm4 = vcmp.lt.s32.totalorder %v6903_v43, 7  ;;  %vm2396_vm6 = vcmp.lt.s32.totalorder %v6903_v43, 1  ;;  %vm2364_vm7 = vcmp.eq.s32.totalorder %v6903_v43, 0 }
 0x2b7   : > { %4738 = vmatprep.subr.bf16.mxu1 %v4737_v38  ;;  %v4741_v49 = vpack.c.bf16 %v2601_v10, %v2600_v0  ;;  %4710 = vmatprep.subr.bf16.mxu0 %v4709_v5  ;;  %v4713_v12 = vpack.c.bf16 %v2587_v34, %v2586_v32  ;;  %v2571_v8 = vld [vmem:[#allocation11 + $0x28] sm:$0xff]  ;;  %v2602_v28 = vld [vmem:[#allocation11 + $0x120] sm:$0xff]  ;;  %v2588_v29 = vld [vmem:[#allocation11 + $0xb0] sm:$0xff]  ;;  %v2447_v0 = vsub.s32 0, %v6903_v43 }
 0x2b8   : > { %s6880_s1 = sshll.u32 %s7767_s8, 7  ;;  %4740 = vmatpush3.bf16.msra.mxu1 %v4737_v38  ;;  %v2603_v22 = vld [vmem:[#allocation11 + $0x128] sm:$0xff]  ;;  %v2589_v59 = vld [vmem:[#allocation11 + $0xb8] sm:$0xff]  ;;  %v2604_v55 = vld [vmem:[#allocation11 + $0x130] sm:$0xff]  ;;  %v4715_v58 = vpack.c.bf16 %v2571_v8, %v2570_v48  ;;  %s3974_s21 = sshll.u32 %s7767_s8, 5 }
 0x2b9   : > { %4742 = vmatprep.subr.bf16.mxu1 %v4741_v49  ;;  %v4745_v6 = vpack.c.bf16 %v2603_v22, %v2602_v28  ;;  %v2605_v15 = vld [vmem:[#allocation11 + $0x138] sm:$0xff]  ;;  %s3958_s22 = sadd.s32 4294967295, %s6880_s1  ;;  %v4717_v26 = vpack.c.bf16 %v2589_v59, %v2588_v29  ;;  %v2572_v33 = vld [vmem:[#allocation11 + $0x30] sm:$0xff]  ;;  %v2590_v37 = vld [vmem:[#allocation11 + $0xc0] sm:$0xff]  ;;  %p2337_p2 = scmp.eq.s32.totalorder %s6880_s1, 0 }
 0x2ba   : > { %4712 = vmatpush3.bf16.msra.mxu0 %v4711_v7  ;;  %v2573_v9 = vld [vmem:[#allocation11 + $0x38] sm:$0xff]  ;;  %v4749_v24 = vpack.c.bf16 %v2605_v15, %v2604_v55  ;;  %v2591_v45 = vld [vmem:[#allocation11 + $0xc8] sm:$0xff]  ;;  %p6883_p9 = scmp.gt.s32.totalorder %s3958_s22, 0  ;;  %v2606_v63 = vld [vmem:[#allocation11 + $0x140] sm:$0xff]  ;;  %s6890_s19 = scalar_lea.vmem %s5847_s24, %s6880_s1 [#allocation5] }
 0x2bb   : > { %4714 = vmatprep.subr.bf16.mxu0 %v4713_v12  ;;  %v2607_v35 = vld [vmem:[#allocation11 + $0x148] sm:$0xff]  ;;  %v4719_v44 = vpack.c.bf16 %v2573_v9, %v2572_v33  ;;  %v4721_v46 = vpack.c.bf16 %v2591_v45, %v2590_v37  ;;  %v2574_v16 = vld [vmem:[#allocation11 + $0x40] sm:$0xff]  ;;  %v2592_v39 = vld [vmem:[#allocation11 + $0xd0] sm:$0xff]  ;;  %s6901_s30 = scalar_select %p2337_p2, 1, 0 }
 0x2bc   : > { %4744 = vmatpush3.bf16.msra.mxu1 %v4741_v49  ;;  %v2575_v21 = vld [vmem:[#allocation11 + $0x48] sm:$0xff]  ;;  %v4753_v2 = vpack.c.bf16 %v2607_v35, %v2606_v63  ;;  %v2593_v19 = vld [vmem:[#allocation11 + $0xd8] sm:$0xff]  ;;  %s7803_s22 = smov (!%p6883_p9, %s3958_s22), 0  ;;  %v2608_v31 = vld [vmem:[#allocation11 + $0x150] sm:$0xff]  ;;  %s6971_s13 = sadd.s32 128, %s6880_s1 }
 0x2bd   : > { %4746 = vmatprep.subr.bf16.mxu1 %v4745_v6  ;;  %v2609_v25 = vld [vmem:[#allocation11 + $0x158] sm:$0xff]  ;;  %v6897_v54 = vld [vmem:[%s6890_s19] sm:$0xff]  ;;  %v4723_v18 = vpack.c.bf16 %v2575_v21, %v2574_v16  ;;  %v4725_v4 = vpack.c.bf16 %v2593_v19, %v2592_v39  ;;  %v2576_v41 = vld [vmem:[#allocation11 + $0x50] sm:$0xff]  ;;  %s2330_s28 = scalar_lea.vmem %s5847_s24, %s7803_s22 [#allocation5]  ;;  %v2339_v56 = vstv %s6901_s30  ;;  %p2333_p13 = scmp.lt.s32.totalorder %s6971_s13, 255 }
 0x2be   : > { %4716 = vmatpush3.bf16.msra.mxu0 %v4715_v58  ;;  %v2481_v57 = vrot.slane %v6897_v54, 1  ;;  %2685 = vmatprep.mubr.f32.mxu0 %v6897_v54  ;;  %v2577_v3 = vld [vmem:[#allocation11 + $0x58] sm:$0xff]  ;;  %v6909_v20 = vld [vmem:[%s6890_s19 + $0x8] sm:$0xff]  ;;  %v4757_v61 = vpack.c.bf16 %v2609_v25, %v2608_v31  ;;  %v2594_v53 = vld [vmem:[#allocation11 + $0xe0] sm:$0xff]  ;;  %vm6922_vm5 = vcmp.eq.s32.totalorder %v2339_v56, 1  ;;  %v2380_v32 = vrot.slane %v6897_v54, 7 }
 0x2bf   : > { %4718 = vmatprep.subr.bf16.mxu0 %v4717_v26  ;;  %v2595_v30 = vld [vmem:[#allocation11 + $0xe8] sm:$0xff]  ;;  %v2482_v62 = vrot.slane %v6909_v20, 1  ;;  %v2610_v42 = vld [vmem:[#allocation11 + $0x160] sm:$0xff]  ;;  %v4727_v14 = vpack.c.bf16 %v2577_v3, %v2576_v41  ;;  %v2596_v52 = vld [vmem:[#allocation11 + $0xf0] sm:$0xff]  ;;  %p2342_p4 = scmp.eq.s32.totalorder %s6971_s13, 256  ;;  %s3967_s12 = sshll.u32 %s7774_s29, 6 }
 0x2c0   : > { %4748 = vmatpush3.bf16.msra.mxu1 %v4745_v6  ;;  %v2611_v36 = vld [vmem:[#allocation11 + $0x168] sm:$0xff]  ;;  %v4729_v23 = vpack.c.bf16 %v2595_v30, %v2594_v53  ;;  %v2578_v60 = vld [vmem:[#allocation11 + $0x60] sm:$0xff]  ;;  %v2597_v50 = vld [vmem:[#allocation11 + $0xf8] sm:$0xff]  ;;  %s7006_s25 = scalar_select %p2333_p13, %s6971_s13, 255 }
 0x2c1   : > { %4750 = vmatprep.subr.bf16.mxu1 %v4749_v24  ;;  %v2512_v17 = vsel %vm2497_vm4, %v2481_v57, %v2482_v62  ;;  %v2579_v51 = vld [vmem:[#allocation11 + $0x68] sm:$0xff]  ;;  %v4761_v40 = vpack.c.bf16 %v2611_v36, %v2610_v42  ;;  %v6920_v38 = vld [vmem:[%s6890_s19 + $0x78] sm:$0xff]  ;;  %v2331_v11 = vld [vmem:[%s2330_s28] sm:$0x1]  ;;  %v4733_v10 = vpack.c.bf16 %v2597_v50, %v2596_v52  ;;  %s2343_s3 = scalar_select %p2342_p4, 1, 0 }
 0x2c2   : > { %4720 = vmatpush3.bf16.msra.mxu0 %v4719_v44  ;;  %4521 = vmatprep.mubr.f32.mxu1 %v2512_v17  ;;  %v2612_v1 = vld [vmem:[#allocation11 + $0x170] sm:$0xff]  ;;  %v2613_v5 = vld [vmem:[#allocation11 + $0x178] sm:$0xff]  ;;  %v4731_v13 = vpack.c.bf16 %v2579_v51, %v2578_v60  ;;  %v2341_v34 = vsel %vm6922_vm5, 0.0, %v2331_v11  ;;  %v2395_v48 = vrot.slane %v6920_v38, 7  ;;  %v6948_v15 = vld [vmem:[%s6890_s19 + $0x20] sm:$0xff]  ;;  %s2335_s18 = scalar_lea.vmem %s5847_s24, %s7006_s25 [#allocation5]  ;;  %s3720_s11 = sadd.s32 %s3974_s21, %s3967_s12 }
 0x2c3   : > { %4722 = vmatprep.subr.bf16.mxu0 %v4721_v46  ;;  %v2580_v7 = vld [vmem:[#allocation11 + $0x70] sm:$0xff]  ;;  %v2581_v49 = vld [vmem:[#allocation11 + $0x78] sm:$0xff]  ;;  %v4765_v12 = vpack.c.bf16 %v2613_v5, %v2612_v1  ;;  %v2448_v6 = vrot.slane %v2341_v34, %v2447_v0  ;;  %v6951_v58 = vld [vmem:[%s6890_s19 + $0x28] sm:$0xff]  ;;  %v2485_v45 = vrot.slane %v6948_v15, 1  ;;  %v2384_v11 = vrot.slane %v6948_v15, 7  ;;  %s3968_s10 = sshll.u32 %s3720_s11, 7 }
 0x2c4   : > { %4752 = vmatpush3.bf16.msra.mxu1 %v4749_v24  ;;  %v6933_v8 = vld [vmem:[%s6890_s19 + $0x10] sm:$0xff]  ;;  %v6936_v28 = vld [vmem:[%s6890_s19 + $0x18] sm:$0xff]  ;;  %v4735_v22 = vpack.c.bf16 %v2581_v49, %v2580_v7  ;;  %v2412_v29 = vsel %vm2396_vm6, %v2395_v48, %v2380_v32  ;;  %v2927_v26 = vld [vmem:[#allocation2 + $0x80] sm:$0xff]  ;;  %v2381_v24 = vrot.slane %v6909_v20, 7  ;;  %v2486_v35 = vrot.slane %v6951_v58, 1  ;;  %s7775_s1 = sld [smem:[#allocation32_spill]] }
 0x2c5   : > { %4754 = vmatprep.subr.bf16.mxu1 %v4753_v2  ;;  %v2483_v59 = vrot.slane %v6933_v8, 1  ;;  %v2484_v55 = vrot.slane %v6936_v28, 1  ;;  %v2928_v33 = vld [vmem:[#allocation2 + $0x88] sm:$0xff]  ;;  %v2449_v9 = vsel %vm2364_vm7, %v2448_v6, %v2412_v29  ;;  %v6961_v27 = vld [vmem:[%s6890_s19 + $0x30] sm:$0xff]  ;;  %v2911_v46 = vld [vmem:[#allocation2] sm:$0xff]  ;;  %v2382_v31 = vrot.slane %v6933_v8, 7 }
 0x2c6   : > { %4724 = vmatpush3.bf16.msra.mxu0 %v4723_v18  ;;  %v4769_v44 = vpack.c.bf16 %v2928_v33, %v2927_v26  ;;  %v2912_v16 = vld [vmem:[#allocation2 + $0x8] sm:$0xff]  ;;  %v6964_v21 = vld [vmem:[%s6890_s19 + $0x38] sm:$0xff]  ;;  %v2411_v19 = vsel %vm2396_vm6, %v2380_v32, %v2381_v24  ;;  %v2487_v18 = vrot.slane %v6961_v27, 1  ;;  %v2508_v41 = vsel %vm2497_vm4, %v2485_v45, %v2486_v35  ;;  %v6998_v17 = vld [vmem:[%s6890_s19 + $0x50] sm:$0xff]  ;;  %s3689_s13 = scalar_lea.sflag [#allocation18], %s5871_s17  ;;  %s5274_s25 = scalar_lea.vmem %s7520_s6, 4096 }
 0x2c7   : > { %4726 = vmatprep.subr.bf16.mxu0 %v4725_v4  ;;  %v2511_v37 = vsel %vm2497_vm4, %v2482_v62, %v2483_v59  ;;  %v2510_v63 = vsel %vm2497_vm4, %v2483_v59, %v2484_v55  ;;  %v2930_v39 = vld [vmem:[#allocation2 + $0x98] sm:$0xff]  ;;  %v2509_v25 = vsel %vm2497_vm4, %v2484_v55, %v2485_v45  ;;  %v4771_v4 = vpack.c.bf16 %v2912_v16, %v2911_v46  ;;  %v6983_v53 = vld [vmem:[%s6890_s19 + $0x48] sm:$0xff]  ;;  %v2931_v52 = vld [vmem:[#allocation2 + $0xa0] sm:$0xff]  ;;  %p5275_p6 = scmp.ne.s32.totalorder %s7520_s6, %s5274_s25 }
 0x2c8   : > { %4756 = vmatpush3.bf16.msra.mxu1 %v4753_v2  ;;  %v2929_v2 = vld [vmem:[#allocation2 + $0x90] sm:$0xff]  ;;  %v2488_v3 = vrot.slane %v6964_v21, 1  ;;  %v2410_v30 = vsel %vm2396_vm6, %v2381_v24, %v2382_v31  ;;  %v2383_v62 = vrot.slane %v6936_v28, 7  ;;  %v2507_v42 = vsel %vm2497_vm4, %v2486_v35, %v2487_v18  ;;  %v2914_v60 = vld [vmem:[#allocation2 + $0x18] sm:$0xff]  ;;  %v7021_v7 = vld [vmem:[%s6890_s19 + $0x60] sm:$0xff] }
 0x2c9   : > { %4758 = vmatprep.subr.bf16.mxu1 %v4757_v61  ;;  %v7001_v51 = vld [vmem:[%s6890_s19 + $0x58] sm:$0xff]  ;;  %v2491_v1 = vrot.slane %v6998_v17, 1  ;;  %v7024_v32 = vld [vmem:[%s6890_s19 + $0x68] sm:$0xff]  ;;  %v7039_v59 = vld [vmem:[%s6890_s19 + $0x70] sm:$0xff]  ;;  %v2386_v45 = vrot.slane %v6961_v27, 7 }
 0x2ca   : > { %4728 = vmatpush3.bf16.msra.mxu0 %v4727_v14  ;;  %v2506_v56 = vsel %vm2497_vm4, %v2487_v18, %v2488_v3  ;;  %v2490_v14 = vrot.slane %v6983_v53, 1  ;;  %v2409_v50 = vsel %vm2396_vm6, %v2382_v31, %v2383_v62  ;;  %v2408_v34 = vsel %vm2396_vm6, %v2383_v62, %v2384_v11  ;;  %v2915_v55 = vld [vmem:[#allocation2 + $0x20] sm:$0xff]  ;;  %v2934_v24 = vld [vmem:[#allocation2 + $0xb8] sm:$0xff]  ;;  %v2925_v33 = vld [vmem:[#allocation2 + $0x70] sm:$0xff]  ;;  %p7778_p0 = scmp.ne.s32.totalorder %s7775_s1, 0 }
 0x2cb   : > { %4730 = vmatprep.subr.bf16.mxu0 %v4729_v23  ;;  %v2913_v23 = vld [vmem:[#allocation2 + $0x10] sm:$0xff]  ;;  %v2494_v29 = vrot.slane %v7024_v32, 1  ;;  %v2336_v26 = vld [vmem:[%s2335_s18] sm:$0x1]  ;;  %v2495_v35 = vrot.slane %v7039_v59, 1  ;;  %v2387_v31 = vrot.slane %v6964_v21, 7 }
 0x2cc   : > { %4760 = vmatpush3.bf16.msra.mxu1 %v4757_v61  ;;  %v4773_v61 = vpack.c.bf16 %v2930_v39, %v2929_v2  ;;  %v4775_v5 = vpack.c.bf16 %v2914_v60, %v2913_v23  ;;  %v2937_v23 = vld [vmem:[#allocation2 + $0xd0] sm:$0xff]  ;;  %v2938_v60 = vld [vmem:[#allocation2 + $0xd8] sm:$0xff]  ;;  %p5276_p5 = pnand %p5275_p6, %p7778_p0 }
 0x2cd   : > { %4762 = vmatprep.subr.bf16.mxu1 %v4761_v40 }
 0x2ce   : > { %4732 = vmatpush3.bf16.msra.mxu0 %v4731_v13  ;;  %p5277_p7 = pneg %p5276_p5 }
 0x2cf   : > { %4734 = vmatprep.subr.bf16.mxu0 %v4733_v10  ;;  %v2492_v10 = vrot.slane %v7001_v51, 1 }
 0x2d0   : > { %4764 = vmatpush3.bf16.msra.mxu1 %v4761_v40  ;;  %v2932_v40 = vld [vmem:[#allocation2 + $0xa8] sm:$0xff] }
 0x2d1   : > { %4766 = vmatprep.subr.bf16.mxu1 %v4765_v12  ;;  %v4777_v49 = vpack.c.bf16 %v2932_v40, %v2931_v52  ;;  %v2502_v6 = vsel %vm2497_vm4, %v2491_v1, %v2492_v10 }
 0x2d2   : > { %4736 = vmatpush3.bf16.msra.mxu0 %v4735_v22  ;;  %v2493_v22 = vrot.slane %v7021_v7, 1 }
 0x2d3   : > { %4770 = vmatprep.subr.bf16.mxu0 %v4769_v44  ;;  %v2363_v44 = vadd.s32 120, %v6903_v43 }
 0x2d4   : > { %4768 = vmatpush3.bf16.msra.mxu1 %v4765_v12  ;;  %v2385_v12 = vrot.slane %v6951_v58, 7  ;;  %v2500_v16 = vsel %vm2497_vm4, %v2493_v22, %v2494_v29 }
 0x2d5   : > { %2686 = vmatmul.mubr.f32.vlgmr.msra.gmra.mrb[0].mxu0 %v2449_v9  ;;  %v2933_v9 = vld [vmem:[#allocation2 + $0xb0] sm:$0xff]  ;;  %vm2480_vm9 = vcmp.eq.s32.totalorder %v2363_v44, 127 }
 0x2d6   : > { %2690 = vmatprep.mubr.f32.mxu0 %v6909_v20  ;;  %v6980_v20 = vld [vmem:[%s6890_s19 + $0x40] sm:$0xff]  ;;  %v4781_v39 = vpack.c.bf16 %v2934_v24, %v2933_v9  ;;  %v2926_v9 = vld [vmem:[#allocation2 + $0x78] sm:$0xff]  ;;  %s7776_s19 = sld [smem:[#allocation44_spill]] }
 0x2d7   : > { %4522 = vmatmul.mubr.f32.vlgmr.msra.gmra.mrb[0].mxu1 %v2511_v37  ;;  %v2489_v36 = vrot.slane %v6980_v20, 1  ;;  %v2407_v37 = vsel %vm2396_vm6, %v2384_v11, %v2385_v12  ;;  %v2388_v62 = vrot.slane %v6980_v20, 7  ;;  %v4799_v24 = vpack.c.bf16 %v2926_v9, %v2925_v33 }
 0x2d8   : > { %4524 = vmatprep.mubr.f32.mxu1 %v2510_v63  ;;  %v2501_v63 = vsel %vm2497_vm4, %v2492_v10, %v2493_v22  ;;  %v2924_v22 = vld [vmem:[#allocation2 + $0x68] sm:$0xff] }
 0x2d9   : > { %2691 = vmatmul.mubr.f32.gmra.mrb[2].mxu0 %v2411_v19  ;;  %v2505_v47 = vsel %vm2497_vm4, %v2488_v3, %v2489_v36  ;;  %v2504_v13 = vsel %vm2497_vm4, %v2489_v36, %v2490_v14  ;;  %v2406_v19 = vsel %vm2396_vm6, %v2385_v12, %v2386_v45  ;;  %v2918_v3 = vld [vmem:[#allocation2 + $0x38] sm:$0xff] }
 0x2da   : > { %2695 = vmatprep.mubr.f32.mxu0 %v6933_v8  ;;  %v2344_v8 = vstv %s2343_s3  ;;  %s5451_s3 = smov [#allocation17]  }
 0x2db   : > { %4525 = vmatmul.mubr.f32.gmra.mrb[2].mxu1 %v2509_v25  ;;  %4772 = vmatpush3.bf16.xpose.msra.mxu0 %v4771_v4  ;;  %vm7041_vm8 = vcmp.eq.s32.totalorder %v2344_v8, 1  ;;  %v2499_v25 = vsel %vm2497_vm4, %v2494_v29, %v2495_v35  ;;  %v2393_v8 = vrot.slane %v7024_v32, 7  ;;  %s5278_s18 = sshll.u32 %s5451_s3, 4  ;;  %s5279_s18 = int_to_ptr.vmem [resolvable:$false] %s5278_s18 }
 0x2dc   : > { %4527 = vmatprep.mubr.f32.mxu1 %v2508_v41  ;;  %4774 = vmatprep.subr.bf16.mxu0 %v4773_v61  ;;  %v2346_v2 = vsel %vm7041_vm8, 0.0, %v2336_v26  ;;  %v2917_v41 = vld [vmem:[#allocation2 + $0x30] sm:$0xff]  ;;  %v2935_v61 = vld [vmem:[#allocation2 + $0xc0] sm:$0xff]  ;;  %s7777_s30 = smov %s7776_s19  ;;  %s7529_s28 = scalar_lea.hbm %s7776_s19, %s3968_s10 }
 0x2dd   : > { %2696 = vmatmul.mubr.f32.gmra.mrb[4].mxu0 %v2410_v30  ;;  %v2549_v18 = vrot.slane %v2346_v2, %v2447_v0  ;;  %v2936_v30 = vld [vmem:[#allocation2 + $0xc8] sm:$0xff]  ;;  %v2405_v0 = vsel %vm2396_vm6, %v2386_v45, %v2387_v31  ;;  %v4783_v54 = vpack.c.bf16 %v2918_v3, %v2917_v41  ;;  %s5280_s24 = scalar_lea.vmem %s5279_s18, 8192  ;;  %p5281_p10 = scmp.lt.s32.totalorder %s7520_s6, %s5279_s18 }
 0x2de   : > { %2700 = vmatprep.mubr.f32.mxu0 %v6936_v28  ;;  %v2503_v28 = vsel %vm2497_vm4, %v2490_v14, %v2491_v1  ;;  %v4785_v36 = vpack.c.bf16 %v2936_v30, %v2935_v61  ;;  %v2920_v14 = vld [vmem:[#allocation2 + $0x48] sm:$0xff]  ;;  %v2921_v1 = vld [vmem:[#allocation2 + $0x50] sm:$0xff]  ;;  %p5282_p12 = scmp.lt.s32.totalorder %s5280_s24, %s5274_s25 }
 0x2df   : > { %4528 = vmatmul.mubr.f32.gmra.mrb[4].mxu1 %v2507_v42 }
 0x2e0   : > { %4530 = vmatprep.mubr.f32.mxu1 %v2506_v56  ;;  %v2389_v56 = vrot.slane %v6983_v53, 7  ;;  %p5283_p8 = por %p5282_p12, %p5281_p10 }
 0x2e1   : > { %2701 = vmatmul.mubr.f32.gmra.mrb[6].mxu0 %v2409_v50  ;;  %v4789_v50 = vpack.c.bf16 %v2938_v60, %v2937_v23 }
 0x2e2   : > { %2705 = vmatprep.mubr.f32.mxu0 %v6948_v15  ;;  %v2916_v15 = vld [vmem:[#allocation2 + $0x28] sm:$0xff]  ;;  %v2403_v52 = vsel %vm2396_vm6, %v2388_v62, %v2389_v56  ;;  %p5284_p11 = pnand %p5283_p8, %p5277_p7 }
 0x2e3   : > { %4531 = vmatmul.mubr.f32.gmra.mrb[6].mxu1 %v2505_v47  ;;  %4776 = vmatpush3.bf16.xpose.msra.mxu0 %v4775_v5  ;;  %v4779_v46 = vpack.c.bf16 %v2916_v15, %v2915_v55  ;;  %v2391_v47 = vrot.slane %v7001_v51, 7  ;;  %v2922_v5 = vld [vmem:[#allocation2 + $0x58] sm:$0xff]  ;;  %v2941_v55 = vld [vmem:[#allocation2 + $0xf0] sm:$0xff] }
 0x2e4   : > { %4533 = vmatprep.mubr.f32.mxu1 %v2504_v13  ;;  %4778 = vmatprep.subr.bf16.mxu0 %v4777_v49  ;;  %v2940_v13 = vld [vmem:[#allocation2 + $0xe8] sm:$0xff]  ;;  %v2392_v49 = vrot.slane %v7021_v7, 7  ;;  %v2942_v15 = vld [vmem:[#allocation2 + $0xf8] sm:$0xff] }
 0x2e5   : > { %2706 = vmatmul.mubr.f32.gmra.mrb[8].mxu0 %v2408_v34  ;;  %v4797_v26 = vpack.c.bf16 %v2942_v15, %v2941_v55 }
 0x2e6   : > { %2710 = vmatprep.mubr.f32.mxu0 %v6951_v58  ;;  %v2496_v58 = vrot.slane %v6920_v38, 1  ;;  %v2400_v12 = vsel %vm2396_vm6, %v2391_v47, %v2392_v49 }
 0x2e7   : > { %4534 = vmatmul.mubr.f32.gmra.mrb[8].mxu1 %v2503_v28  ;;  %v2923_v28 = vld [vmem:[#allocation2 + $0x60] sm:$0xff] }
 0x2e8   : > { %4536 = vmatprep.mubr.f32.mxu1 %v2502_v6  ;;  %v2498_v4 = vsel %vm2497_vm4, %v2495_v35, %v2496_v58  ;;  %v2394_v6 = vrot.slane %v7039_v59, 7  ;;  %v4795_v29 = vpack.c.bf16 %v2924_v22, %v2923_v28 }
 0x2e9   : > { %2711 = vmatmul.mubr.f32.gmra.mrb[10].mxu0 %v2407_v37 }
 0x2ea   : > { %2715 = vmatprep.mubr.f32.mxu0 %v6961_v27  ;;  %v2513_v27 = vsel %vm2497_vm4, %v2496_v58, %v2481_v57  ;;  %v2404_v57 = vsel %vm2396_vm6, %v2387_v31, %v2388_v62 }
 0x2eb   : > { %4537 = vmatmul.mubr.f32.gmra.mrb[10].mxu1 %v2501_v63  ;;  %4780 = vmatpush3.bf16.xpose.msra.mxu0 %v4779_v46  ;;  %v2565_v42 = vsel %vm2480_vm9, %v2549_v18, %v2513_v27  ;;  %v7111_v63 = vld [vmem:[%s7773_s14] ss:$0 sm:$0xff] }
 0x2ec   : > { %4539 = vmatprep.mubr.f32.mxu1 %v2500_v16  ;;  %4782 = vmatprep.subr.bf16.mxu0 %v4781_v39 }
 0x2ed   : > { %2716 = vmatmul.mubr.f32.gmra.mrb[12].mxu0 %v2406_v19 }
 0x2ee   : > { %2720 = vmatprep.mubr.f32.mxu0 %v6964_v21  ;;  %v2919_v21 = vld [vmem:[#allocation2 + $0x40] sm:$0xff] }
 0x2ef   : > { %4540 = vmatmul.mubr.f32.gmra.mrb[12].mxu1 %v2499_v25  ;;  %v4787_v40 = vpack.c.bf16 %v2920_v14, %v2919_v21 }
 0x2f0   : > { %4542 = vmatprep.mubr.f32.mxu1 %v2498_v4 }
 0x2f1   : > { %2721 = vmatmul.mubr.f32.gmra.mrb[14].mxu0 %v2405_v0 }
 0x2f2   : > { %2725 = vmatprep.mubr.f32.mxu0 %v6980_v20  ;;  %v2390_v20 = vrot.slane %v6998_v17, 7 }
 0x2f3   : > { %4543 = vmatmul.mubr.f32.gmra.mrb[14].mxu1 %v2565_v42  ;;  %4784 = vmatpush3.bf16.xpose.msra.mxu0 %v4783_v54 }
 0x2f4   : > { %4786 = vmatprep.subr.bf16.mxu0 %v4785_v36  ;;  %v2402_v11 = vsel %vm2396_vm6, %v2389_v56, %v2390_v20  ;;  %v2401_v10 = vsel %vm2396_vm6, %v2390_v20, %v2391_v47 }
 0x2f5   : > { %2726 = vmatmul.mubr.f32.gmra.mrb[16].mxu0 %v2404_v57 }
 0x2f6   : > { %2730 = vmatprep.mubr.f32.mxu0 %v6983_v53  ;;  %v2939_v53 = vld [vmem:[#allocation2 + $0xe0] sm:$0xff] }
 0x2f7   : > { %v4793_v34 = vpack.c.bf16 %v2940_v13, %v2939_v53 }
 0x2f9   : > { %2731 = vmatmul.mubr.f32.gmra.mrb[18].mxu0 %v2403_v52 }
 0x2fa   : > { %2735 = vmatprep.mubr.f32.mxu0 %v6998_v17  ;;  %v4791_v17 = vpack.c.bf16 %v2922_v5, %v2921_v1 }
 0x2fb   : > { %4788 = vmatpush3.bf16.xpose.msra.mxu0 %v4787_v40 }
 0x2fc   : > { %4790 = vmatprep.subr.bf16.mxu0 %v4789_v50 }
 0x2fd   : > { %2736 = vmatmul.mubr.f32.gmra.mrb[20].mxu0 %v2402_v11 }
 0x2fe   : > { %2740 = vmatprep.mubr.f32.mxu0 %v7001_v51  ;;  %v2399_v51 = vsel %vm2396_vm6, %v2392_v49, %v2393_v8 }
 0x301   : > { %2741 = vmatmul.mubr.f32.gmra.mrb[22].mxu0 %v2401_v10 }
 0x302   : > { %2745 = vmatprep.mubr.f32.mxu0 %v7021_v7  ;;  %v2398_v7 = vsel %vm2396_vm6, %v2393_v8, %v2394_v6 }
 0x303   : > { %4792 = vmatpush3.bf16.xpose.msra.mxu0 %v4791_v17 }
 0x304   : > { %4794 = vmatprep.subr.bf16.mxu0 %v4793_v34 }
 0x305   : > { %2746 = vmatmul.mubr.f32.gmra.mrb[24].mxu0 %v2400_v12 }
 0x306   : > { %2750 = vmatprep.mubr.f32.mxu0 %v7024_v32  ;;  %v2397_v32 = vsel %vm2396_vm6, %v2394_v6, %v2395_v48 }
 0x309   : > { %2751 = vmatmul.mubr.f32.gmra.mrb[26].mxu0 %v2399_v51 }
 0x30a   : > { %2755 = vmatprep.mubr.f32.mxu0 %v7039_v59 }
 0x30b   : > { %4796 = vmatpush3.bf16.xpose.msra.mxu0 %v4795_v29 }
 0x30c   : > { %4798 = vmatprep.subr.bf16.mxu0 %v4797_v26 }
 0x30d   : > { %2756 = vmatmul.mubr.f32.gmra.mrb[28].mxu0 %v2398_v7 }
 0x30e   : > { %2760 = vmatprep.mubr.f32.mxu0 %v6920_v38 }
 0x311   : > { %2761 = vmatmul.mubr.f32.gmra.mrb[30].mxu0 %v2397_v32 }
 0x313   : > { %4800 = vmatpush3.bf16.xpose.msra.mxu0 %v4799_v24 }
 0x3a8   : > { %v4105_v59 = vpop.f32.mrb[0].mxu0 }
 0x3a9   : > { %v4106_v37 = vpop.f32.mrb[1].mxu0 }
 0x3aa   : > { %v4523_v45 = vpop.f32.mrb[0].mxu1  ;;  %v4107_v38 = vadd.f32 %v4106_v37, %v4105_v59 }
 0x3ab   : > { %v2832_v43 = vpop.f32.mrb[1].mxu1 }
 0x3ac   : > { %v4108_v48 = vpop.f32.mrb[2].mxu0  ;;  %v2688_v35 = vadd.f32 %v4107_v38, %v7111_v63 }
 0x3ad   : > { %v4109_v44 = vpop.f32.mrb[3].mxu0 }
 0x3ae   : > { %v4526_v46 = vpop.f32.mrb[2].mxu1  ;;  %v2833_v16 = vadd.f32 %v2832_v43, %v2688_v35  ;;  %v4110_v58 = vadd.f32 %v4109_v44, %v4108_v48 }
 0x3af   : > { %v2842_v2 = vpop.f32.mrb[3].mxu1 }
 0x3b0   : > { %v2693_v39 = vadd.f32 %v4110_v58, %v7111_v63  ;;  %v4111_v19 = vpop.f32.mrb[4].mxu0  ;;  %4217 = vmatprep.mubr.f32.mxu0 %v2833_v16 }
 0x3b1   : > { %v4112_v31 = vpop.f32.mrb[5].mxu0  ;;  %4218 = vmatmul.mubr.f32.vlgmr.msra.gmra.mrb[32].mxu0 %v2833_v16 }
 0x3b2   : > { %v4529_v25 = vpop.f32.mrb[4].mxu1  ;;  %v4113_v18 = vadd.f32 %v4112_v31, %v4111_v19  ;;  %v2838_v4 = vadd.f32 %v4523_v45, %v2693_v39 }
 0x3b3   : > { %v2852_v27 = vpop.f32.mrb[5].mxu1 }
 0x3b4   : > { %v4114_v41 = vpop.f32.mrb[6].mxu0  ;;  %v2698_v3 = vadd.f32 %v4113_v18, %v7111_v63  ;;  %4219 = vmatprep.mubr.f32.mxu0 %v2838_v4 }
 0x3b5   : > { %v4115_v61 = vpop.f32.mrb[7].mxu0  ;;  %4220 = vmatmul.mubr.f32.gmra.mrb[34].mxu0 %v2838_v4 }
 0x3b6   : > { %v4532_v30 = vpop.f32.mrb[6].mxu1  ;;  %v2843_v0 = vadd.f32 %v2842_v2, %v2698_v3  ;;  %v4116_v62 = vadd.f32 %v4115_v61, %v4114_v41 }
 0x3b7   : > { %v2862_v42 = vpop.f32.mrb[7].mxu1 }
 0x3b8   : > { %v2703_v54 = vadd.f32 %v4116_v62, %v7111_v63  ;;  %v4117_v36 = vpop.f32.mrb[8].mxu0  ;;  %4221 = vmatprep.mubr.f32.mxu0 %v2843_v0 }
 0x3b9   : > { %v4118_v57 = vpop.f32.mrb[9].mxu0  ;;  %4222 = vmatmul.mubr.f32.gmra.mrb[36].mxu0 %v2843_v0 }
 0x3ba   : > { %v4535_v56 = vpop.f32.mrb[8].mxu1  ;;  %v4119_v21 = vadd.f32 %v4118_v57, %v4117_v36  ;;  %v2848_v14 = vadd.f32 %v4526_v46, %v2703_v54 }
 0x3bb   : > { %v2872_v23 = vpop.f32.mrb[9].mxu1 }
 0x3bc   : > { %v4120_v60 = vpop.f32.mrb[10].mxu0  ;;  %v2708_v52 = vadd.f32 %v4119_v21, %v7111_v63  ;;  %4223 = vmatprep.mubr.f32.mxu0 %v2848_v14 }
 0x3bd   : > { %v4121_v20 = vpop.f32.mrb[11].mxu0  ;;  %4224 = vmatmul.mubr.f32.gmra.mrb[38].mxu0 %v2848_v14 }
 0x3be   : > { %v4538_v40 = vpop.f32.mrb[10].mxu1  ;;  %v2853_v50 = vadd.f32 %v2852_v27, %v2708_v52  ;;  %v4122_v11 = vadd.f32 %v4121_v20, %v4120_v60  ;;  %v3408_v60 = vld [vmem:[#allocation3 + $0x80] sm:$0xff]  ;;  %v3409_v52 = vld [vmem:[#allocation3 + $0x88] sm:$0xff] }
 0x3bf   : > { %v2882_v47 = vpop.f32.mrb[11].mxu1  ;;  %v3392_v20 = vld [vmem:[#allocation3] sm:$0xff] }
 0x3c0   : > { %v2713_v1 = vadd.f32 %v4122_v11, %v7111_v63  ;;  %v4123_v5 = vpop.f32.mrb[12].mxu0  ;;  %4225 = vmatprep.mubr.f32.mxu0 %v2853_v50  ;;  %v3410_v11 = vld [vmem:[#allocation3 + $0x90] sm:$0xff] }
 0x3c1   : > { %v4124_v53 = vpop.f32.mrb[13].mxu0  ;;  %4226 = vmatmul.mubr.f32.gmra.mrb[40].mxu0 %v2853_v50  ;;  %v3393_v50 = vld [vmem:[#allocation3 + $0x8] sm:$0xff] }
 0x3c2   : > { %v4541_v13 = vpop.f32.mrb[12].mxu1  ;;  %v4125_v10 = vadd.f32 %v4124_v53, %v4123_v5  ;;  %v2858_v49 = vadd.f32 %v4529_v25, %v2713_v1  ;;  %v4803_v1 = vpack.c.bf16 %v3393_v50, %v3392_v20  ;;  %v3394_v53 = vld [vmem:[#allocation3 + $0x10] sm:$0xff] }
 0x3c3   : > { %v2892_v17 = vpop.f32.mrb[13].mxu1 }
 0x3c4   : > { %v4126_v34 = vpop.f32.mrb[14].mxu0  ;;  %v2718_v12 = vadd.f32 %v4125_v10, %v7111_v63  ;;  %4227 = vmatprep.mubr.f32.mxu0 %v2858_v49  ;;  %v3412_v10 = vld [vmem:[#allocation3 + $0xa0] sm:$0xff] }
 0x3c5   : > { %v4127_v8 = vpop.f32.mrb[15].mxu0  ;;  %4228 = vmatmul.mubr.f32.gmra.mrb[42].mxu0 %v2858_v49 }
 0x3c6   : > { %v7120_v28 = vpop.f32.mrb[14].mxu1  ;;  %v2863_v22 = vadd.f32 %v2862_v42, %v2718_v12  ;;  %v4128_v51 = vadd.f32 %v4127_v8, %v4126_v34  ;;  %v3396_v34 = vld [vmem:[#allocation3 + $0x20] sm:$0xff]  ;;  %v3397_v12 = vld [vmem:[#allocation3 + $0x28] sm:$0xff]  ;;  %v3414_v8 = vld [vmem:[#allocation3 + $0xb0] sm:$0xff] }
 0x3c7   : > { %v2902_v6 = vpop.f32.mrb[15].mxu1 }
 0x3c8   : > { %v2723_v29 = vadd.f32 %v4128_v51, %v7111_v63  ;;  %v4129_v7 = vpop.f32.mrb[16].mxu0  ;;  %4229 = vmatprep.mubr.f32.mxu0 %v2863_v22 }
 0x3c9   : > { %v4130_v32 = vpop.f32.mrb[17].mxu0  ;;  %4230 = vmatmul.mubr.f32.gmra.mrb[44].mxu0 %v2863_v22  ;;  %v4811_v22 = vpack.c.bf16 %v3397_v12, %v3396_v34 }
 0x3ca   : > { %v4131_v55 = vadd.f32 %v4130_v32, %v4129_v7  ;;  %v2868_v15 = vadd.f32 %v4532_v30, %v2723_v29  ;;  %v3399_v29 = vld [vmem:[#allocation3 + $0x38] sm:$0xff]  ;;  %v3416_v7 = vld [vmem:[#allocation3 + $0xc0] sm:$0xff]  ;;  %v3417_v32 = vld [vmem:[#allocation3 + $0xc8] sm:$0xff] }
 0x3cc   : > { %v4132_v26 = vpop.f32.mrb[18].mxu0  ;;  %v2728_v33 = vadd.f32 %v4131_v55, %v7111_v63  ;;  %4231 = vmatprep.mubr.f32.mxu0 %v2868_v15 }
 0x3cd   : > { %v4133_v9 = vpop.f32.mrb[19].mxu0  ;;  %4232 = vmatmul.mubr.f32.gmra.mrb[46].mxu0 %v2868_v15  ;;  %v4817_v15 = vpack.c.bf16 %v3417_v32, %v3416_v7 }
 0x3ce   : > { %v2873_v24 = vadd.f32 %v2872_v23, %v2728_v33  ;;  %v4134_v59 = vadd.f32 %v4133_v9, %v4132_v26 }
 0x3d0   : > { %v2733_v37 = vadd.f32 %v4134_v59, %v7111_v63  ;;  %v4135_v45 = vpop.f32.mrb[20].mxu0  ;;  %4233 = vmatprep.mubr.f32.mxu0 %v2873_v24 }
 0x3d1   : > { %v4136_v38 = vpop.f32.mrb[21].mxu0  ;;  %4234 = vmatmul.mubr.f32.gmra.mrb[48].mxu0 %v2873_v24 }
 0x3d2   : > { %v4137_v43 = vadd.f32 %v4136_v38, %v4135_v45  ;;  %v2878_v48 = vadd.f32 %v4535_v56, %v2733_v37 }
 0x3d4   : > { %v4138_v35 = vpop.f32.mrb[22].mxu0  ;;  %v2738_v44 = vadd.f32 %v4137_v43, %v7111_v63  ;;  %4235 = vmatprep.mubr.f32.mxu0 %v2878_v48 }
 0x3d5   : > { %v4139_v46 = vpop.f32.mrb[23].mxu0  ;;  %4236 = vmatmul.mubr.f32.gmra.mrb[50].mxu0 %v2878_v48 }
 0x3d6   : > { %v2883_v16 = vadd.f32 %v2882_v47, %v2738_v44  ;;  %v4140_v58 = vadd.f32 %v4139_v46, %v4138_v35  ;;  %v3411_v47 = vld [vmem:[#allocation3 + $0x98] sm:$0xff] }
 0x3d7   : > { %v4805_v5 = vpack.c.bf16 %v3411_v47, %v3410_v11  ;;  %v3420_v47 = vld [vmem:[#allocation3 + $0xe0] sm:$0xff] }
 0x3d8   : > { %v2743_v2 = vadd.f32 %v4140_v58, %v7111_v63  ;;  %v4141_v39 = vpop.f32.mrb[24].mxu0  ;;  %4237 = vmatprep.mubr.f32.mxu0 %v2883_v16 }
 0x3d9   : > { %v4142_v19 = vpop.f32.mrb[25].mxu0  ;;  %4238 = vmatmul.mubr.f32.gmra.mrb[52].mxu0 %v2883_v16 }
 0x3da   : > { %v4143_v31 = vadd.f32 %v4142_v19, %v4141_v39  ;;  %v2888_v25 = vadd.f32 %v4538_v40, %v2743_v2  ;;  %v4801_v40 = vpack.c.bf16 %v3409_v52, %v3408_v60 }
 0x3dc   : > { %v4144_v18 = vpop.f32.mrb[26].mxu0  ;;  %v2748_v4 = vadd.f32 %v4143_v31, %v7111_v63  ;;  %4239 = vmatprep.mubr.f32.mxu0 %v2888_v25  ;;  %4802 = vmatprep.subr.bf16.mxu1 %v4801_v40 }
 0x3dd   : > { %v4145_v27 = vpop.f32.mrb[27].mxu0  ;;  %4240 = vmatmul.mubr.f32.gmra.mrb[54].mxu0 %v2888_v25  ;;  %4804 = vmatpush3.bf16.msra.mxu1 %v4803_v1  ;;  %v3421_v1 = vld [vmem:[#allocation3 + $0xe8] sm:$0xff] }
 0x3de   : > { %v2893_v41 = vadd.f32 %v2892_v17, %v2748_v4  ;;  %v4146_v3 = vadd.f32 %v4145_v27, %v4144_v18  ;;  %4806 = vmatprep.subr.bf16.mxu1 %v4805_v5  ;;  %v4825_v5 = vpack.c.bf16 %v3421_v1, %v3420_v47 }
 0x3e0   : > { %v2753_v61 = vadd.f32 %v4146_v3, %v7111_v63  ;;  %v4147_v30 = vpop.f32.mrb[28].mxu0  ;;  %4241 = vmatprep.mubr.f32.mxu0 %v2893_v41  ;;  %v3400_v3 = vld [vmem:[#allocation3 + $0x40] sm:$0xff] }
 0x3e1   : > { %v4148_v0 = vpop.f32.mrb[29].mxu0  ;;  %4242 = vmatmul.mubr.f32.gmra.mrb[56].mxu0 %v2893_v41 }
 0x3e2   : > { %v4149_v62 = vadd.f32 %v4148_v0, %v4147_v30  ;;  %v2898_v42 = vadd.f32 %v4541_v13, %v2753_v61  ;;  %v3395_v13 = vld [vmem:[#allocation3 + $0x18] sm:$0xff]  ;;  %v3401_v61 = vld [vmem:[#allocation3 + $0x48] sm:$0xff] }
 0x3e3   : > { %v4807_v49 = vpack.c.bf16 %v3395_v13, %v3394_v53  ;;  %v3404_v53 = vld [vmem:[#allocation3 + $0x60] sm:$0xff]  ;;  %v3405_v13 = vld [vmem:[#allocation3 + $0x68] sm:$0xff] }
 0x3e4   : > { %v4150_v54 = vpop.f32.mrb[30].mxu0  ;;  %v2758_v36 = vadd.f32 %v4149_v62, %v7111_v63  ;;  %4243 = vmatprep.mubr.f32.mxu0 %v2898_v42  ;;  %v4819_v62 = vpack.c.bf16 %v3401_v61, %v3400_v3 }
 0x3e5   : > { %v4151_v57 = vpop.f32.mrb[31].mxu0  ;;  %4244 = vmatmul.mubr.f32.gmra.mrb[58].mxu0 %v2898_v42  ;;  %4808 = vmatpush3.bf16.msra.mxu1 %v4807_v49  ;;  %v4827_v49 = vpack.c.bf16 %v3405_v13, %v3404_v53 }
 0x3e6   : > { %v2903_v56 = vadd.f32 %v2902_v6, %v2758_v36  ;;  %v4152_v21 = vadd.f32 %v4151_v57, %v4150_v54  ;;  %v3398_v6 = vld [vmem:[#allocation3 + $0x30] sm:$0xff] }
 0x3e7   : > { %v4815_v55 = vpack.c.bf16 %v3399_v29, %v3398_v6  ;;  %v3418_v57 = vld [vmem:[#allocation3 + $0xd0] sm:$0xff]  ;;  %v3407_v6 = vld [vmem:[#allocation3 + $0x78] sm:$0xff] }
 0x3e8   : > { %v2763_v14 = vadd.f32 %v4152_v21, %v7111_v63  ;;  %4245 = vmatprep.mubr.f32.mxu0 %v2903_v56  ;;  %v3413_v63 = vld [vmem:[#allocation3 + $0xa8] sm:$0xff] }
 0x3e9   : > { %4246 = vmatmul.mubr.f32.gmra.mrb[60].mxu0 %v2903_v56  ;;  %v4809_v17 = vpack.c.bf16 %v3413_v63, %v3412_v10  ;;  %v3419_v56 = vld [vmem:[#allocation3 + $0xd8] sm:$0xff] }
 0x3ea   : > { %v2908_v23 = vadd.f32 %v7120_v28, %v2763_v14  ;;  %v3415_v28 = vld [vmem:[#allocation3 + $0xb8] sm:$0xff]  ;;  %v4821_v21 = vpack.c.bf16 %v3419_v56, %v3418_v57  ;;  %v3402_v14 = vld [vmem:[#allocation3 + $0x50] sm:$0xff] }
 0x3eb   : > { %4810 = vmatprep.subr.bf16.mxu1 %v4809_v17  ;;  %v4813_v51 = vpack.c.bf16 %v3415_v28, %v3414_v8  ;;  %v3422_v8 = vld [vmem:[#allocation3 + $0xf0] sm:$0xff]  ;;  %v3423_v28 = vld [vmem:[#allocation3 + $0xf8] sm:$0xff] }
 0x3ec   : > { %4247 = vmatprep.mubr.f32.mxu0 %v2908_v23  ;;  %4812 = vmatpush3.bf16.msra.mxu1 %v4811_v22  ;;  %v4829_v22 = vpack.c.bf16 %v3423_v28, %v3422_v8 }
 0x3ed   : > { %4248 = vmatmul.mubr.f32.gmra.mrb[62].mxu0 %v2908_v23  ;;  %4814 = vmatprep.subr.bf16.mxu1 %v4813_v51  ;;  %v3403_v23 = vld [vmem:[#allocation3 + $0x58] sm:$0xff]  ;;  %v3406_v51 = vld [vmem:[#allocation3 + $0x70] sm:$0xff] }
 0x3ee   : > { %v4823_v20 = vpack.c.bf16 %v3403_v23, %v3402_v14  ;;  %v4831_v32 = vpack.c.bf16 %v3407_v6, %v3406_v51 }
 0x3f0   : > { %4816 = vmatpush3.bf16.msra.mxu1 %v4815_v55 }
 0x3f1   : > { %4818 = vmatprep.subr.bf16.mxu1 %v4817_v15 }
 0x3f4   : > { %4820 = vmatpush3.bf16.msra.mxu1 %v4819_v62 }
 0x3f5   : > { %4822 = vmatprep.subr.bf16.mxu1 %v4821_v21 }
 0x3f8   : > { %4824 = vmatpush3.bf16.msra.mxu1 %v4823_v20 }
 0x3f9   : > { %4826 = vmatprep.subr.bf16.mxu1 %v4825_v5 }
 0x3fc   : > { %4828 = vmatpush3.bf16.msra.mxu1 %v4827_v49 }
 0x3fd   : > { %4830 = vmatprep.subr.bf16.mxu1 %v4829_v22 }
 0x400   : > { %4832 = vmatpush3.bf16.msra.mxu1 %v4831_v32 }
 0x484   : > { %v3009_v26 = vpop.f32.mrb[32].mxu0 }
 0x485   : > { %v7132_v33 = vmul.f32 0.088388346, %v3009_v26  ;;  %v3011_v9 = vpop.f32.mrb[33].mxu0 }
 0x486   : > { %v7134_v24 = vmul.f32 0.088388346, %v3011_v9 }
 0x488   : > { %v3015_v59 = vpop.f32.mrb[34].mxu0  ;;  %v3136_v37 = vmax.f32 %v7132_v33, %v7134_v24 }
 0x489   : > { %v7138_v45 = vmul.f32 0.088388346, %v3015_v59  ;;  %v3017_v38 = vpop.f32.mrb[35].mxu0 }
 0x48a   : > { %v7140_v43 = vmul.f32 0.088388346, %v3017_v38  ;;  %3137 = vmax.xlane.f32.xlu0 %v3136_v37 }
 0x48c   : > { %v3021_v48 = vpop.f32.mrb[36].mxu0  ;;  %v3139_v35 = vmax.f32 %v7138_v45, %v7140_v43 }
 0x48d   : > { %v7144_v44 = vmul.f32 0.088388346, %v3021_v48  ;;  %v3023_v46 = vpop.f32.mrb[37].mxu0 }
 0x48e   : > { %v7146_v16 = vmul.f32 0.088388346, %v3023_v46  ;;  %3140 = vmax.xlane.f32.xlu0 %v3139_v35 }
 0x490   : > { %v3027_v58 = vpop.f32.mrb[38].mxu0  ;;  %v3142_v2 = vmax.f32 %v7144_v44, %v7146_v16 }
 0x491   : > { %v7150_v39 = vmul.f32 0.088388346, %v3027_v58  ;;  %v3029_v19 = vpop.f32.mrb[39].mxu0 }
 0x492   : > { %v7152_v31 = vmul.f32 0.088388346, %v3029_v19  ;;  %3143 = vmax.xlane.f32.xlu1 %v3142_v2 }
 0x494   : > { %v3033_v25 = vpop.f32.mrb[40].mxu0  ;;  %v3145_v18 = vmax.f32 %v7150_v39, %v7152_v31 }
 0x495   : > { %v7156_v4 = vmul.f32 0.088388346, %v3033_v25  ;;  %v3035_v27 = vpop.f32.mrb[41].mxu0 }
 0x496   : > { %v7158_v41 = vmul.f32 0.088388346, %v3035_v27  ;;  %3146 = vmax.xlane.f32.xlu1 %v3145_v18 }
 0x498   : > { %v3039_v30 = vpop.f32.mrb[42].mxu0  ;;  %v3148_v0 = vmax.f32 %v7156_v4, %v7158_v41 }
 0x499   : > { %v7162_v42 = vmul.f32 0.088388346, %v3039_v30  ;;  %v3041_v54 = vpop.f32.mrb[43].mxu0 }
 0x49a   : > { %v7164_v36 = vmul.f32 0.088388346, %v3041_v54  ;;  %3149 = vmax.xlane.f32.xlu0 %v3148_v0 }
 0x49c   : > { %v3045_v60 = vpop.f32.mrb[44].mxu0  ;;  %v3151_v52 = vmax.f32 %v7162_v42, %v7164_v36 }
 0x49d   : > { %v7168_v40 = vmul.f32 0.088388346, %v3045_v60  ;;  %v3047_v50 = vpop.f32.mrb[45].mxu0 }
 0x49e   : > { %v7170_v11 = vmul.f32 0.088388346, %v3047_v50  ;;  %3152 = vmax.xlane.f32.xlu1 %v3151_v52 }
 0x4a0   : > { %v3051_v10 = vpop.f32.mrb[46].mxu0  ;;  %v3154_v63 = vmax.f32 %v7168_v40, %v7170_v11 }
 0x4a1   : > { %v7174_v17 = vmul.f32 0.088388346, %v3051_v10  ;;  %v3053_v34 = vpop.f32.mrb[47].mxu0 }
 0x4a2   : > { %v7176_v12 = vmul.f32 0.088388346, %v3053_v34  ;;  %3155 = vmax.xlane.f32.xlu0 %v3154_v63 }
 0x4a4   : > { %v3057_v29 = vpop.f32.mrb[48].mxu0  ;;  %v3157_v7 = vmax.f32 %v7174_v17, %v7176_v12 }
 0x4a5   : > { %v7180_v55 = vmul.f32 0.088388346, %v3057_v29  ;;  %v3059_v15 = vpop.f32.mrb[49].mxu0 }
 0x4a6   : > { %v7182_v26 = vmul.f32 0.088388346, %v3059_v15  ;;  %3158 = vmax.xlane.f32.xlu1 %v3157_v7 }
 0x4a8   : > { %v3063_v9 = vpop.f32.mrb[50].mxu0  ;;  %v3160_v59 = vmax.f32 %v7180_v55, %v7182_v26 }
 0x4a9   : > { %v7186_v37 = vmul.f32 0.088388346, %v3063_v9  ;;  %v3065_v38 = vpop.f32.mrb[51].mxu0 }
 0x4aa   : > { %v7188_v48 = vmul.f32 0.088388346, %v3065_v38  ;;  %3161 = vmax.xlane.f32.xlu0 %v3160_v59 }
 0x4ac   : > { %v3069_v35 = vpop.f32.mrb[52].mxu0  ;;  %v3163_v46 = vmax.f32 %v7186_v37, %v7188_v48 }
 0x4ad   : > { %v7192_v58 = vmul.f32 0.088388346, %v3069_v35  ;;  %v3071_v2 = vpop.f32.mrb[53].mxu0 }
 0x4ae   : > { %v7194_v19 = vmul.f32 0.088388346, %v3071_v2  ;;  %3164 = vmax.xlane.f32.xlu1 %v3163_v46 }
 0x4b0   : > { %v3075_v25 = vpop.f32.mrb[54].mxu0  ;;  %v3166_v18 = vmax.f32 %v7192_v58, %v7194_v19 }
 0x4b1   : > { %v7198_v27 = vmul.f32 0.088388346, %v3075_v25  ;;  %v3077_v3 = vpop.f32.mrb[55].mxu0 }
 0x4b2   : > { %v7200_v61 = vmul.f32 0.088388346, %v3077_v3  ;;  %3167 = vmax.xlane.f32.xlu0 %v3166_v18 }
 0x4b4   : > { %v3081_v30 = vpop.f32.mrb[56].mxu0  ;;  %v3169_v0 = vmax.f32 %v7198_v27, %v7200_v61 }
 0x4b5   : > { %v7204_v62 = vmul.f32 0.088388346, %v3081_v30  ;;  %v3083_v54 = vpop.f32.mrb[57].mxu0 }
 0x4b6   : > { %v7206_v57 = vmul.f32 0.088388346, %v3083_v54  ;;  %3170 = vmax.xlane.f32.xlu1 %v3169_v0 }
 0x4b8   : > { %v3087_v56 = vpop.f32.mrb[58].mxu0  ;;  %v3172_v21 = vmax.f32 %v7204_v62, %v7206_v57 }
 0x4b9   : > { %v7210_v14 = vmul.f32 0.088388346, %v3087_v56  ;;  %v3089_v23 = vpop.f32.mrb[59].mxu0 }
 0x4ba   : > { %v7212_v60 = vmul.f32 0.088388346, %v3089_v23  ;;  %3173 = vmax.xlane.f32.xlu0 %v3172_v21 }
 0x4bc   : > { %v3093_v52 = vpop.f32.mrb[60].mxu0  ;;  %v3175_v20 = vmax.f32 %v7210_v14, %v7212_v60 }
 0x4bd   : > { %v7216_v50 = vmul.f32 0.088388346, %v3093_v52  ;;  %v3095_v47 = vpop.f32.mrb[61].mxu0 }
 0x4be   : > { %v7218_v1 = vmul.f32 0.088388346, %v3095_v47  ;;  %3176 = vmax.xlane.f32.xlu1 %v3175_v20 }
 0x4c0   : > { %v3099_v5 = vpop.f32.mrb[62].mxu0  ;;  %v3178_v53 = vmax.f32 %v7216_v50, %v7218_v1 }
 0x4c1   : > { %v7222_v13 = vmul.f32 0.088388346, %v3099_v5  ;;  %v3101_v10 = vpop.f32.mrb[63].mxu0 }
 0x4c2   : > { %v7224_v63 = vmul.f32 0.088388346, %v3101_v10  ;;  %3179 = vmax.xlane.f32.xlu0 %v3178_v53 }
 0x4c4   : > { %v3181_v49 = vmax.f32 %v7222_v13, %v7224_v63 }
 0x4c6   : > { %3182 = vmax.xlane.f32.xlu1 %v3181_v49 }
 0x517   : > { %v3138_v34 = vpop.xlane.xlu0 %3137 }
 0x518   : > { %v3184_v8 = vsub.f32 %v7132_v33, %v3138_v34  ;;  %v3185_v28 = vsub.f32 %v7134_v24, %v3138_v34 }
 0x51a   : > { %v3216_v22 = vmul.f32 1.442695, %v3184_v8  ;;  %v3218_v51 = vmul.f32 1.442695, %v3185_v28 }
 0x51b   : > { %v3141_v6 = vpop.xlane.xlu0 %3140 }
 0x51c   : > { %5004 = vpow2.f32 %v3216_v22  ;;  %v3186_v29 = vsub.f32 %v7138_v45, %v3141_v6  ;;  %v3187_v7 = vsub.f32 %v7140_v43, %v3141_v6 }
 0x51d   : > { %5006 = vpow2.f32 %v3218_v51 }
 0x51e   : > { %v3220_v32 = vmul.f32 1.442695, %v3186_v29  ;;  %v3222_v15 = vmul.f32 1.442695, %v3187_v7 }
 0x51f   : > { %v3144_v9 = vpop.xlane.xlu1 %3143 }
 0x520   : > { %5008 = vpow2.f32 %v3220_v32  ;;  %v3188_v59 = vsub.f32 %v7144_v44, %v3144_v9  ;;  %v3189_v38 = vsub.f32 %v7146_v16, %v3144_v9 }
 0x521   : > { %5010 = vpow2.f32 %v3222_v15 }
 0x522   : > { %v3224_v33 = vmul.f32 1.442695, %v3188_v59  ;;  %v3226_v24 = vmul.f32 1.442695, %v3189_v38 }
 0x523   : > { %v3147_v35 = vpop.xlane.xlu1 %3146 }
 0x524   : > { %5012 = vpow2.f32 %v3224_v33  ;;  %v3190_v46 = vsub.f32 %v7150_v39, %v3147_v35  ;;  %v3191_v45 = vsub.f32 %v7152_v31, %v3147_v35 }
 0x525   : > { %5014 = vpow2.f32 %v3226_v24 }
 0x526   : > { %v7236_v43 = vpop.eup %5004  ;;  %v3228_v2 = vmul.f32 1.442695, %v3190_v46  ;;  %v3230_v25 = vmul.f32 1.442695, %v3191_v45 }
 0x527   : > { %v7238_v18 = vpop.eup %5006  ;;  %v3150_v3 = vpop.xlane.xlu0 %3149 }
 0x528   : > { %5016 = vpow2.f32 %v3228_v2  ;;  %3488 = vmatprep.mubr.f32.mxu1 %v7238_v18  ;;  %v3192_v44 = vsub.f32 %v7156_v4, %v3150_v3  ;;  %v3193_v16 = vsub.f32 %v7158_v41, %v3150_v3  ;;  %v3280_v39 = vadd.f32 %v7238_v18, %v7236_v43 }
 0x529   : > { %5018 = vpow2.f32 %v3230_v25  ;;  %3489 = vmatmul.mubr.f32.vlgmr.msra.gmra.mrb[16].mxu1 %v7236_v43 }
 0x52a   : > { %v7246_v31 = vpop.eup %5008  ;;  %v3232_v30 = vmul.f32 1.442695, %v3192_v44  ;;  %v3234_v0 = vmul.f32 1.442695, %v3193_v16  ;;  %3281 = vadd.xlane.f32.xlu0 %v3280_v39 }
 0x52b   : > { %v7248_v54 = vpop.eup %5010  ;;  %v3153_v56 = vpop.xlane.xlu1 %3152 }
 0x52c   : > { %5020 = vpow2.f32 %v3232_v30  ;;  %3493 = vmatprep.mubr.f32.mxu1 %v7248_v54  ;;  %v3194_v4 = vsub.f32 %v7162_v42, %v3153_v56  ;;  %v3195_v41 = vsub.f32 %v7164_v36, %v3153_v56  ;;  %v3283_v21 = vadd.f32 %v7248_v54, %v7246_v31 }
 0x52d   : > { %5022 = vpow2.f32 %v3234_v0  ;;  %3494 = vmatmul.mubr.f32.gmra.mrb[18].mxu1 %v7246_v31 }
 0x52e   : > { %v7256_v23 = vpop.eup %5012  ;;  %v3236_v52 = vmul.f32 1.442695, %v3194_v4  ;;  %v3238_v20 = vmul.f32 1.442695, %v3195_v41  ;;  %3284 = vadd.xlane.f32.xlu1 %v3283_v21 }
 0x52f   : > { %v7258_v47 = vpop.eup %5014  ;;  %v3156_v5 = vpop.xlane.xlu0 %3155 }
 0x530   : > { %5024 = vpow2.f32 %v3236_v52  ;;  %3498 = vmatprep.mubr.f32.mxu1 %v7258_v47  ;;  %v3196_v42 = vsub.f32 %v7168_v40, %v3156_v5  ;;  %v3197_v36 = vsub.f32 %v7170_v11, %v3156_v5  ;;  %v3286_v53 = vadd.f32 %v7258_v47, %v7256_v23 }
 0x531   : > { %5026 = vpow2.f32 %v3238_v20  ;;  %3499 = vmatmul.mubr.f32.gmra.mrb[20].mxu1 %v7256_v23 }
 0x532   : > { %v7266_v10 = vpop.eup %5016  ;;  %v3240_v49 = vmul.f32 1.442695, %v3196_v42  ;;  %v3242_v34 = vmul.f32 1.442695, %v3197_v36  ;;  %3287 = vadd.xlane.f32.xlu0 %v3286_v53 }
 0x533   : > { %v7268_v8 = vpop.eup %5018  ;;  %v3159_v28 = vpop.xlane.xlu1 %3158 }
 0x534   : > { %5028 = vpow2.f32 %v3240_v49  ;;  %3503 = vmatprep.mubr.f32.mxu1 %v7268_v8  ;;  %v3198_v40 = vsub.f32 %v7174_v17, %v3159_v28  ;;  %v3199_v11 = vsub.f32 %v7176_v12, %v3159_v28  ;;  %v3289_v22 = vadd.f32 %v7268_v8, %v7266_v10 }
 0x535   : > { %5030 = vpow2.f32 %v3242_v34  ;;  %3504 = vmatmul.mubr.f32.gmra.mrb[22].mxu1 %v7266_v10 }
 0x536   : > { %v7276_v51 = vpop.eup %5020  ;;  %v3244_v6 = vmul.f32 1.442695, %v3198_v40  ;;  %v3246_v29 = vmul.f32 1.442695, %v3199_v11  ;;  %3290 = vadd.xlane.f32.xlu1 %v3289_v22 }
 0x537   : > { %v7278_v7 = vpop.eup %5022  ;;  %v3162_v32 = vpop.xlane.xlu0 %3161 }
 0x538   : > { %5032 = vpow2.f32 %v3244_v6  ;;  %3508 = vmatprep.mubr.f32.mxu1 %v7278_v7  ;;  %v3200_v17 = vsub.f32 %v7180_v55, %v3162_v32  ;;  %v3201_v12 = vsub.f32 %v7182_v26, %v3162_v32  ;;  %v3292_v15 = vadd.f32 %v7278_v7, %v7276_v51 }
 0x539   : > { %5034 = vpow2.f32 %v3246_v29  ;;  %3509 = vmatmul.mubr.f32.gmra.mrb[24].mxu1 %v7276_v51 }
 0x53a   : > { %v7286_v9 = vpop.eup %5024  ;;  %v3248_v59 = vmul.f32 1.442695, %v3200_v17  ;;  %v3250_v38 = vmul.f32 1.442695, %v3201_v12  ;;  %3293 = vadd.xlane.f32.xlu0 %v3292_v15 }
 0x53b   : > { %v7288_v33 = vpop.eup %5026  ;;  %v3165_v24 = vpop.xlane.xlu1 %3164 }
 0x53c   : > { %5036 = vpow2.f32 %v3248_v59  ;;  %3513 = vmatprep.mubr.f32.mxu1 %v7288_v33  ;;  %v3202_v55 = vsub.f32 %v7186_v37, %v3165_v24  ;;  %v3203_v26 = vsub.f32 %v7188_v48, %v3165_v24  ;;  %v3295_v35 = vadd.f32 %v7288_v33, %v7286_v9 }
 0x53d   : > { %5038 = vpow2.f32 %v3250_v38  ;;  %3514 = vmatmul.mubr.f32.gmra.mrb[26].mxu1 %v7286_v9 }
 0x53e   : > { %v7296_v46 = vpop.eup %5028  ;;  %v3252_v45 = vmul.f32 1.442695, %v3202_v55  ;;  %v3254_v2 = vmul.f32 1.442695, %v3203_v26  ;;  %3296 = vadd.xlane.f32.xlu1 %v3295_v35 }
 0x53f   : > { %v7298_v25 = vpop.eup %5030  ;;  %v3168_v3 = vpop.xlane.xlu0 %3167 }
 0x540   : > { %5040 = vpow2.f32 %v3252_v45  ;;  %3518 = vmatprep.mubr.f32.mxu1 %v7298_v25  ;;  %v3204_v37 = vsub.f32 %v7192_v58, %v3168_v3  ;;  %v3205_v48 = vsub.f32 %v7194_v19, %v3168_v3  ;;  %v3298_v44 = vadd.f32 %v7298_v25, %v7296_v46 }
 0x541   : > { %5042 = vpow2.f32 %v3254_v2  ;;  %3519 = vmatmul.mubr.f32.gmra.mrb[28].mxu1 %v7296_v46 }
 0x542   : > { %v7306_v16 = vpop.eup %5032  ;;  %v3256_v39 = vmul.f32 1.442695, %v3204_v37  ;;  %v3258_v30 = vmul.f32 1.442695, %v3205_v48  ;;  %3299 = vadd.xlane.f32.xlu0 %v3298_v44 }
 0x543   : > { %v7308_v0 = vpop.eup %5034  ;;  %v3171_v56 = vpop.xlane.xlu1 %3170 }
 0x544   : > { %5044 = vpow2.f32 %v3256_v39  ;;  %3523 = vmatprep.mubr.f32.mxu1 %v7308_v0  ;;  %v3206_v58 = vsub.f32 %v7198_v27, %v3171_v56  ;;  %v3207_v19 = vsub.f32 %v7200_v61, %v3171_v56  ;;  %v3301_v4 = vadd.f32 %v7308_v0, %v7306_v16 }
 0x545   : > { %5046 = vpow2.f32 %v3258_v30  ;;  %3524 = vmatmul.mubr.f32.gmra.mrb[30].mxu1 %v7306_v16 }
 0x546   : > { %v7316_v41 = vpop.eup %5036  ;;  %v3260_v21 = vmul.f32 1.442695, %v3206_v58  ;;  %v3262_v52 = vmul.f32 1.442695, %v3207_v19  ;;  %3302 = vadd.xlane.f32.xlu1 %v3301_v4 }
 0x547   : > { %v7318_v20 = vpop.eup %5038  ;;  %v3174_v5 = vpop.xlane.xlu0 %3173 }
 0x548   : > { %5048 = vpow2.f32 %v3260_v21  ;;  %3528 = vmatprep.mubr.f32.mxu1 %v7318_v20  ;;  %v3208_v27 = vsub.f32 %v7204_v62, %v3174_v5  ;;  %v3209_v61 = vsub.f32 %v7206_v57, %v3174_v5  ;;  %v3304_v42 = vadd.f32 %v7318_v20, %v7316_v41 }
 0x549   : > { %5050 = vpow2.f32 %v3262_v52  ;;  %3529 = vmatmul.mubr.f32.gmra.mrb[32].mxu1 %v7316_v41 }
 0x54a   : > { %v7326_v36 = vpop.eup %5040  ;;  %v3264_v53 = vmul.f32 1.442695, %v3208_v27  ;;  %v3266_v49 = vmul.f32 1.442695, %v3209_v61  ;;  %3305 = vadd.xlane.f32.xlu0 %v3304_v42 }
 0x54b   : > { %v7328_v34 = vpop.eup %5042  ;;  %v3177_v28 = vpop.xlane.xlu1 %3176 }
 0x54c   : > { %5052 = vpow2.f32 %v3264_v53  ;;  %3533 = vmatprep.mubr.f32.mxu1 %v7328_v34  ;;  %v3210_v62 = vsub.f32 %v7210_v14, %v3177_v28  ;;  %v3211_v57 = vsub.f32 %v7212_v60, %v3177_v28  ;;  %v3307_v40 = vadd.f32 %v7328_v34, %v7326_v36 }
 0x54d   : > { %5054 = vpow2.f32 %v3266_v49  ;;  %3534 = vmatmul.mubr.f32.gmra.mrb[34].mxu1 %v7326_v36 }
 0x54e   : > { %v7336_v11 = vpop.eup %5044  ;;  %v3268_v22 = vmul.f32 1.442695, %v3210_v62  ;;  %v3270_v6 = vmul.f32 1.442695, %v3211_v57  ;;  %3308 = vadd.xlane.f32.xlu1 %v3307_v40 }
 0x54f   : > { %v7338_v29 = vpop.eup %5046  ;;  %v3180_v32 = vpop.xlane.xlu0 %3179 }
 0x550   : > { %5056 = vpow2.f32 %v3268_v22  ;;  %3538 = vmatprep.mubr.f32.mxu1 %v7338_v29  ;;  %v3212_v14 = vsub.f32 %v7216_v50, %v3180_v32  ;;  %v3213_v60 = vsub.f32 %v7218_v1, %v3180_v32  ;;  %v3310_v17 = vadd.f32 %v7338_v29, %v7336_v11 }
 0x551   : > { %5058 = vpow2.f32 %v3270_v6  ;;  %3539 = vmatmul.mubr.f32.gmra.mrb[36].mxu1 %v7336_v11 }
 0x552   : > { %v7346_v12 = vpop.eup %5048  ;;  %v3272_v15 = vmul.f32 1.442695, %v3212_v14  ;;  %v3274_v59 = vmul.f32 1.442695, %v3213_v60  ;;  %3311 = vadd.xlane.f32.xlu0 %v3310_v17 }
 0x553   : > { %v7348_v38 = vpop.eup %5050  ;;  %v3183_v24 = vpop.xlane.xlu1 %3182 }
 0x554   : > { %5060 = vpow2.f32 %v3272_v15  ;;  %3543 = vmatprep.mubr.f32.mxu1 %v7348_v38  ;;  %v3214_v50 = vsub.f32 %v7222_v13, %v3183_v24  ;;  %v3215_v1 = vsub.f32 %v7224_v63, %v3183_v24  ;;  %v3313_v55 = vadd.f32 %v7348_v38, %v7346_v12 }
 0x555   : > { %5062 = vpow2.f32 %v3274_v59  ;;  %3544 = vmatmul.mubr.f32.gmra.mrb[38].mxu1 %v7346_v12 }
 0x556   : > { %v7356_v26 = vpop.eup %5052  ;;  %v3276_v35 = vmul.f32 1.442695, %v3214_v50  ;;  %v3278_v45 = vmul.f32 1.442695, %v3215_v1  ;;  %3314 = vadd.xlane.f32.xlu1 %v3313_v55 }
 0x557   : > { %v7358_v2 = vpop.eup %5054 }
 0x558   : > { %5064 = vpow2.f32 %v3276_v35  ;;  %3548 = vmatprep.mubr.f32.mxu1 %v7358_v2  ;;  %v3316_v13 = vadd.f32 %v7358_v2, %v7356_v26 }
 0x559   : > { %5066 = vpow2.f32 %v3278_v45  ;;  %3549 = vmatmul.mubr.f32.gmra.mrb[40].mxu1 %v7356_v26 }
 0x55a   : > { %v7364_v63 = vpop.eup %5056  ;;  %3317 = vadd.xlane.f32.xlu0 %v3316_v13 }
 0x55b   : > { %v7366_v3 = vpop.eup %5058 }
 0x55c   : > { %3553 = vmatprep.mubr.f32.mxu1 %v7366_v3  ;;  %v3319_v37 = vadd.f32 %v7366_v3, %v7364_v63 }
 0x55d   : > { %3554 = vmatmul.mubr.f32.gmra.mrb[42].mxu1 %v7364_v63 }
 0x55e   : > { %v7372_v48 = vpop.eup %5060  ;;  %3320 = vadd.xlane.f32.xlu1 %v3319_v37 }
 0x55f   : > { %v7374_v44 = vpop.eup %5062 }
 0x560   : > { %3558 = vmatprep.mubr.f32.mxu1 %v7374_v44  ;;  %v3322_v39 = vadd.f32 %v7374_v44, %v7372_v48 }
 0x561   : > { %3559 = vmatmul.mubr.f32.gmra.mrb[44].mxu1 %v7372_v48 }
 0x562   : > { %v7380_v30 = vpop.eup %5064  ;;  %3323 = vadd.xlane.f32.xlu0 %v3322_v39 }
 0x563   : > { %v7382_v56 = vpop.eup %5066 }
 0x564   : > { %3563 = vmatprep.mubr.f32.mxu1 %v7382_v56  ;;  %v3325_v58 = vadd.f32 %v7382_v56, %v7380_v30 }
 0x565   : > { %3564 = vmatmul.mubr.f32.gmra.mrb[46].mxu1 %v7380_v30 }
 0x566   : > { %3326 = vadd.xlane.f32.xlu1 %v3325_v58 }
 0x5b7   : > { %v3282_v19 = vpop.xlane.xlu0 %3281 }
 0x5b8   : > { %5068 = vrcp.f32 %v3282_v19 }
 0x5bb   : > { %v3285_v4 = vpop.xlane.xlu1 %3284 }
 0x5bc   : > { %5070 = vrcp.f32 %v3285_v4 }
 0x5bf   : > { %v3288_v21 = vpop.xlane.xlu0 %3287 }
 0x5c0   : > { %5072 = vrcp.f32 %v3288_v21 }
 0x5c2   : > { %v5069_v52 = vpop.eup %5068 }
 0x5c3   : > { %v3344_v5 = vmul.f32 %v5069_v52, %v3282_v19  ;;  %v3291_v27 = vpop.xlane.xlu1 %3290 }
 0x5c4   : > { %5074 = vrcp.f32 %v3291_v27 }
 0x5c5   : > { %v3360_v61 = vsub.f32 2.0, %v3344_v5 }
 0x5c6   : > { %v5071_v42 = vpop.eup %5070 }
 0x5c7   : > { %v7388_v53 = vmul.f32 %v5069_v52, %v3360_v61  ;;  %v3345_v49 = vmul.f32 %v5071_v42, %v3285_v4  ;;  %v3294_v28 = vpop.xlane.xlu0 %3293 }
 0x5c8   : > { %5076 = vrcp.f32 %v3294_v28 }
 0x5c9   : > { %v3619_v62 = vmul.f32 %v7236_v43, %v7388_v53  ;;  %v3620_v57 = vmul.f32 %v7238_v18, %v7388_v53  ;;  %v3361_v40 = vsub.f32 2.0, %v3345_v49 }
 0x5ca   : > { %v5073_v22 = vpop.eup %5072 }
 0x5cb   : > { %3651 = vst [vmem:[%s5877_s27] sm:$0xff] %v3619_v62  ;;  %3652 = vst [vmem:[%s5877_s27 + $0x8] sm:$0xff] %v3620_v57  ;;  %v7396_v6 = vmul.f32 %v5071_v42, %v3361_v40  ;;  %v3346_v32 = vmul.f32 %v5073_v22, %v3288_v21  ;;  %v3297_v14 = vpop.xlane.xlu1 %3296 }
 0x5cc   : > { %5078 = vrcp.f32 %v3297_v14 }
 0x5cd   : > { %v3621_v60 = vmul.f32 %v7246_v31, %v7396_v6  ;;  %v3622_v43 = vmul.f32 %v7248_v54, %v7396_v6  ;;  %v3362_v17 = vsub.f32 2.0, %v3346_v32 }
 0x5ce   : > { %v5075_v15 = vpop.eup %5074 }
 0x5cf   : > { %3653 = vst [vmem:[%s5877_s27 + $0x10] sm:$0xff] %v3621_v60  ;;  %3654 = vst [vmem:[%s5877_s27 + $0x18] sm:$0xff] %v3622_v43  ;;  %v7404_v18 = vmul.f32 %v5073_v22, %v3362_v17  ;;  %v3347_v59 = vmul.f32 %v5075_v15, %v3291_v27  ;;  %v3300_v24 = vpop.xlane.xlu0 %3299 }
 0x5d0   : > { %5080 = vrcp.f32 %v3300_v24 }
 0x5d1   : > { %v3623_v50 = vmul.f32 %v7256_v23, %v7404_v18  ;;  %v3624_v31 = vmul.f32 %v7258_v47, %v7404_v18  ;;  %v3363_v1 = vsub.f32 2.0, %v3347_v59 }
 0x5d2   : > { %v5077_v55 = vpop.eup %5076 }
 0x5d3   : > { %3655 = vst [vmem:[%s5877_s27 + $0x20] sm:$0xff] %v3623_v50  ;;  %3656 = vst [vmem:[%s5877_s27 + $0x28] sm:$0xff] %v3624_v31  ;;  %v7412_v54 = vmul.f32 %v5075_v15, %v3363_v1  ;;  %v3348_v35 = vmul.f32 %v5077_v55, %v3294_v28  ;;  %v3303_v45 = vpop.xlane.xlu1 %3302 }
 0x5d4   : > { %5082 = vrcp.f32 %v3303_v45 }
 0x5d5   : > { %v3625_v13 = vmul.f32 %v7266_v10, %v7412_v54  ;;  %v3626_v23 = vmul.f32 %v7268_v8, %v7412_v54  ;;  %v3364_v37 = vsub.f32 2.0, %v3348_v35 }
 0x5d6   : > { %v5079_v39 = vpop.eup %5078 }
 0x5d7   : > { %3657 = vst [vmem:[%s5877_s27 + $0x30] sm:$0xff] %v3625_v13  ;;  %3658 = vst [vmem:[%s5877_s27 + $0x38] sm:$0xff] %v3626_v23  ;;  %v7420_v47 = vmul.f32 %v5077_v55, %v3364_v37  ;;  %v3349_v58 = vmul.f32 %v5079_v39, %v3297_v14  ;;  %v3306_v19 = vpop.xlane.xlu0 %3305 }
 0x5d8   : > { %5084 = vrcp.f32 %v3306_v19 }
 0x5d9   : > { %v3627_v4 = vmul.f32 %v7276_v51, %v7420_v47  ;;  %v3628_v10 = vmul.f32 %v7278_v7, %v7420_v47  ;;  %v3365_v21 = vsub.f32 2.0, %v3349_v58 }
 0x5da   : > { %v5081_v52 = vpop.eup %5080 }
 0x5db   : > { %3659 = vst [vmem:[%s5877_s27 + $0x40] sm:$0xff] %v3627_v4  ;;  %3660 = vst [vmem:[%s5877_s27 + $0x48] sm:$0xff] %v3628_v10  ;;  %v7428_v8 = vmul.f32 %v5079_v39, %v3365_v21  ;;  %v3350_v5 = vmul.f32 %v5081_v52, %v3300_v24  ;;  %v3309_v27 = vpop.xlane.xlu1 %3308 }
 0x5dc   : > { %5086 = vrcp.f32 %v3309_v27 }
 0x5dd   : > { %v3629_v61 = vmul.f32 %v7286_v9, %v7428_v8  ;;  %v3630_v51 = vmul.f32 %v7288_v33, %v7428_v8  ;;  %v3366_v42 = vsub.f32 2.0, %v3350_v5 }
 0x5de   : > { %v5083_v49 = vpop.eup %5082 }
 0x5df   : > { %3661 = vst [vmem:[%s5877_s27 + $0x50] sm:$0xff] %v3629_v61  ;;  %3662 = vst [vmem:[%s5877_s27 + $0x58] sm:$0xff] %v3630_v51  ;;  %v7436_v7 = vmul.f32 %v5081_v52, %v3366_v42  ;;  %v3351_v28 = vmul.f32 %v5083_v49, %v3303_v45  ;;  %v3312_v62 = vpop.xlane.xlu0 %3311 }
 0x5e0   : > { %5088 = vrcp.f32 %v3312_v62 }
 0x5e1   : > { %v3631_v57 = vmul.f32 %v7296_v46, %v7436_v7  ;;  %v3632_v9 = vmul.f32 %v7298_v25, %v7436_v7  ;;  %v3367_v40 = vsub.f32 2.0, %v3351_v28  ;;  %v7494_v28 = vstv %s3569_s4 }
 0x5e2   : > { %v5085_v22 = vpop.eup %5084 }
 0x5e3   : > { %3663 = vst [vmem:[%s5877_s27 + $0x60] sm:$0xff] %v3631_v57  ;;  %3664 = vst [vmem:[%s5877_s27 + $0x68] sm:$0xff] %v3632_v9  ;;  %v7444_v33 = vmul.f32 %v5083_v49, %v3367_v40  ;;  %v3352_v32 = vmul.f32 %v5085_v22, %v3306_v19  ;;  %v3315_v14 = vpop.xlane.xlu1 %3314 }
 0x5e4   : > { %5090 = vrcp.f32 %v3315_v14 }
 0x5e5   : > { %v3633_v60 = vmul.f32 %v7306_v16, %v7444_v33  ;;  %v3634_v46 = vmul.f32 %v7308_v0, %v7444_v33  ;;  %v3368_v43 = vsub.f32 2.0, %v3352_v32  ;;  %v3571_v32 = vmul.f32 %v7494_v28, %v7388_v53 }
 0x5e6   : > { %v5087_v17 = vpop.eup %5086 }
 0x5e7   : > { %3665 = vst [vmem:[%s5877_s27 + $0x70] sm:$0xff] %v3633_v60  ;;  %3666 = vst [vmem:[%s5877_s27 + $0x78] sm:$0xff] %v3634_v46  ;;  %v7452_v25 = vmul.f32 %v5085_v22, %v3368_v43  ;;  %v3353_v15 = vmul.f32 %v5087_v17, %v3309_v27  ;;  %v3318_v59 = vpop.xlane.xlu0 %3317 }
 0x5e8   : > { %5092 = vrcp.f32 %v3318_v59 }
 0x5e9   : > { %v3635_v24 = vmul.f32 %v7316_v41, %v7452_v25  ;;  %v3636_v16 = vmul.f32 %v7318_v20, %v7452_v25  ;;  %v3369_v50 = vsub.f32 2.0, %v3353_v15 }
 0x5ea   : > { %v5089_v31 = vpop.eup %5088 }
 0x5eb   : > { %3667 = vst [vmem:[%s5877_s27 + $0x80] sm:$0xff] %v3635_v24  ;;  %3668 = vst [vmem:[%s5877_s27 + $0x88] sm:$0xff] %v3636_v16  ;;  %v7460_v0 = vmul.f32 %v5087_v17, %v3369_v50  ;;  %v3354_v1 = vmul.f32 %v5089_v31, %v3312_v62  ;;  %v3321_v55 = vpop.xlane.xlu1 %3320 }
 0x5ec   : > { %5094 = vrcp.f32 %v3321_v55 }
 0x5ed   : > { %v3637_v35 = vmul.f32 %v7326_v36, %v7460_v0  ;;  %v3638_v41 = vmul.f32 %v7328_v34, %v7460_v0  ;;  %v3370_v45 = vsub.f32 2.0, %v3354_v1  ;;  %v3573_v1 = vmul.f32 %v7494_v28, %v7404_v18 }
 0x5ee   : > { %v5091_v13 = vpop.eup %5090 }
 0x5ef   : > { %3669 = vst [vmem:[%s5877_s27 + $0x90] sm:$0xff] %v3637_v35  ;;  %3670 = vst [vmem:[%s5877_s27 + $0x98] sm:$0xff] %v3638_v41  ;;  %v7468_v20 = vmul.f32 %v5089_v31, %v3370_v45  ;;  %v3355_v23 = vmul.f32 %v5091_v13, %v3315_v14  ;;  %v3324_v37 = vpop.xlane.xlu0 %3323 }
 0x5f0   : > { %5096 = vrcp.f32 %v3324_v37 }
 0x5f1   : > { %v3639_v39 = vmul.f32 %v7336_v11, %v7468_v20  ;;  %v3640_v36 = vmul.f32 %v7338_v29, %v7468_v20  ;;  %v3371_v58 = vsub.f32 2.0, %v3355_v23 }
 0x5f2   : > { %v5093_v19 = vpop.eup %5092 }
 0x5f3   : > { %3671 = vst [vmem:[%s5877_s27 + $0xa0] sm:$0xff] %v3639_v39  ;;  %3672 = vst [vmem:[%s5877_s27 + $0xa8] sm:$0xff] %v3640_v36  ;;  %v7476_v34 = vmul.f32 %v5091_v13, %v3371_v58  ;;  %v3356_v4 = vmul.f32 %v5093_v19, %v3318_v59  ;;  %v3327_v10 = vpop.xlane.xlu1 %3326  ;;  %v3572_v59 = vmul.f32 %v7494_v28, %v7396_v6 }
 0x5f4   : > { %5098 = vrcp.f32 %v3327_v10 }
 0x5f5   : > { %v3641_v21 = vmul.f32 %v7346_v12, %v7476_v34  ;;  %v3642_v11 = vmul.f32 %v7348_v38, %v7476_v34  ;;  %v3372_v52 = vsub.f32 2.0, %v3356_v4 }
 0x5f6   : > { %v5095_v29 = vpop.eup %5094 }
 0x5f7   : > { %3673 = vst [vmem:[%s5877_s27 + $0xb0] sm:$0xff] %v3641_v21  ;;  %3674 = vst [vmem:[%s5877_s27 + $0xb8] sm:$0xff] %v3642_v11  ;;  %v7484_v5 = vmul.f32 %v5093_v19, %v3372_v52  ;;  %v3357_v27 = vmul.f32 %v5095_v29, %v3321_v55 }
 0x5f9   : > { %v3643_v61 = vmul.f32 %v7356_v26, %v7484_v5  ;;  %v3644_v51 = vmul.f32 %v7358_v2, %v7484_v5  ;;  %v3373_v42 = vsub.f32 2.0, %v3357_v27 }
 0x5fa   : > { %v5097_v12 = vpop.eup %5096 }
 0x5fb   : > { %3675 = vst [vmem:[%s5877_s27 + $0xc0] sm:$0xff] %v3643_v61  ;;  %3676 = vst [vmem:[%s5877_s27 + $0xc8] sm:$0xff] %v3644_v51  ;;  %v7492_v38 = vmul.f32 %v5095_v29, %v3373_v42  ;;  %v3358_v49 = vmul.f32 %v5097_v12, %v3324_v37 }
 0x5fc   : > { %v4281_v62 = vpop.f32.mrb[16].mxu1 }
 0x5fd   : > { %v3645_v26 = vmul.f32 %v7364_v63, %v7492_v38  ;;  %v3646_v2 = vmul.f32 %v7366_v3, %v7492_v38  ;;  %v3374_v57 = vsub.f32 2.0, %v3358_v49  ;;  %v4282_v9 = vpop.f32.mrb[17].mxu1 }
 0x5fe   : > { %v5099_v40 = vpop.eup %5098  ;;  %v4283_v22 = vadd.f32 %v4282_v9, %v4281_v62 }
 0x5ff   : > { %3677 = vst [vmem:[%s5877_s27 + $0xd0] sm:$0xff] %v3645_v26  ;;  %3678 = vst [vmem:[%s5877_s27 + $0xd8] sm:$0xff] %v3646_v2  ;;  %v7506_v14 = vmul.f32 %v5097_v12, %v3374_v57  ;;  %v3359_v60 = vmul.f32 %v5099_v40, %v3327_v10 }
 0x600   : > { %v3587_v63 = vmul.f32 %v4283_v22, %v3571_v32  ;;  %v4284_v46 = vpop.f32.mrb[18].mxu1 }
 0x601   : > { %v3647_v3 = vmul.f32 %v7372_v48, %v7506_v14  ;;  %v3648_v43 = vmul.f32 %v7374_v44, %v7506_v14  ;;  %v3375_v17 = vsub.f32 2.0, %v3359_v60  ;;  %v4285_v15 = vpop.f32.mrb[19].mxu1 }
 0x602   : > { %3603 = vst [vmem:[%s5875_s16] sm:$0xff] %v3587_v63  ;;  %v4286_v53 = vadd.f32 %v4285_v15, %v4284_v46 }
 0x603   : > { %3679 = vst [vmem:[%s5877_s27 + $0xe0] sm:$0xff] %v3647_v3  ;;  %3680 = vst [vmem:[%s5877_s27 + $0xe8] sm:$0xff] %v3648_v43  ;;  %v7518_v24 = vmul.f32 %v5099_v40, %v3375_v17 }
 0x604   : > { %v3588_v48 = vmul.f32 %v4286_v53, %v3572_v59  ;;  %v4287_v16 = vpop.f32.mrb[20].mxu1 }
 0x605   : > { %v3649_v44 = vmul.f32 %v7380_v30, %v7518_v24  ;;  %v3650_v6 = vmul.f32 %v7382_v56, %v7518_v24  ;;  %v4288_v50 = vpop.f32.mrb[21].mxu1 }
 0x606   : > { %3604 = vst [vmem:[%s5875_s16 + $0x8] sm:$0xff] %v3588_v48  ;;  %v4289_v31 = vadd.f32 %v4288_v50, %v4287_v16 }
 0x607   : > { %3681 = vst [vmem:[%s5877_s27 + $0xf0] sm:$0xff] %v3649_v44  ;;  %3682 = vst [vmem:[%s5877_s27 + $0xf8] sm:$0xff] %v3650_v6 }
 0x608   : > { %v3589_v55 = vmul.f32 %v4289_v31, %v3573_v1  ;;  %v4290_v35 = vpop.f32.mrb[22].mxu1 }
 0x609   : > { %5287 = shalt.err (!%p5284_p11)
}
 0x60a   : > { %s5288_s27 = scalar_lea.hbm %s7529_s28, 4096  ;;  %s5292_s4 = scalar_lea.hbm %s7777_s30, 16384 }
 0x60b   : > { %p5289_p1 = scmp.ne.s32.totalorder %s7529_s28, %s5288_s27  ;;  %p5293_p2 = scmp.lt.u32.totalorder %s7529_s28, %s7777_s30 }
 0x60c   : > { %p5294_p13 = scmp.lt.u32.totalorder %s5292_s4, %s5288_s27  ;;  %p5296_p6 = scmp.lt.u32.totalorder %s5288_s27, %s7529_s28 }
 0x60d   : > { %p5290_p3 = pnand %p5289_p1, %p7778_p0 }
 0x60e   : > { %p5295_p4 = por %p5294_p13, %p5293_p2 }
 0x60f   : > { %p5291_p9 = pneg %p5290_p3 }
 0x610   : > { %p5297_p5 = por %p5296_p6, %p5295_p4 }
 0x612   : > { %p5298_p7 = pnand %p5297_p5, %p5291_p9 }
 0x614   : > { %5301 = shalt.err (!%p5298_p7)
}
 0x615   : > { %s5452_s11 = smov 256   ;;  %s5453_s10 = smov 16   ;;  %v4291_v30 = vpop.f32.mrb[23].mxu1  ;;  %3605 = vst [vmem:[%s5875_s16 + $0x10] sm:$0xff] %v3589_v55  ;;  %v3574_v18 = vmul.f32 %v7494_v28, %v7412_v54  ;;  %v3575_v37 = vmul.f32 %v7494_v28, %v7420_v47  ;;  %v3576_v4 = vmul.f32 %v7494_v28, %v7428_v8  ;;  %v3577_v52 = vmul.f32 %v7494_v28, %v7436_v7 }
 0x616   : > { %4868 = dma.vmem_to_hbm [thread:$0]  (%p7778_p0), %s7520_s6, 4096, %s7529_s28, %s3689_s13, %s5452_s11, %s5452_s11, %s5453_s10   ;;  %v4292_v56 = vadd.f32 %v4291_v30, %v4290_v35  ;;  %v4293_v45 = vpop.f32.mrb[24].mxu1  ;;  %v3578_v51 = vmul.f32 %v7494_v28, %v7444_v33  ;;  %v3579_v62 = vmul.f32 %v7494_v28, %v7452_v25  ;;  %v3580_v9 = vmul.f32 %v7494_v28, %v7460_v0 }
 0x617   : > { %v4294_v13 = vpop.f32.mrb[25].mxu1  ;;  %v3581_v60 = vmul.f32 %v7494_v28, %v7468_v20  ;;  %v3582_v0 = vmul.f32 %v7494_v28, %v7476_v34  ;;  %v3583_v20 = vmul.f32 %v7494_v28, %v7484_v5  ;;  %v3584_v6 = vmul.f32 %v7494_v28, %v7492_v38  ;;  %s3962_s6 = sshll.u32 %s7767_s8, 4  ;;  %s3963_s22 = sshll.u32 %s7774_s29, 5 }
 0x618   : > { %v3590_v41 = vmul.f32 %v4292_v56, %v3574_v18  ;;  %v4295_v23 = vadd.f32 %v4294_v13, %v4293_v45  ;;  %v4296_v36 = vpop.f32.mrb[26].mxu1  ;;  %s3701_s26 = sadd.s32 %s3963_s22, %s3962_s6  ;;  %v3585_v1 = vmul.f32 %v7494_v28, %v7506_v14  ;;  %s3704_s28 = sshll.u32 %s5875_s16, 4  ;;  %v3586_v56 = vmul.f32 %v7494_v28, %v7518_v24  ;;  %s7607_s28 = int_to_ptr.vmem [resolvable:$true] %s3704_s28 }
 0x619   : > { %v4297_v58 = vpop.f32.mrb[27].mxu1  ;;  %s3964_s19 = sshll.u32 %s3701_s26, 7  ;;  %s7779_s13 = sld [smem:[#allocation43_spill]] }
 0x61a   : > { %3606 = vst [vmem:[%s5875_s16 + $0x18] sm:$0xff] %v3590_v41  ;;  %v3591_v39 = vmul.f32 %v4295_v23, %v3575_v37  ;;  %v4298_v19 = vadd.f32 %v4297_v58, %v4296_v36  ;;  %v4299_v10 = vpop.f32.mrb[28].mxu1  ;;  %s3684_s3 = scalar_lea.sflag [#allocation7], %s5871_s17  ;;  %s5302_s18 = scalar_lea.vmem %s7607_s28, 2048 }
 0x61b   : > { %v4300_v21 = vpop.f32.mrb[29].mxu1  ;;  %p5303_p10 = scmp.ne.s32.totalorder %s7607_s28, %s5302_s18  ;;  %s5454_s24 = smov [#allocation16]  }
 0x61c   : > { %3607 = vst [vmem:[%s5875_s16 + $0x20] sm:$0xff] %v3591_v39  ;;  %v3592_v54 = vmul.f32 %v4298_v19, %v3576_v4  ;;  %v4301_v11 = vadd.f32 %v4300_v21, %v4299_v10  ;;  %v4302_v29 = vpop.f32.mrb[30].mxu1  ;;  %s5306_s27 = sshll.u32 %s5454_s24, 4  ;;  %s5307_s27 = int_to_ptr.vmem [resolvable:$false] %s5306_s27 }
 0x61d   : > { %v4303_v27 = vpop.f32.mrb[31].mxu1  ;;  %p5304_p12 = pnand %p5303_p10, %p7778_p0  ;;  %s5308_s15 = scalar_lea.vmem %s5307_s27, 4096 }
 0x61e   : > { %3608 = vst [vmem:[%s5875_s16 + $0x28] sm:$0xff] %v3592_v54  ;;  %v3593_v47 = vmul.f32 %v4301_v11, %v3577_v52  ;;  %v4304_v61 = vadd.f32 %v4303_v27, %v4302_v29  ;;  %v4305_v42 = vpop.f32.mrb[32].mxu1  ;;  %p5309_p11 = scmp.lt.s32.totalorder %s7607_s28, %s5307_s27  ;;  %p5310_p1 = scmp.lt.s32.totalorder %s5308_s15, %s5302_s18 }
 0x61f   : > { %v4306_v12 = vpop.f32.mrb[33].mxu1  ;;  %s7605_s25 = scalar_lea.hbm %s7779_s13, %s3964_s19  ;;  %p5305_p8 = pneg %p5304_p12 }
 0x620   : > { %3609 = vst [vmem:[%s5875_s16 + $0x30] sm:$0xff] %v3593_v47  ;;  %v3594_v8 = vmul.f32 %v4304_v61, %v3578_v51  ;;  %v4307_v49 = vadd.f32 %v4306_v12, %v4305_v42  ;;  %v4308_v26 = vpop.f32.mrb[34].mxu1  ;;  %p5311_p3 = por %p5310_p1, %p5309_p11 }
 0x621   : > { %v4309_v2 = vpop.f32.mrb[35].mxu1 }
 0x622   : > { %3610 = vst [vmem:[%s5875_s16 + $0x38] sm:$0xff] %v3594_v8  ;;  %v3595_v7 = vmul.f32 %v4307_v49, %v3579_v62  ;;  %v4310_v57 = vadd.f32 %v4309_v2, %v4308_v26  ;;  %p5312_p9 = pnand %p5311_p3, %p5305_p8 }
 0x624   : > { %3611 = vst [vmem:[%s5875_s16 + $0x40] sm:$0xff] %v3595_v7  ;;  %v3596_v33 = vmul.f32 %v4310_v57, %v3580_v9  ;;  %v4311_v40 = vpop.f32.mrb[36].mxu1 }
 0x625   : > { %v4312_v22 = vpop.f32.mrb[37].mxu1 }
 0x626   : > { %3612 = vst [vmem:[%s5875_s16 + $0x48] sm:$0xff] %v3596_v33  ;;  %v4313_v32 = vadd.f32 %v4312_v22, %v4311_v40 }
 0x628   : > { %v3597_v25 = vmul.f32 %v4313_v32, %v3581_v60  ;;  %v4314_v63 = vpop.f32.mrb[38].mxu1 }
 0x629   : > { %v4315_v46 = vpop.f32.mrb[39].mxu1 }
 0x62a   : > { %3613 = vst [vmem:[%s5875_s16 + $0x50] sm:$0xff] %v3597_v25  ;;  %v4316_v3 = vadd.f32 %v4315_v46, %v4314_v63 }
 0x62c   : > { %v3598_v43 = vmul.f32 %v4316_v3, %v3582_v0  ;;  %v4317_v17 = vpop.f32.mrb[40].mxu1 }
 0x62d   : > { %v4318_v15 = vpop.f32.mrb[41].mxu1 }
 0x62e   : > { %3614 = vst [vmem:[%s5875_s16 + $0x58] sm:$0xff] %v3598_v43  ;;  %v4319_v53 = vadd.f32 %v4318_v15, %v4317_v17 }
 0x630   : > { %v3599_v59 = vmul.f32 %v4319_v53, %v3583_v20  ;;  %v4320_v48 = vpop.f32.mrb[42].mxu1 }
 0x631   : > { %v4321_v16 = vpop.f32.mrb[43].mxu1 }
 0x632   : > { %3615 = vst [vmem:[%s5875_s16 + $0x60] sm:$0xff] %v3599_v59  ;;  %v4322_v44 = vadd.f32 %v4321_v16, %v4320_v48 }
 0x634   : > { %v3600_v34 = vmul.f32 %v4322_v44, %v3584_v6  ;;  %v4323_v50 = vpop.f32.mrb[44].mxu1 }
 0x635   : > { %v4324_v31 = vpop.f32.mrb[45].mxu1 }
 0x636   : > { %3616 = vst [vmem:[%s5875_s16 + $0x68] sm:$0xff] %v3600_v34  ;;  %v4325_v5 = vadd.f32 %v4324_v31, %v4323_v50 }
 0x638   : > { %v3601_v55 = vmul.f32 %v4325_v5, %v3585_v1  ;;  %v4326_v35 = vpop.f32.mrb[46].mxu1 }
 0x639   : > { %v4327_v30 = vpop.f32.mrb[47].mxu1 }
 0x63a   : > { %3617 = vst [vmem:[%s5875_s16 + $0x70] sm:$0xff] %v3601_v55  ;;  %v4328_v38 = vadd.f32 %v4327_v30, %v4326_v35 }
 0x63c   : > { %v3602_v14 = vmul.f32 %v4328_v38, %v3586_v56 }
 0x63e   : > { %3618 = vst [vmem:[%s5875_s16 + $0x78] sm:$0xff] %v3602_v14 }
 0x63f   : > { %5315 = shalt.err (!%p5312_p9)
}
 0x640   : > { %s5316_s16 = scalar_lea.hbm %s7605_s25, 2048  ;;  %s5320_s21 = scalar_lea.hbm %s7779_s13, 8192 }
 0x641   : > { %p5317_p2 = scmp.ne.s32.totalorder %s7605_s25, %s5316_s16  ;;  %p5321_p6 = scmp.lt.u32.totalorder %s7605_s25, %s7779_s13 }
 0x642   : > { %p5322_p5 = scmp.lt.u32.totalorder %s5320_s21, %s5316_s16  ;;  %p5324_p10 = scmp.lt.u32.totalorder %s5316_s16, %s7605_s25 }
 0x643   : > { %p5318_p13 = pnand %p5317_p2, %p7778_p0 }
 0x644   : > { %p5323_p7 = por %p5322_p5, %p5321_p6 }
 0x645   : > { %p5319_p4 = pneg %p5318_p13 }
 0x646   : > { %p5325_p12 = por %p5324_p10, %p5323_p7 }
 0x648   : > { %p5326_p8 = pnand %p5325_p12, %p5319_p4 }
 0x64a   : > { %5329 = shalt.err (!%p5326_p8)
}
 0x64b   : > { %s5455_s10 = smov 128   ;;  %s5456_s6 = smov 8  }
 0x64c   : > { %4867 = dma.vmem_to_hbm [thread:$0]  (%p7778_p0), %s7607_s28, 2048, %s7605_s25, %s3684_s3, %s5455_s10, %s5455_s10, %s5456_s6  }
 0x64d PF: > { %s7780_s22 = sld [smem:[#allocation31_spill]]  ;;  %s7781_s26 = sld [smem:[#allocation25_spill]] }
 0x64e   : > { %s7782_s19 = sld [smem:[#allocation33_spill]] }
 0x653   : > { %p4905_p11 = scmp.ge.s32.totalorder %s7780_s22, 2  ;;  %s3738_s8 = sand.u32 1, %s7781_s26  }
 0x654   : > { %p7783_p1 = scmp.ne.s32.totalorder %s7782_s19, 0  ;;  %s3739_s29 = scalar_lea.sflag [#allocation7], %s3738_s8 }
 0x656   : > { %p4892_p3 = pnand %p4905_p11, %p7783_p1 }
 0x658   : > { %5391 = dma.done.wait (!%p4892_p3), %s3739_s29, 2048  }
 0x659   : > { %5393 = vsyncadd (!%p4892_p3), %s3739_s29, 4294965248  ;;  %s3748_s18 = scalar_lea.sflag [#allocation18], %s3738_s8 }
 0x65a   : > { %5395 = dma.done.wait (!%p4892_p3), %s3748_s18, 4096  }
 0x65b   : > { %5397 = vsyncadd (!%p4892_p3), %s3748_s18, 4294963200  ;;  %s37_s28 = sadd.s32 1, %s7780_s22   ;;  %s7784_s17 = sld [smem:[#allocation26_spill]] }
 0x65c   : > { %p34_p9 = scmp.ge.s32.totalorder %s37_s28, 6   ;;  %s7785_s21 = sld [smem:[#allocation37_spill]] }
 0x65d   : > { %s7786_s1 = sld [smem:[#allocation36_spill]]  ;;  %s7787_s24 = sld [smem:[#allocation29_spill]] }
 0x65e   : > { %s7788_s25 = sld [smem:[#allocation30_spill]]  ;;  %s7789_s26 = sld [smem:[#allocation34_spill]] }
 0x65f   : > { %s7790_s27 = sld [smem:[#allocation35_spill]]  ;;  %s7791_s19 = smov %s5404_s20 }
 0x660   : > { %s7793_s22 = smov %s5416_s23  ;;  %s7794_s23 = smov %s5420_s9 }
 0x661   : > { %s7792_s20 = smov %s7784_s17  ;;  %36 = sbr.rel (!%p34_p9) target bundleno = 24 (0x18), region = 165 }
 0x663   : > { %s7795_s9 = smov %s7786_s1 }
 0x668   :  { %3753 = vsyncpa [#allocation6], 1 }
 0x669   :  { %3755 = vsyncpa [#allocation6 + $0x1], 1 }
 0x66a   :  { %3756 = vsyncpa [#allocation9], 1 }
 0x66b   :  { %3758 = vsyncpa [#allocation9 + $0x1], 1 }
 0x66c   :  { %3759 = vsyncpa [#allocation12], 1 }
 0x66d   :  { %3760 = vsyncpa [#allocation15], 1 }
 0x66e   :  { %3761 = vsyncpa [#allocation7], 1 }
 0x66f   :  { %3763 = vsyncpa [#allocation7 + $0x1], 1 }
 0x670   :  { %3764 = vsyncpa [#allocation18], 1 }
 0x671   :  { %3766 = vsyncpa [#allocation18 + $0x1], 1 }

</bundles_post_ra>
